<compile_context>
chip_gen: v5e
topology: v5e:2x2
jax: 0.10.0
libtpu: 0.0.40
codegen_flags: <defaults>
</compile_context>

<pallas_src>
import jax
import jax.numpy as jnp
from jax import lax
from jax.experimental import pallas as pl
from jax.experimental.pallas import tpu as pltpu
import numpy as np

VOCAB_SIZE = 3004                                   # as in the PyTorch module
VOCAB_PAD = ((VOCAB_SIZE + 127) // 128) * 128       # 3072, lane-aligned
HIDDEN = 32                                         # small demo hidden_size
INPUT_SIZE = 32
BATCH = 2
SEQ = 8
LAYER = 1
NEG = -1e30                                         # "-inf" for padded logits


# ----------------------------------------------------------------------------
# Fused kernel: LSTM (unrolled) -> Linear -> LogSoftmax -> argmax indices
# Gate column order inside the kernel is (i, f, o, g)  [pre-reordered params].
# ----------------------------------------------------------------------------
def decoder_kernel(x_ref, h0_ref, c0_ref, wih_ref, whh_ref, b_ref,
                   wout_ref, bout_ref,
                   res_ref, idx_ref, hn_ref, cn_ref,
                   hseq_ref):
    B, T, H = hseq_ref.shape
    N = B * T
    V = res_ref.shape[-1]          # 3004
    VP = wout_ref.shape[-1]        # 3072 (lane padded)

    # ---- one MXU call for all timesteps' input projections (+ bias) --------
    xproj = (jnp.dot(x_ref[...], wih_ref[...],
                     preferred_element_type=jnp.float32)
             + b_ref[...])                               # (N, 4H), rows (b, t)
    xproj = xproj.reshape(B, T, 4 * H)

    # ---- recurrence: fully unrolled, weights hoisted ------------------------
    whh = whh_ref[...]
    h = h0_ref[...]                                      # (B, H)
    c = c0_ref[...]
    for t in range(T):                                   # T static -> unrolled
        gates = xproj[:, t, :] + jnp.dot(h, whh,
                                         preferred_element_type=jnp.float32)
        sig = jax.nn.sigmoid(gates[:, :3 * H])           # i | f | o grouped
        g = jnp.tanh(gates[:, 3 * H:])
        c = sig[:, H:2 * H] * c + sig[:, :H] * g
        h = sig[:, 2 * H:3 * H] * jnp.tanh(c)
        hseq_ref[:, t, :] = h                            # static index store

    hn_ref[...] = h
    cn_ref[...] = c

    # ---- head: Linear -> LogSoftmax -> argmax (vocab padded to 128 lanes) ---
    hmat = hseq_ref[...].reshape(N, H)                   # batch-major (b, t)
    logits = (jnp.dot(hmat, wout_ref[...],
                      preferred_element_type=jnp.float32)
              + bout_ref[...])                           # (N, VP); pad = -1e30
    m = jnp.max(logits, axis=-1, keepdims=True)
    shifted = logits - m
    lse = jnp.log(jnp.sum(jnp.exp(shifted), axis=-1, keepdims=True))
    logp = shifted - lse
    res_ref[...] = logp[:, :V]

    # argmax over vocab (first max wins, like torch.max(result, 1)[1]);
    # reuse `m` instead of re-reducing logp (removes one V-wide reduction).
    col = lax.broadcasted_iota(jnp.int32, logits.shape, 1)
    is_max = logits == m
    idx_ref[...] = jnp.min(jnp.where(is_max, col, VP), axis=-1, keepdims=True)


# ----------------------------------------------------------------------------
# Wrapper
# ----------------------------------------------------------------------------
def decoder_forward(kparams, data, hidden):
    """data: (B, T, input_size) f32; hidden: (h0, c0) each (1, B, H)."""
    h0, c0 = hidden
    B, T, _ = data.shape
    H = kparams["w_hh_t"].shape[0]
    N = B * T

    x2d = data.reshape(N, -1)        # free XLA reshape, batch-major rows (b,t)
    vmem = pl.BlockSpec(memory_space=pltpu.MemorySpace.VMEM)

    result, idx, hn, cn = pl.pallas_call(
        decoder_kernel,
        out_shape=(jax.ShapeDtypeStruct((N, VOCAB_SIZE), jnp.float32),
                   jax.ShapeDtypeStruct((N, 1), jnp.int32),
                   jax.ShapeDtypeStruct((B, H), jnp.float32),
                   jax.ShapeDtypeStruct((B, H), jnp.float32)),
        in_specs=[vmem] * 8,
        out_specs=(vmem, vmem, vmem, vmem),
        scratch_shapes=[pltpu.VMEM((B, T, H), jnp.float32)],
    )(x2d, h0[0], c0[0],
      kparams["w_ih_t"], kparams["w_hh_t"], kparams["b"],
      kparams["w_out_t"], kparams["b_out"])

    # Data-dependent 16-row embedding lookup done at the XLA level (cheaper
    # than a one-hot @ table matmul and avoids DMA-ing the table into VMEM).
    embed = jnp.take(kparams["emb"], idx[:, 0], axis=0).reshape(N, 1, H)
    new_hidden = (hn[None, :, :], cn[None, :, :])
    # LAYER == 1, so the PyTorch for-loop body runs exactly once.
    return result, embed, new_hidden


# ----------------------------------------------------------------------------
# Parameters: PyTorch layout + one-time kernel-friendly preparation
# ----------------------------------------------------------------------------
def make_params(key):
    # PyTorch-layout parameters (LSTM gate order i, f, g, o; unpadded vocab).
    ks = jax.random.split(key, 6)
    u = lambda k, shape: jax.random.uniform(k, shape, jnp.float32, -0.1, 0.1)
    return {
        "w_ih_t": u(ks[0], (INPUT_SIZE, 4 * HIDDEN)),   # LSTM W_ih^T
        "w_hh_t": u(ks[1], (HIDDEN, 4 * HIDDEN)),       # LSTM W_hh^T
        "b":      u(ks[2], (1, 4 * HIDDEN)),            # b_ih + b_hh combined
        "w_out_t": u(ks[3], (HIDDEN, VOCAB_SIZE)),      # hidden2out W^T
        "b_out":  u(ks[4], (1, VOCAB_SIZE)),
        "emb":    u(ks[5], (VOCAB_SIZE, HIDDEN)),       # embedding table
    }


def _reorder_gates(w):
    # columns (i, f, g, o) -> (i, f, o, g): sigmoid gates become lane-contiguous
    i, f, g, o = jnp.split(w, 4, axis=-1)
    return jnp.concatenate([i, f, o, g], axis=-1)


def prepare_params(params):
    """One-time prep: gate reorder + lane-pad the vocab dimension to 3072."""
    H = params["w_hh_t"].shape[0]
    w_out_p = jnp.zeros((H, VOCAB_PAD), jnp.float32)
    w_out_p = w_out_p.at[:, :VOCAB_SIZE].set(params["w_out_t"])
    b_out_p = jnp.full((1, VOCAB_PAD), NEG, jnp.float32)
    b_out_p = b_out_p.at[:, :VOCAB_SIZE].set(params["b_out"])
    return {
        "w_ih_t": _reorder_gates(params["w_ih_t"]),
        "w_hh_t": _reorder_gates(params["w_hh_t"]),
        "b":      _reorder_gates(params["b"]),
        "w_out_t": w_out_p,
        "b_out":  b_out_p,
        "emb":    params["emb"],
    }


# ----------------------------------------------------------------------------
# Pure-JAX reference (PyTorch semantics, original i,f,g,o layout)
# ----------------------------------------------------------------------------
def decoder_reference(params, data, hidden):
    h = hidden[0][0]
    c = hidden[1][0]
    H = h.shape[-1]
    outs = []
    for t in range(data.shape[1]):
        x_t = data[:, t, :]
        gates = x_t @ params["w_ih_t"] + h @ params["w_hh_t"] + params["b"][0]
        i = jax.nn.sigmoid(gates[:, 0:H])
        f = jax.nn.sigmoid(gates[:, H:2 * H])
        g = jnp.tanh(gates[:, 2 * H:3 * H])
        o = jax.nn.sigmoid(gates[:, 3 * H:4 * H])
        c = f * c + i * g
        h = o * jnp.tanh(c)
        outs.append(h)
    out = jnp.stack(outs, axis=1)                              # (B, T, H)
    flat = out.reshape(-1, H)
    logits = flat @ params["w_out_t"] + params["b_out"][0]
    result = jax.nn.log_softmax(logits, axis=-1)
    idx = jnp.argmax(result, axis=-1)
    embed = params["emb"][idx].reshape(-1, 1, H)
    return result, embed, (h[None], c[None])


if __name__ == "__main__":
    key = jax.random.PRNGKey(0)
    pkey, dkey = jax.random.split(key)
    params = make_params(pkey)
    kparams = prepare_params(params)

    data = jax.random.normal(dkey, (BATCH, SEQ, INPUT_SIZE), jnp.float32)
    hidden = (jnp.zeros((1, BATCH, HIDDEN), jnp.float32),
              jnp.zeros((1, BATCH, HIDDEN), jnp.float32))

    fwd = jax.jit(decoder_forward)
    result, embed, (hn, cn) = fwd(kparams, data, hidden)
    jax.block_until_ready((result, embed, hn, cn))

    r_ref, e_ref, (hn_ref, cn_ref) = decoder_reference(params, data, hidden)
    np.testing.assert_allclose(np.asarray(result), np.asarray(r_ref),
                               rtol=1e-4, atol=1e-4)
    np.testing.assert_allclose(np.asarray(embed), np.asarray(e_ref),
                               rtol=1e-4, atol=1e-4)
    np.testing.assert_allclose(np.asarray(hn), np.asarray(hn_ref),
                               rtol=1e-4, atol=1e-4)
    np.testing.assert_allclose(np.asarray(cn), np.asarray(cn_ref),
                               rtol=1e-4, atol=1e-4)

    assert result.shape == (BATCH * SEQ, VOCAB_SIZE)
    assert embed.shape == (BATCH * SEQ, 1, HIDDEN)
    print("KERNEL_OK")
</pallas_src>

<mosaic_0001>
module attributes {stable_mosaic.version = 11 : i64} {
  func.func @decoder_kernel(%arg0: memref<16x32xf32, #tpu.memory_space<vmem>>, %arg1: memref<2x32xf32, #tpu.memory_space<vmem>>, %arg2: memref<2x32xf32, #tpu.memory_space<vmem>>, %arg3: memref<32x128xf32, #tpu.memory_space<vmem>>, %arg4: memref<32x128xf32, #tpu.memory_space<vmem>>, %arg5: memref<1x128xf32, #tpu.memory_space<vmem>>, %arg6: memref<32x3072xf32, #tpu.memory_space<vmem>>, %arg7: memref<1x3072xf32, #tpu.memory_space<vmem>>, %arg8: memref<16x3004xf32, #tpu.memory_space<vmem>>, %arg9: memref<16x1xi32, #tpu.memory_space<vmem>>, %arg10: memref<2x32xf32, #tpu.memory_space<vmem>>, %arg11: memref<2x32xf32, #tpu.memory_space<vmem>>, %arg12: memref<2x8x32xf32, #tpu.memory_space<vmem>>) attributes {dimension_semantics = [], scalar_prefetch = 0 : i64, scratch_operands = 1 : i64, tpu.core_type = #tpu.core_type<tc>} {
    %c0 = arith.constant 0 : index
    %c0_0 = arith.constant 0 : index
    %0 = vector.load %arg0[%c0, %c0_0] : memref<16x32xf32, #tpu.memory_space<vmem>>, vector<16x32xf32>
    %c0_1 = arith.constant 0 : index
    %c0_2 = arith.constant 0 : index
    %1 = vector.load %arg3[%c0_1, %c0_2] : memref<32x128xf32, #tpu.memory_space<vmem>>, vector<32x128xf32>
    %cst = arith.constant dense<0.000000e+00> : vector<16x128xf32>
    %2 = tpu.matmul %0, %1, %cst {dimension_numbers = #tpu.dot_dimension_numbers<[1], [0], [0], [1], [0, 0, 1, 1], [], []>} : vector<16x32xf32>, vector<32x128xf32>, vector<16x128xf32> -> vector<16x128xf32>
    %c0_3 = arith.constant 0 : index
    %c0_4 = arith.constant 0 : index
    %3 = vector.load %arg5[%c0_3, %c0_4] : memref<1x128xf32, #tpu.memory_space<vmem>>, vector<1x128xf32>
    %4 = vector.broadcast %3 : vector<1x128xf32> to vector<16x128xf32>
    %5 = arith.addf %2, %4 : vector<16x128xf32>
    %6 = vector.shape_cast %5 : vector<16x128xf32> to vector<2x8x128xf32>
    %c0_5 = arith.constant 0 : index
    %c0_6 = arith.constant 0 : index
    %7 = vector.load %arg4[%c0_5, %c0_6] : memref<32x128xf32, #tpu.memory_space<vmem>>, vector<32x128xf32>
    %c0_7 = arith.constant 0 : index
    %c0_8 = arith.constant 0 : index
    %8 = vector.load %arg1[%c0_7, %c0_8] : memref<2x32xf32, #tpu.memory_space<vmem>>, vector<2x32xf32>
    %c0_9 = arith.constant 0 : index
    %c0_10 = arith.constant 0 : index
    %9 = vector.load %arg2[%c0_9, %c0_10] : memref<2x32xf32, #tpu.memory_space<vmem>>, vector<2x32xf32>
    %10 = vector.extract_strided_slice %6 {offsets = [0, 0, 0], sizes = [2, 1, 128], strides = [1, 1, 1]} : vector<2x8x128xf32> to vector<2x1x128xf32>
    %11 = vector.shape_cast %10 : vector<2x1x128xf32> to vector<2x128xf32>
    %cst_11 = arith.constant dense<0.000000e+00> : vector<2x128xf32>
    %12 = tpu.matmul %8, %7, %cst_11 {dimension_numbers = #tpu.dot_dimension_numbers<[1], [0], [0], [1], [0, 0, 1, 1], [], []>} : vector<2x32xf32>, vector<32x128xf32>, vector<2x128xf32> -> vector<2x128xf32>
    %13 = arith.addf %11, %12 : vector<2x128xf32>
    %14 = vector.extract_strided_slice %13 {offsets = [0, 0], sizes = [2, 96], strides = [1, 1]} : vector<2x128xf32> to vector<2x96xf32>
    %15 = arith.negf %14 : vector<2x96xf32>
    %16 = math.exp %15 : vector<2x96xf32>
    %cst_12 = arith.constant 1.000000e+00 : f32
    %17 = vector.broadcast %cst_12 : f32 to vector<2x96xf32>
    %18 = arith.addf %17, %16 : vector<2x96xf32>
    %19 = arith.divf %17, %18 : vector<2x96xf32>
    %20 = vector.extract_strided_slice %13 {offsets = [0, 96], sizes = [2, 32], strides = [1, 1]} : vector<2x128xf32> to vector<2x32xf32>
    %21 = math.tanh %20 : vector<2x32xf32>
    %22 = vector.extract_strided_slice %19 {offsets = [0, 32], sizes = [2, 32], strides = [1, 1]} : vector<2x96xf32> to vector<2x32xf32>
    %23 = arith.mulf %22, %9 : vector<2x32xf32>
    %24 = vector.extract_strided_slice %19 {offsets = [0, 0], sizes = [2, 32], strides = [1, 1]} : vector<2x96xf32> to vector<2x32xf32>
    %25 = arith.mulf %24, %21 : vector<2x32xf32>
    %26 = arith.addf %23, %25 : vector<2x32xf32>
    %27 = vector.extract_strided_slice %19 {offsets = [0, 64], sizes = [2, 32], strides = [1, 1]} : vector<2x96xf32> to vector<2x32xf32>
    %28 = math.tanh %26 : vector<2x32xf32>
    %29 = arith.mulf %27, %28 : vector<2x32xf32>
    %c0_13 = arith.constant 0 : index
    %c0_14 = arith.constant 0 : index
    %c0_15 = arith.constant 0 : index
    %30 = vector.load %arg12[%c0_13, %c0_14, %c0_15] : memref<2x8x32xf32, #tpu.memory_space<vmem>>, vector<2x1x32xf32>
    %31 = vector.shape_cast %30 : vector<2x1x32xf32> to vector<2x32xf32>
    %32 = vector.shape_cast %29 : vector<2x32xf32> to vector<2x1x32xf32>
    tpu.vector_store %arg12[%c0_13, %c0_14, %c0_15], %32 {strides = array<i32>} : memref<2x8x32xf32, #tpu.memory_space<vmem>>, vector<2x1x32xf32>,
    %33 = vector.extract_strided_slice %6 {offsets = [0, 1, 0], sizes = [2, 1, 128], strides = [1, 1, 1]} : vector<2x8x128xf32> to vector<2x1x128xf32>
    %34 = vector.shape_cast %33 : vector<2x1x128xf32> to vector<2x128xf32>
    %cst_16 = arith.constant dense<0.000000e+00> : vector<2x128xf32>
    %35 = tpu.matmul %29, %7, %cst_16 {dimension_numbers = #tpu.dot_dimension_numbers<[1], [0], [0], [1], [0, 0, 1, 1], [], []>} : vector<2x32xf32>, vector<32x128xf32>, vector<2x128xf32> -> vector<2x128xf32>
    %36 = arith.addf %34, %35 : vector<2x128xf32>
    %37 = vector.extract_strided_slice %36 {offsets = [0, 0], sizes = [2, 96], strides = [1, 1]} : vector<2x128xf32> to vector<2x96xf32>
    %38 = arith.negf %37 : vector<2x96xf32>
    %39 = math.exp %38 : vector<2x96xf32>
    %cst_17 = arith.constant 1.000000e+00 : f32
    %40 = vector.broadcast %cst_17 : f32 to vector<2x96xf32>
    %41 = arith.addf %40, %39 : vector<2x96xf32>
    %42 = arith.divf %40, %41 : vector<2x96xf32>
    %43 = vector.extract_strided_slice %36 {offsets = [0, 96], sizes = [2, 32], strides = [1, 1]} : vector<2x128xf32> to vector<2x32xf32>
    %44 = math.tanh %43 : vector<2x32xf32>
    %45 = vector.extract_strided_slice %42 {offsets = [0, 32], sizes = [2, 32], strides = [1, 1]} : vector<2x96xf32> to vector<2x32xf32>
    %46 = arith.mulf %45, %26 : vector<2x32xf32>
    %47 = vector.extract_strided_slice %42 {offsets = [0, 0], sizes = [2, 32], strides = [1, 1]} : vector<2x96xf32> to vector<2x32xf32>
    %48 = arith.mulf %47, %44 : vector<2x32xf32>
    %49 = arith.addf %46, %48 : vector<2x32xf32>
    %50 = vector.extract_strided_slice %42 {offsets = [0, 64], sizes = [2, 32], strides = [1, 1]} : vector<2x96xf32> to vector<2x32xf32>
    %51 = math.tanh %49 : vector<2x32xf32>
    %52 = arith.mulf %50, %51 : vector<2x32xf32>
    %c0_18 = arith.constant 0 : index
    %c1 = arith.constant 1 : index
    %c0_19 = arith.constant 0 : index
    %53 = vector.load %arg12[%c0_18, %c1, %c0_19] : memref<2x8x32xf32, #tpu.memory_space<vmem>>, vector<2x1x32xf32>
    %54 = vector.shape_cast %53 : vector<2x1x32xf32> to vector<2x32xf32>
    %55 = vector.shape_cast %52 : vector<2x32xf32> to vector<2x1x32xf32>
    tpu.vector_store %arg12[%c0_18, %c1, %c0_19], %55 {strides = array<i32>} : memref<2x8x32xf32, #tpu.memory_space<vmem>>, vector<2x1x32xf32>,
    %56 = vector.extract_strided_slice %6 {offsets = [0, 2, 0], sizes = [2, 1, 128], strides = [1, 1, 1]} : vector<2x8x128xf32> to vector<2x1x128xf32>
    %57 = vector.shape_cast %56 : vector<2x1x128xf32> to vector<2x128xf32>
    %cst_20 = arith.constant dense<0.000000e+00> : vector<2x128xf32>
    %58 = tpu.matmul %52, %7, %cst_20 {dimension_numbers = #tpu.dot_dimension_numbers<[1], [0], [0], [1], [0, 0, 1, 1], [], []>} : vector<2x32xf32>, vector<32x128xf32>, vector<2x128xf32> -> vector<2x128xf32>
    %59 = arith.addf %57, %58 : vector<2x128xf32>
    %60 = vector.extract_strided_slice %59 {offsets = [0, 0], sizes = [2, 96], strides = [1, 1]} : vector<2x128xf32> to vector<2x96xf32>
    %61 = arith.negf %60 : vector<2x96xf32>
    %62 = math.exp %61 : vector<2x96xf32>
    %cst_21 = arith.constant 1.000000e+00 : f32
    %63 = vector.broadcast %cst_21 : f32 to vector<2x96xf32>
    %64 = arith.addf %63, %62 : vector<2x96xf32>
    %65 = arith.divf %63, %64 : vector<2x96xf32>
    %66 = vector.extract_strided_slice %59 {offsets = [0, 96], sizes = [2, 32], strides = [1, 1]} : vector<2x128xf32> to vector<2x32xf32>
    %67 = math.tanh %66 : vector<2x32xf32>
    %68 = vector.extract_strided_slice %65 {offsets = [0, 32], sizes = [2, 32], strides = [1, 1]} : vector<2x96xf32> to vector<2x32xf32>
    %69 = arith.mulf %68, %49 : vector<2x32xf32>
    %70 = vector.extract_strided_slice %65 {offsets = [0, 0], sizes = [2, 32], strides = [1, 1]} : vector<2x96xf32> to vector<2x32xf32>
    %71 = arith.mulf %70, %67 : vector<2x32xf32>
    %72 = arith.addf %69, %71 : vector<2x32xf32>
    %73 = vector.extract_strided_slice %65 {offsets = [0, 64], sizes = [2, 32], strides = [1, 1]} : vector<2x96xf32> to vector<2x32xf32>
    %74 = math.tanh %72 : vector<2x32xf32>
    %75 = arith.mulf %73, %74 : vector<2x32xf32>
    %c0_22 = arith.constant 0 : index
    %c2 = arith.constant 2 : index
    %c0_23 = arith.constant 0 : index
    %76 = vector.load %arg12[%c0_22, %c2, %c0_23] : memref<2x8x32xf32, #tpu.memory_space<vmem>>, vector<2x1x32xf32>
    %77 = vector.shape_cast %76 : vector<2x1x32xf32> to vector<2x32xf32>
    %78 = vector.shape_cast %75 : vector<2x32xf32> to vector<2x1x32xf32>
    tpu.vector_store %arg12[%c0_22, %c2, %c0_23], %78 {strides = array<i32>} : memref<2x8x32xf32, #tpu.memory_space<vmem>>, vector<2x1x32xf32>,
    %79 = vector.extract_strided_slice %6 {offsets = [0, 3, 0], sizes = [2, 1, 128], strides = [1, 1, 1]} : vector<2x8x128xf32> to vector<2x1x128xf32>
    %80 = vector.shape_cast %79 : vector<2x1x128xf32> to vector<2x128xf32>
    %cst_24 = arith.constant dense<0.000000e+00> : vector<2x128xf32>
    %81 = tpu.matmul %75, %7, %cst_24 {dimension_numbers = #tpu.dot_dimension_numbers<[1], [0], [0], [1], [0, 0, 1, 1], [], []>} : vector<2x32xf32>, vector<32x128xf32>, vector<2x128xf32> -> vector<2x128xf32>
    %82 = arith.addf %80, %81 : vector<2x128xf32>
    %83 = vector.extract_strided_slice %82 {offsets = [0, 0], sizes = [2, 96], strides = [1, 1]} : vector<2x128xf32> to vector<2x96xf32>
    %84 = arith.negf %83 : vector<2x96xf32>
    %85 = math.exp %84 : vector<2x96xf32>
    %cst_25 = arith.constant 1.000000e+00 : f32
    %86 = vector.broadcast %cst_25 : f32 to vector<2x96xf32>
    %87 = arith.addf %86, %85 : vector<2x96xf32>
    %88 = arith.divf %86, %87 : vector<2x96xf32>
    %89 = vector.extract_strided_slice %82 {offsets = [0, 96], sizes = [2, 32], strides = [1, 1]} : vector<2x128xf32> to vector<2x32xf32>
    %90 = math.tanh %89 : vector<2x32xf32>
    %91 = vector.extract_strided_slice %88 {offsets = [0, 32], sizes = [2, 32], strides = [1, 1]} : vector<2x96xf32> to vector<2x32xf32>
    %92 = arith.mulf %91, %72 : vector<2x32xf32>
    %93 = vector.extract_strided_slice %88 {offsets = [0, 0], sizes = [2, 32], strides = [1, 1]} : vector<2x96xf32> to vector<2x32xf32>
    %94 = arith.mulf %93, %90 : vector<2x32xf32>
    %95 = arith.addf %92, %94 : vector<2x32xf32>
    %96 = vector.extract_strided_slice %88 {offsets = [0, 64], sizes = [2, 32], strides = [1, 1]} : vector<2x96xf32> to vector<2x32xf32>
    %97 = math.tanh %95 : vector<2x32xf32>
    %98 = arith.mulf %96, %97 : vector<2x32xf32>
    %c0_26 = arith.constant 0 : index
    %c3 = arith.constant 3 : index
    %c0_27 = arith.constant 0 : index
    %99 = vector.load %arg12[%c0_26, %c3, %c0_27] : memref<2x8x32xf32, #tpu.memory_space<vmem>>, vector<2x1x32xf32>
    %100 = vector.shape_cast %99 : vector<2x1x32xf32> to vector<2x32xf32>
    %101 = vector.shape_cast %98 : vector<2x32xf32> to vector<2x1x32xf32>
    tpu.vector_store %arg12[%c0_26, %c3, %c0_27], %101 {strides = array<i32>} : memref<2x8x32xf32, #tpu.memory_space<vmem>>, vector<2x1x32xf32>,
    %102 = vector.extract_strided_slice %6 {offsets = [0, 4, 0], sizes = [2, 1, 128], strides = [1, 1, 1]} : vector<2x8x128xf32> to vector<2x1x128xf32>
    %103 = vector.shape_cast %102 : vector<2x1x128xf32> to vector<2x128xf32>
    %cst_28 = arith.constant dense<0.000000e+00> : vector<2x128xf32>
    %104 = tpu.matmul %98, %7, %cst_28 {dimension_numbers = #tpu.dot_dimension_numbers<[1], [0], [0], [1], [0, 0, 1, 1], [], []>} : vector<2x32xf32>, vector<32x128xf32>, vector<2x128xf32> -> vector<2x128xf32>
    %105 = arith.addf %103, %104 : vector<2x128xf32>
    %106 = vector.extract_strided_slice %105 {offsets = [0, 0], sizes = [2, 96], strides = [1, 1]} : vector<2x128xf32> to vector<2x96xf32>
    %107 = arith.negf %106 : vector<2x96xf32>
    %108 = math.exp %107 : vector<2x96xf32>
    %cst_29 = arith.constant 1.000000e+00 : f32
    %109 = vector.broadcast %cst_29 : f32 to vector<2x96xf32>
    %110 = arith.addf %109, %108 : vector<2x96xf32>
    %111 = arith.divf %109, %110 : vector<2x96xf32>
    %112 = vector.extract_strided_slice %105 {offsets = [0, 96], sizes = [2, 32], strides = [1, 1]} : vector<2x128xf32> to vector<2x32xf32>
    %113 = math.tanh %112 : vector<2x32xf32>
    %114 = vector.extract_strided_slice %111 {offsets = [0, 32], sizes = [2, 32], strides = [1, 1]} : vector<2x96xf32> to vector<2x32xf32>
    %115 = arith.mulf %114, %95 : vector<2x32xf32>
    %116 = vector.extract_strided_slice %111 {offsets = [0, 0], sizes = [2, 32], strides = [1, 1]} : vector<2x96xf32> to vector<2x32xf32>
    %117 = arith.mulf %116, %113 : vector<2x32xf32>
    %118 = arith.addf %115, %117 : vector<2x32xf32>
    %119 = vector.extract_strided_slice %111 {offsets = [0, 64], sizes = [2, 32], strides = [1, 1]} : vector<2x96xf32> to vector<2x32xf32>
    %120 = math.tanh %118 : vector<2x32xf32>
    %121 = arith.mulf %119, %120 : vector<2x32xf32>
    %c0_30 = arith.constant 0 : index
    %c4 = arith.constant 4 : index
    %c0_31 = arith.constant 0 : index
    %122 = vector.load %arg12[%c0_30, %c4, %c0_31] : memref<2x8x32xf32, #tpu.memory_space<vmem>>, vector<2x1x32xf32>
    %123 = vector.shape_cast %122 : vector<2x1x32xf32> to vector<2x32xf32>
    %124 = vector.shape_cast %121 : vector<2x32xf32> to vector<2x1x32xf32>
    tpu.vector_store %arg12[%c0_30, %c4, %c0_31], %124 {strides = array<i32>} : memref<2x8x32xf32, #tpu.memory_space<vmem>>, vector<2x1x32xf32>,
    %125 = vector.extract_strided_slice %6 {offsets = [0, 5, 0], sizes = [2, 1, 128], strides = [1, 1, 1]} : vector<2x8x128xf32> to vector<2x1x128xf32>
    %126 = vector.shape_cast %125 : vector<2x1x128xf32> to vector<2x128xf32>
    %cst_32 = arith.constant dense<0.000000e+00> : vector<2x128xf32>
    %127 = tpu.matmul %121, %7, %cst_32 {dimension_numbers = #tpu.dot_dimension_numbers<[1], [0], [0], [1], [0, 0, 1, 1], [], []>} : vector<2x32xf32>, vector<32x128xf32>, vector<2x128xf32> -> vector<2x128xf32>
    %128 = arith.addf %126, %127 : vector<2x128xf32>
    %129 = vector.extract_strided_slice %128 {offsets = [0, 0], sizes = [2, 96], strides = [1, 1]} : vector<2x128xf32> to vector<2x96xf32>
    %130 = arith.negf %129 : vector<2x96xf32>
    %131 = math.exp %130 : vector<2x96xf32>
    %cst_33 = arith.constant 1.000000e+00 : f32
    %132 = vector.broadcast %cst_33 : f32 to vector<2x96xf32>
    %133 = arith.addf %132, %131 : vector<2x96xf32>
    %134 = arith.divf %132, %133 : vector<2x96xf32>
    %135 = vector.extract_strided_slice %128 {offsets = [0, 96], sizes = [2, 32], strides = [1, 1]} : vector<2x128xf32> to vector<2x32xf32>
    %136 = math.tanh %135 : vector<2x32xf32>
    %137 = vector.extract_strided_slice %134 {offsets = [0, 32], sizes = [2, 32], strides = [1, 1]} : vector<2x96xf32> to vector<2x32xf32>
    %138 = arith.mulf %137, %118 : vector<2x32xf32>
    %139 = vector.extract_strided_slice %134 {offsets = [0, 0], sizes = [2, 32], strides = [1, 1]} : vector<2x96xf32> to vector<2x32xf32>
    %140 = arith.mulf %139, %136 : vector<2x32xf32>
    %141 = arith.addf %138, %140 : vector<2x32xf32>
    %142 = vector.extract_strided_slice %134 {offsets = [0, 64], sizes = [2, 32], strides = [1, 1]} : vector<2x96xf32> to vector<2x32xf32>
    %143 = math.tanh %141 : vector<2x32xf32>
    %144 = arith.mulf %142, %143 : vector<2x32xf32>
    %c0_34 = arith.constant 0 : index
    %c5 = arith.constant 5 : index
    %c0_35 = arith.constant 0 : index
    %145 = vector.load %arg12[%c0_34, %c5, %c0_35] : memref<2x8x32xf32, #tpu.memory_space<vmem>>, vector<2x1x32xf32>
    %146 = vector.shape_cast %145 : vector<2x1x32xf32> to vector<2x32xf32>
    %147 = vector.shape_cast %144 : vector<2x32xf32> to vector<2x1x32xf32>
    tpu.vector_store %arg12[%c0_34, %c5, %c0_35], %147 {strides = array<i32>} : memref<2x8x32xf32, #tpu.memory_space<vmem>>, vector<2x1x32xf32>,
    %148 = vector.extract_strided_slice %6 {offsets = [0, 6, 0], sizes = [2, 1, 128], strides = [1, 1, 1]} : vector<2x8x128xf32> to vector<2x1x128xf32>
    %149 = vector.shape_cast %148 : vector<2x1x128xf32> to vector<2x128xf32>
    %cst_36 = arith.constant dense<0.000000e+00> : vector<2x128xf32>
    %150 = tpu.matmul %144, %7, %cst_36 {dimension_numbers = #tpu.dot_dimension_numbers<[1], [0], [0], [1], [0, 0, 1, 1], [], []>} : vector<2x32xf32>, vector<32x128xf32>, vector<2x128xf32> -> vector<2x128xf32>
    %151 = arith.addf %149, %150 : vector<2x128xf32>
    %152 = vector.extract_strided_slice %151 {offsets = [0, 0], sizes = [2, 96], strides = [1, 1]} : vector<2x128xf32> to vector<2x96xf32>
    %153 = arith.negf %152 : vector<2x96xf32>
    %154 = math.exp %153 : vector<2x96xf32>
    %cst_37 = arith.constant 1.000000e+00 : f32
    %155 = vector.broadcast %cst_37 : f32 to vector<2x96xf32>
    %156 = arith.addf %155, %154 : vector<2x96xf32>
    %157 = arith.divf %155, %156 : vector<2x96xf32>
    %158 = vector.extract_strided_slice %151 {offsets = [0, 96], sizes = [2, 32], strides = [1, 1]} : vector<2x128xf32> to vector<2x32xf32>
    %159 = math.tanh %158 : vector<2x32xf32>
    %160 = vector.extract_strided_slice %157 {offsets = [0, 32], sizes = [2, 32], strides = [1, 1]} : vector<2x96xf32> to vector<2x32xf32>
    %161 = arith.mulf %160, %141 : vector<2x32xf32>
    %162 = vector.extract_strided_slice %157 {offsets = [0, 0], sizes = [2, 32], strides = [1, 1]} : vector<2x96xf32> to vector<2x32xf32>
    %163 = arith.mulf %162, %159 : vector<2x32xf32>
    %164 = arith.addf %161, %163 : vector<2x32xf32>
    %165 = vector.extract_strided_slice %157 {offsets = [0, 64], sizes = [2, 32], strides = [1, 1]} : vector<2x96xf32> to vector<2x32xf32>
    %166 = math.tanh %164 : vector<2x32xf32>
    %167 = arith.mulf %165, %166 : vector<2x32xf32>
    %c0_38 = arith.constant 0 : index
    %c6 = arith.constant 6 : index
    %c0_39 = arith.constant 0 : index
    %168 = vector.load %arg12[%c0_38, %c6, %c0_39] : memref<2x8x32xf32, #tpu.memory_space<vmem>>, vector<2x1x32xf32>
    %169 = vector.shape_cast %168 : vector<2x1x32xf32> to vector<2x32xf32>
    %170 = vector.shape_cast %167 : vector<2x32xf32> to vector<2x1x32xf32>
    tpu.vector_store %arg12[%c0_38, %c6, %c0_39], %170 {strides = array<i32>} : memref<2x8x32xf32, #tpu.memory_space<vmem>>, vector<2x1x32xf32>,
    %171 = vector.extract_strided_slice %6 {offsets = [0, 7, 0], sizes = [2, 1, 128], strides = [1, 1, 1]} : vector<2x8x128xf32> to vector<2x1x128xf32>
    %172 = vector.shape_cast %171 : vector<2x1x128xf32> to vector<2x128xf32>
    %cst_40 = arith.constant dense<0.000000e+00> : vector<2x128xf32>
    %173 = tpu.matmul %167, %7, %cst_40 {dimension_numbers = #tpu.dot_dimension_numbers<[1], [0], [0], [1], [0, 0, 1, 1], [], []>} : vector<2x32xf32>, vector<32x128xf32>, vector<2x128xf32> -> vector<2x128xf32>
    %174 = arith.addf %172, %173 : vector<2x128xf32>
    %175 = vector.extract_strided_slice %174 {offsets = [0, 0], sizes = [2, 96], strides = [1, 1]} : vector<2x128xf32> to vector<2x96xf32>
    %176 = arith.negf %175 : vector<2x96xf32>
    %177 = math.exp %176 : vector<2x96xf32>
    %cst_41 = arith.constant 1.000000e+00 : f32
    %178 = vector.broadcast %cst_41 : f32 to vector<2x96xf32>
    %179 = arith.addf %178, %177 : vector<2x96xf32>
    %180 = arith.divf %178, %179 : vector<2x96xf32>
    %181 = vector.extract_strided_slice %174 {offsets = [0, 96], sizes = [2, 32], strides = [1, 1]} : vector<2x128xf32> to vector<2x32xf32>
    %182 = math.tanh %181 : vector<2x32xf32>
    %183 = vector.extract_strided_slice %180 {offsets = [0, 32], sizes = [2, 32], strides = [1, 1]} : vector<2x96xf32> to vector<2x32xf32>
    %184 = arith.mulf %183, %164 : vector<2x32xf32>
    %185 = vector.extract_strided_slice %180 {offsets = [0, 0], sizes = [2, 32], strides = [1, 1]} : vector<2x96xf32> to vector<2x32xf32>
    %186 = arith.mulf %185, %182 : vector<2x32xf32>
    %187 = arith.addf %184, %186 : vector<2x32xf32>
    %188 = vector.extract_strided_slice %180 {offsets = [0, 64], sizes = [2, 32], strides = [1, 1]} : vector<2x96xf32> to vector<2x32xf32>
    %189 = math.tanh %187 : vector<2x32xf32>
    %190 = arith.mulf %188, %189 : vector<2x32xf32>
    %c0_42 = arith.constant 0 : index
    %c7 = arith.constant 7 : index
    %c0_43 = arith.constant 0 : index
    %191 = vector.load %arg12[%c0_42, %c7, %c0_43] : memref<2x8x32xf32, #tpu.memory_space<vmem>>, vector<2x1x32xf32>
    %192 = vector.shape_cast %191 : vector<2x1x32xf32> to vector<2x32xf32>
    %193 = vector.shape_cast %190 : vector<2x32xf32> to vector<2x1x32xf32>
    tpu.vector_store %arg12[%c0_42, %c7, %c0_43], %193 {strides = array<i32>} : memref<2x8x32xf32, #tpu.memory_space<vmem>>, vector<2x1x32xf32>,
    %c0_44 = arith.constant 0 : index
    %c0_45 = arith.constant 0 : index
    %194 = vector.load %arg10[%c0_44, %c0_45] : memref<2x32xf32, #tpu.memory_space<vmem>>, vector<2x32xf32>
    tpu.vector_store %arg10[%c0_44, %c0_45], %190 {strides = array<i32>} : memref<2x32xf32, #tpu.memory_space<vmem>>, vector<2x32xf32>,
    %c0_46 = arith.constant 0 : index
    %c0_47 = arith.constant 0 : index
    %195 = vector.load %arg11[%c0_46, %c0_47] : memref<2x32xf32, #tpu.memory_space<vmem>>, vector<2x32xf32>
    tpu.vector_store %arg11[%c0_46, %c0_47], %187 {strides = array<i32>} : memref<2x32xf32, #tpu.memory_space<vmem>>, vector<2x32xf32>,
    %c0_48 = arith.constant 0 : index
    %c0_49 = arith.constant 0 : index
    %c0_50 = arith.constant 0 : index
    %196 = vector.load %arg12[%c0_48, %c0_49, %c0_50] : memref<2x8x32xf32, #tpu.memory_space<vmem>>, vector<2x8x32xf32>
    %197 = vector.shape_cast %196 : vector<2x8x32xf32> to vector<16x32xf32>
    %c0_51 = arith.constant 0 : index
    %c0_52 = arith.constant 0 : index
    %198 = vector.load %arg6[%c0_51, %c0_52] : memref<32x3072xf32, #tpu.memory_space<vmem>>, vector<32x3072xf32>
    %cst_53 = arith.constant dense<0.000000e+00> : vector<16x3072xf32>
    %199 = tpu.matmul %197, %198, %cst_53 {dimension_numbers = #tpu.dot_dimension_numbers<[1], [0], [0], [1], [0, 0, 1, 1], [], []>} : vector<16x32xf32>, vector<32x3072xf32>, vector<16x3072xf32> -> vector<16x3072xf32>
    %c0_54 = arith.constant 0 : index
    %c0_55 = arith.constant 0 : index
    %200 = vector.load %arg7[%c0_54, %c0_55] : memref<1x3072xf32, #tpu.memory_space<vmem>>, vector<1x3072xf32>
    %201 = vector.broadcast %200 : vector<1x3072xf32> to vector<16x3072xf32>
    %202 = arith.addf %199, %201 : vector<16x3072xf32>
    %cst_56 = arith.constant dense<0xFF800000> : vector<16xf32>
    %203 = vector.multi_reduction <maximumf>, %202, %cst_56 [1] : vector<16x3072xf32> to vector<16xf32>
    %204 = vector.shape_cast %203 : vector<16xf32> to vector<16x1xf32>
    %205 = vector.broadcast %204 : vector<16x1xf32> to vector<16x3072xf32>
    %206 = arith.subf %202, %205 : vector<16x3072xf32>
    %207 = math.exp %206 : vector<16x3072xf32>
    %cst_57 = arith.constant dense<0.000000e+00> : vector<16xf32>
    %208 = vector.multi_reduction <add>, %207, %cst_57 [1] : vector<16x3072xf32> to vector<16xf32>
    %209 = vector.shape_cast %208 : vector<16xf32> to vector<16x1xf32>
    %210 = math.log %209 : vector<16x1xf32>
    %211 = vector.broadcast %210 : vector<16x1xf32> to vector<16x3072xf32>
    %212 = arith.subf %206, %211 : vector<16x3072xf32>
    %213 = vector.extract_strided_slice %212 {offsets = [0, 0], sizes = [16, 3004], strides = [1, 1]} : vector<16x3072xf32> to vector<16x3004xf32>
    %c0_58 = arith.constant 0 : index
    %c0_59 = arith.constant 0 : index
    %214 = vector.load %arg8[%c0_58, %c0_59] : memref<16x3004xf32, #tpu.memory_space<vmem>>, vector<16x3004xf32>
    tpu.vector_store %arg8[%c0_58, %c0_59], %213 {strides = array<i32>} : memref<16x3004xf32, #tpu.memory_space<vmem>>, vector<16x3004xf32>,
    %215 = tpu.iota {dimensions = array<i32: 1>} : vector<16x3072xi32>
    %216 = vector.broadcast %204 : vector<16x1xf32> to vector<16x3072xf32>
    %217 = arith.cmpf oeq, %202, %216 : vector<16x3072xf32>
    %c3072_i32 = arith.constant 3072 : i32
    %218 = vector.broadcast %c3072_i32 : i32 to vector<16x3072xi32>
    %219 = arith.select %217, %215, %218 : vector<16x3072xi1>, vector<16x3072xi32>
    %cst_60 = arith.constant dense<2147483647> : vector<16xi32>
    %220 = vector.multi_reduction <minsi>, %219, %cst_60 [1] : vector<16x3072xi32> to vector<16xi32>
    %221 = vector.shape_cast %220 : vector<16xi32> to vector<16x1xi32>
    %c0_61 = arith.constant 0 : index
    %c0_62 = arith.constant 0 : index
    %222 = vector.load %arg9[%c0_61, %c0_62] : memref<16x1xi32, #tpu.memory_space<vmem>>, vector<16x1xi32>
    tpu.vector_store %arg9[%c0_61, %c0_62], %221 {strides = array<i32>} : memref<16x1xi32, #tpu.memory_space<vmem>>, vector<16x1xi32>,
    return
  }
}

</mosaic_0001>

<bundles_post_ra>
// kernel: decoder_forward.1
= control target key start
LH: loop header
LB: loop body
LE: loop exit
PB: predicated region body
PF: predicated region fallthrough
CT: control target
= control target key end

     0   :  { %17 = vsyncpa [#allocation4], 0  ;;  %s4545_s0 = inlined_call_operand.hbm [shape: f32[16,32], index: 0, kind: input, shape index: {}]   ;;  %s4546_s1 = inlined_call_operand.hbm [shape: f32[2,32], index: 1, kind: input, shape index: {}]   ;;  %s4547_s2 = inlined_call_operand.hbm [shape: f32[2,32], index: 2, kind: input, shape index: {}]   ;;  %s4548_s3 = inlined_call_operand.hbm [shape: f32[32,128], index: 3, kind: input, shape index: {}]   ;;  %s4549_s4 = inlined_call_operand.hbm [shape: f32[32,128], index: 4, kind: input, shape index: {}]   ;;  %s4550_s5 = inlined_call_operand.hbm [shape: f32[1,128], index: 5, kind: input, shape index: {}]   ;;  %s4551_s6 = inlined_call_operand.hbm [shape: f32[32,3072], index: 6, kind: input, shape index: {}]   ;;  %s4552_s7 = inlined_call_operand.hbm [shape: f32[1,3072], index: 7, kind: input, shape index: {}]   ;;  %s4553_s8 = inlined_call_operand.hbm [shape: f32[16,3004], index: 8, kind: output, shape index: {0}]   ;;  %s4554_s9 = inlined_call_operand.vmem [shape: s32[16,1], index: 9, kind: output, shape index: {1}]   ;;  %s4555_s10 = inlined_call_operand.hbm [shape: f32[2,32], index: 10, kind: output, shape index: {2}]   ;;  %s4556_s11 = inlined_call_operand.hbm [shape: f32[2,32], index: 11, kind: output, shape index: {3}]  }
   0x1   :  { %18 = vsyncpa [#allocation7], 0 }
   0x2   :  { %19 = vsyncpa [#allocation10], 0 }
   0x3   :  { %20 = vsyncpa [#allocation13], 0 }
   0x4   :  { %21 = vsyncpa [#allocation16], 0 }
   0x5   :  { %22 = vsyncpa [#allocation5], 0  ;;  %s42_s19 = sshll.u32 %s4546_s1, 4  ;;  %s43_s19 = int_to_ptr.hbm [resolvable:$true] %s42_s19 }
   0x6   :  { %23 = vsyncpa [#allocation19], 0  ;;  %s3166_s20 = smov [#allocation6]   ;;  %s63_s24 = sshll.u32 %s4548_s3, 4  ;;  %s64_s24 = int_to_ptr.hbm [resolvable:$true] %s63_s24 }
   0x7   :  { %s44_s21 = sshll.u32 %s3166_s20, 4  ;;  %s3167_s25 = smov [#allocation9]   ;;  %s45_s21 = int_to_ptr.vmem [resolvable:$true] %s44_s21 }
   0x8   :  { %47 = dma.hbm_to_vmem [thread:$0]  %s43_s19, 32, %s45_s21, [#allocation7]  }
   0x9   :  { %s65_s26 = sshll.u32 %s3167_s25, 4  ;;  %s90_s29 = sshll.u32 %s4550_s5, 4  ;;  %s66_s26 = int_to_ptr.vmem [resolvable:$true] %s65_s26  ;;  %s91_s29 = int_to_ptr.hbm [resolvable:$true] %s90_s29 }
   0xa   :  { %s3168_s1 = smov 128   ;;  %s3169_s30 = smov 8  }
   0xb   :  { %71 = dma.hbm_to_vmem [thread:$0]  %s64_s24, 512, %s66_s26, [#allocation10], %s3168_s1, %s3168_s1, %s3169_s30  }
   0xc   :  { %s28_s14 = sshll.u32 %s4545_s0, 4  ;;  %s3170_s15 = smov [#allocation12]   ;;  %s29_s14 = int_to_ptr.hbm [resolvable:$true] %s28_s14 }
   0xd   :  { %s92_s16 = sshll.u32 %s3170_s15, 4  ;;  %s3171_s3 = smov [#allocation3]   ;;  %s93_s16 = int_to_ptr.vmem [resolvable:$true] %s92_s16 }
   0xe   :  { %95 = dma.hbm_to_vmem [thread:$0]  %s91_s29, 16, %s93_s16, [#allocation13]  }
   0xf   :  { %s30_s17 = sshll.u32 %s3171_s3, 4  ;;  %s53_s5 = sshll.u32 %s4547_s2, 4  ;;  %s31_s17 = int_to_ptr.vmem [resolvable:$true] %s30_s17  ;;  %s54_s5 = int_to_ptr.hbm [resolvable:$true] %s53_s5 }
  0x10   :  { %36 = dma.hbm_to_vmem [thread:$0]  %s29_s14, 256, %s31_s17, [#allocation4], %s3168_s1, %s3168_s1, %s3169_s30  }
  0x11   :  { %s76_s22 = sshll.u32 %s4549_s4, 4  ;;  %s3172_s23 = smov [#allocation8]   ;;  %s77_s22 = int_to_ptr.hbm [resolvable:$true] %s76_s22 }
  0x12   :  { %s55_s0 = sshll.u32 %s3172_s23, 4  ;;  %s3173_s24 = smov [#allocation11]   ;;  %s56_s0 = int_to_ptr.vmem [resolvable:$true] %s55_s0 }
  0x13   :  { %58 = dma.hbm_to_vmem [thread:$0]  %s54_s5, 32, %s56_s0, [#allocation7]  }
  0x14   :  { %s78_s25 = sshll.u32 %s3173_s24, 4  ;;  %s100_s28 = sshll.u32 %s4551_s6, 4  ;;  %s79_s25 = int_to_ptr.vmem [resolvable:$true] %s78_s25  ;;  %s101_s28 = int_to_ptr.hbm [resolvable:$true] %s100_s28 }
  0x15   :  { %84 = dma.hbm_to_vmem [thread:$0]  %s77_s22, 512, %s79_s25, [#allocation10], %s3168_s1, %s3168_s1, %s3169_s30  }
  0x16   :  { %s3174_s2 = smov [#allocation14]   ;;  %s114_s4 = sshll.u32 %s4552_s7, 4  ;;  %s115_s4 = int_to_ptr.hbm [resolvable:$true] %s114_s4 }
  0x17   :  { %s102_s29 = sshll.u32 %s3174_s2, 4  ;;  %s3175_s14 = smov 3072   ;;  %s103_s29 = int_to_ptr.vmem [resolvable:$true] %s102_s29 }
  0x18   :  { %s3176_s15 = smov 192   ;;  %s3177_s16 = smov [#allocation15]  }
  0x19   :  { %108 = dma.hbm_to_vmem [thread:$0]  %s101_s28, 12288, %s103_s29, [#allocation13], %s3175_s14, %s3175_s14, %s3176_s15  }
  0x1a   :  { %s116_s3 = sshll.u32 %s3177_s16, 4  ;;  %s117_s3 = int_to_ptr.vmem [resolvable:$true] %s116_s3 }
  0x1b   :  { %119 = dma.hbm_to_vmem [thread:$0]  %s115_s4, 384, %s117_s3, [#allocation16]  }
  0x1c   :  { %3152 = dma.done.wait [#allocation4], 256  }
  0x1d   :  { %3153 = vsyncadd [#allocation4], 4294967040 }
  0x1e   :  { %3154 = dma.done.wait [#allocation7], 64  }
  0x1f   :  { %3155 = vsyncadd [#allocation7], 4294967232 }
  0x20   :  { %3156 = dma.done.wait [#allocation10], 1024  }
  0x21   :  { %3157 = vsyncadd [#allocation10], 4294966272 }
  0x22   :  { %3158 = dma.done.wait [#allocation13], 12304  }
  0x23   :  { %3159 = vsyncadd [#allocation13], 4294954992 }
  0x24   :  { %3160 = dma.done.wait [#allocation16], 384  }
  0x25   :  { %3161 = vsyncadd [#allocation16], 4294966912  ;;  %v157_v0 = vld [vmem:[#allocation9 + $0x18] sm:$0xff]  ;;  %v156_v1 = vld [vmem:[#allocation9 + $0x10] sm:$0xff]  ;;  %vm162_vm0 = vcmask 261120   ;;  %s3178_s6 = smov 32  }
  0x26   :  { %v195_v2 = vld [vmem:[#allocation11 + $0x18] sm:$0xff]  ;;  %181 = vmatpush.msra.mxu0 %v157_v0  ;;  %v194_v3 = vld [vmem:[#allocation11 + $0x10] sm:$0xff]  ;;  %v155_v4 = vld [vmem:[#allocation9 + $0x8] sm:$0xff]  ;;  %vm321_vm9 = vcmask 1041409   ;;  %s3179_s7 = smov 64   ;;  %s3180_s1 = smov 96  }
  0x27   :  { %213 = vmatpush.msra.mxu1 %v195_v2  ;;  %v193_v5 = vld [vmem:[#allocation11 + $0x8] sm:$0xff]  ;;  %339 = vmatpush.msra.mxu2 %v195_v2  ;;  %v197_v6 = vld [vmem:[#allocation8] sm:$0x3]  ;;  %v154_v7 = vld [vmem:[#allocation9] sm:$0xff]  ;;  %s3181_s30 = smov [#allocation17]   ;;  %s2515_s5 = sshll.u32 %s4553_s8, 4  ;;  %s2516_s5 = int_to_ptr.hbm [resolvable:$true] %s2515_s5 }
  0x28   :  { %462 = vmatpush.msra.mxu3 %v195_v2  ;;  %182 = vmatpush.msra.mxu0 %v156_v1  ;;  %v192_v8 = vld [vmem:[#allocation11] sm:$0xff]  ;;  %v268_v9 = vrot.slane %v197_v6, 1  ;;  %v152_v10 = vld [vmem:[#allocation3] sm:$0xff]  ;;  %v196_v11 = vld [vmem:[#allocation6] sm:$0x3]  ;;  %s2513_s17 = sshll.u32 %s3181_s30, 4  ;;  %s2514_s17 = int_to_ptr.vmem [resolvable:$true] %s2513_s17 }
  0x29   :  { %214 = vmatpush.msra.mxu1 %v194_v3  ;;  %340 = vmatpush.msra.mxu2 %v194_v3  ;;  %v153_v12 = vld [vmem:[#allocation3 + $0x8] sm:$0xff]  ;;  %v2659_v15 = vld [vmem:[#allocation12] ss:$0 sm:$0xff]  ;;  %s3182_s20 = smov [#allocation18]   ;;  %s2531_s0 = sshll.u32 %s4555_s10, 4  ;;  %s2532_s0 = int_to_ptr.hbm [resolvable:$true] %s2531_s0 }
  0x2a   :  { %463 = vmatpush.msra.mxu3 %v194_v3  ;;  %183 = vmatpush.msra.mxu0 %v155_v4  ;;  %s2529_s21 = sshll.u32 %s3182_s20, 4  ;;  %s3183_s26 = smov [#allocation20]   ;;  %s2530_s21 = int_to_ptr.vmem [resolvable:$true] %s2529_s21 }
  0x2b   :  { %215 = vmatpush.msra.mxu1 %v193_v5  ;;  %271 = vrot.lane.b32.xlu1 %v268_v9, %s3178_s6  ;;  %s2540_s27 = sshll.u32 %s3183_s26, 4  ;;  %s2542_s29 = sshll.u32 %s4556_s11, 4  ;;  %s2541_s27 = int_to_ptr.vmem [resolvable:$true] %s2540_s27  ;;  %s2543_s29 = int_to_ptr.hbm [resolvable:$true] %s2542_s29 }
  0x2c   :  { %341 = vmatpush.msra.mxu2 %v193_v5  ;;  %184 = vmatpush.msra.mxu0 %v154_v7 }
  0x2d   :  { %216 = vmatpush.msra.mxu1 %v192_v8  ;;  %2567 = vmatmul.msk.f32.vlgmr.msra.gmra.mxu0 %vm162_vm0, %v152_v10 }
  0x2e   :  { %2569 = vmatmul.msk.f32.vlgmr.msra.gmra.mxu1 %vm162_vm0, %v196_v11  ;;  %342 = vmatpush.msra.mxu2 %v192_v8 }
  0x2f   :  { %464 = vmatpush.msra.mxu3 %v193_v5  ;;  %587 = vmatpush.msrb.mxu1 %v195_v2 }
  0x30   :  { %712 = vmatpush.msrb.mxu2 %v195_v2  ;;  %962 = vmatpush.msrb.mxu0 %v195_v2 }
  0x31   :  { %465 = vmatpush.msra.mxu3 %v192_v8  ;;  %588 = vmatpush.msrb.mxu1 %v194_v3 }
  0x32   :  { %713 = vmatpush.msrb.mxu2 %v194_v3  ;;  %963 = vmatpush.msrb.mxu0 %v194_v3 }
  0x33   :  { %837 = vmatpush.msrb.mxu3 %v195_v2  ;;  %269 = vrot.lane.b32.xlu1 %v197_v6, %s3178_s6 }
  0x34   :  { %589 = vmatpush.msrb.mxu1 %v193_v5  ;;  %714 = vmatpush.msrb.mxu2 %v193_v5 }
  0x35   :  { %838 = vmatpush.msrb.mxu3 %v194_v3  ;;  %2568 = vmatmul.msk.f32.gmra.mxu0 %vm162_vm0, %v153_v12 }
  0x36   :  { %590 = vmatpush.msrb.mxu1 %v192_v8  ;;  %715 = vmatpush.msrb.mxu2 %v192_v8 }
  0x37   :  { %839 = vmatpush.msrb.mxu3 %v193_v5  ;;  %964 = vmatpush.msrb.mxu0 %v193_v5 }
  0x38   :  { %1087 = vmatpush.msra.mxu1 %v195_v2 }
  0x39   :  { %840 = vmatpush.msrb.mxu3 %v192_v8  ;;  %965 = vmatpush.msrb.mxu0 %v192_v8 }
  0x3a   :  { %1088 = vmatpush.msra.mxu1 %v194_v3 }
  0x3c   :  { %1089 = vmatpush.msra.mxu1 %v193_v5 }
  0x3e   :  { %1090 = vmatpush.msra.mxu1 %v192_v8 }
  0x9d   :  { %v272_v54 = vpop.permute.xlu1 %271 }
  0xa5   :  { %v270_v58 = vpop.permute.xlu1 %269 }
  0xaa   :  { %v186_v13 = vpop.f32.mrf.mxu0 }
  0xab   :  { %v218_v14 = vpop.f32.mrf.mxu1  ;;  %v3279_v20 = vadd.f32 %v2659_v15, %v186_v13 }
  0xac   :  { %v222_v16 = vrot.slane %v218_v14, 1 }
  0xad   :  { %v225_v21 = vadd.f32 %v218_v14, %v3279_v20 }
  0xaf   :  { %v2570_v25 = vmul.f32 -1.442695, %v225_v21 }
  0xb2   :  { %v189_v17 = vpop.f32.mrf.mxu0 }
  0xb3   :  { %v3276_v18 = vadd.f32 %v2659_v15, %v189_v17 }
  0xb5   :  { %v226_v19 = vadd.f32 %v222_v16, %v3276_v18 }
  0xb7   :  { %2660 = vtanh.f32 %v226_v19  ;;  %v2571_v24 = vmul.f32 -1.442695, %v226_v19 }
  0xb8   :  { %2662 = vtanh.f32 %v225_v21 }
  0xb9   :  { %2664 = vpow2.f32 %v2571_v24 }
  0xba   :  { %2666 = vpow2.f32 %v2570_v25 }
  0xbd   :  { %v2661_v22 = vpop.eup %2660 }
  0xbe   :  { %281 = vrot.lane.b32.xlu0 %v2661_v22, %s3178_s6  ;;  %v2663_v23 = vpop.eup %2662 }
  0xbf   :  { %v2665_v26 = vpop.eup %2664 }
  0xc0   :  { %v234_v27 = vadd.f32 1.0, %v2665_v26  ;;  %v2667_v28 = vpop.eup %2666 }
  0xc1   :  { %v233_v29 = vadd.f32 1.0, %v2667_v28 }
  0xc2   :  { %2668 = vrcp.f32 %v234_v27  ;;  %v261_v38 = vand.u32 2147483648, %v234_v27  ;;  %vm255_vm2 = vweird.f32 %v234_v27  ;;  %v259_v39 = vand.u32 2147483647, %v234_v27 }
  0xc3   :  { %2670 = vrcp.f32 %v233_v29  ;;  %v246_v47 = vand.u32 2147483648, %v233_v29  ;;  %vm240_vm6 = vweird.f32 %v233_v29  ;;  %v244_v48 = vand.u32 2147483647, %v233_v29 }
  0xc4   :  { %v262_v42 = vor.u32 1.1754944e-38, %v261_v38  ;;  %vm260_vm4 = vcmp.eq.f32.partialorder %v259_v39, 8.507059e+37 }
  0xc5   :  { %v247_v50 = vor.u32 1.1754944e-38, %v246_v47  ;;  %vm245_vm8 = vcmp.eq.f32.partialorder %v244_v48, 8.507059e+37 }
  0xc6   :  { %279 = vrot.lane.b32.xlu0 %v2663_v23, %s3178_s6 }
  0xc8   :  { %v2669_v30 = vpop.eup %2668 }
  0xc9   :  { %v251_v31 = vmul.f32 %v2669_v30, %v234_v27  ;;  %v2671_v33 = vpop.eup %2670  ;;  %vm256_vm1 = vweird.f32 %v2669_v30 }
  0xca   :  { %v236_v35 = vmul.f32 %v2671_v33, %v233_v29  ;;  %vm257_vm3 = vmor %vm255_vm2, %vm256_vm1  ;;  %vm241_vm5 = vweird.f32 %v2671_v33 }
  0xcb   :  { %v252_v32 = vsub.f32 1.0, %v251_v31  ;;  %vm242_vm7 = vmor %vm240_vm6, %vm241_vm5 }
  0xcc   :  { %v237_v37 = vsub.f32 1.0, %v236_v35 }
  0xcd   :  { %v253_v34 = vmul.f32 %v2669_v30, %v252_v32 }
  0xce   :  { %v238_v41 = vmul.f32 %v2671_v33, %v237_v37 }
  0xcf   :  { %v254_v36 = vadd.f32 %v2669_v30, %v253_v34 }
  0xd0   :  { %v239_v45 = vadd.f32 %v2671_v33, %v238_v41 }
  0xd1   :  { %v258_v40 = vsel %vm257_vm3, %v2669_v30, %v254_v36 }
  0xd2   :  { %v263_v43 = vsel %vm260_vm4, %v262_v42, %v258_v40  ;;  %v243_v49 = vsel %vm242_vm7, %v2671_v33, %v239_v45 }
  0xd3   :  { %v248_v51 = vsel %vm245_vm8, %v247_v50, %v243_v49  ;;  %v276_v55 = vmul.f32 %v272_v54, %v263_v43 }
  0xd4   :  { %v275_v59 = vmul.f32 %v270_v58, %v248_v51 }
 0x130   :  { %v282_v44 = vpop.permute.xlu0 %281 }
 0x131   :  { %v286_v46 = vmul.f32 %v282_v44, %v263_v43 }
 0x133   :  { %291 = vrot.lane.b32.xlu2 %v286_v46, %s3178_s6 }
 0x138   :  { %v280_v52 = vpop.permute.xlu0 %279 }
 0x139   :  { %v285_v53 = vmul.f32 %v280_v52, %v248_v51 }
 0x13b   :  { %289 = vrot.lane.b32.xlu2 %v285_v53, %s3178_s6 }
 0x18d   :  { %v292_v56 = vpop.permute.xlu2 %291 }
 0x18e   :  { %v3286_v57 = vadd.f32 %v292_v56, %v276_v55 }
 0x190   :  { %2672 = vtanh.f32 %v3286_v57  ;;  %v396_v50 = vrot.slane %v3286_v57, 7 }
 0x195   :  { %v290_v60 = vpop.permute.xlu2 %289 }
 0x196   :  { %v2673_v61 = vpop.eup %2672  ;;  %v3289_v62 = vadd.f32 %v290_v60, %v275_v59 }
 0x197   :  { %303 = vrot.lane.b32.xlu0 %v2673_v61, %s3178_s6 }
 0x198   :  { %2674 = vtanh.f32 %v3289_v62  ;;  %v395_v45 = vrot.slane %v3289_v62, 7 }
 0x19e   :  { %v2675_v63 = vpop.eup %2674 }
 0x19f   :  { %301 = vrot.lane.b32.xlu1 %v2675_v63, %s3178_s6 }
 0x209   :  { %v304_v0 = vpop.permute.xlu0 %303 }
 0x20a   :  { %v3294_v1 = vmul.f32 %v304_v0, %v263_v43 }
 0x20c   :  { %v320_v3 = vrot.slane %v3294_v1, 7 }
 0x211   :  { %v302_v2 = vpop.permute.xlu1 %301 }
 0x212   :  { %v3297_v4 = vmul.f32 %v302_v2, %v248_v51 }
 0x214   :  { %v322_v5 = vsel %vm321_vm9, %v320_v3, %v3297_v4 }
 0x215   :  { %323 = vrot.lane.b32.xlu2 %v322_v5, %s3179_s7 }
 0x26f   :  { %v324_v6 = vpop.permute.xlu2 %323 }
 0x270   :  { %2572 = vmatmul.msk.f32.vlgmr.msra.gmra.mxu2 %vm162_vm0, %v324_v6 }
 0x2f3   :  { %v344_v7 = vpop.f32.mrf.mxu2 }
 0x2f4   :  { %v348_v8 = vrot.slane %v344_v7, 7  ;;  %v352_v9 = vadd.f32 %v344_v7, %v3276_v18 }
 0x2f6   :  { %v351_v10 = vadd.f32 %v348_v8, %v3279_v20  ;;  %2676 = vtanh.f32 %v352_v9  ;;  %v2574_v13 = vmul.f32 -1.442695, %v352_v9 }
 0x2f8   :  { %2678 = vtanh.f32 %v351_v10  ;;  %v2573_v14 = vmul.f32 -1.442695, %v351_v10 }
 0x2f9   :  { %2680 = vpow2.f32 %v2574_v13 }
 0x2fa   :  { %2682 = vpow2.f32 %v2573_v14 }
 0x2fc   :  { %v2677_v11 = vpop.eup %2676 }
 0x2fd   :  { %405 = vrot.lane.b32.xlu1 %v2677_v11, %s3178_s6 }
 0x2fe   :  { %v2679_v12 = vpop.eup %2678 }
 0x2ff   :  { %403 = vrot.lane.b32.xlu0 %v2679_v12, %s3178_s6  ;;  %v2681_v15 = vpop.eup %2680 }
 0x300   :  { %v2683_v16 = vpop.eup %2682  ;;  %v360_v17 = vadd.f32 1.0, %v2681_v15 }
 0x301   :  { %v359_v19 = vadd.f32 1.0, %v2683_v16 }
 0x302   :  { %2684 = vrcp.f32 %v360_v17  ;;  %v387_v30 = vand.u32 2147483648, %v360_v17  ;;  %vm381_vm11 = vweird.f32 %v360_v17  ;;  %v385_v31 = vand.u32 2147483647, %v360_v17 }
 0x303   :  { %2686 = vrcp.f32 %v359_v19  ;;  %v372_v34 = vand.u32 2147483648, %v359_v19  ;;  %vm366_vm14 = vweird.f32 %v359_v19  ;;  %v370_v36 = vand.u32 2147483647, %v359_v19 }
 0x304   :  { %v388_v35 = vor.u32 1.1754944e-38, %v387_v30  ;;  %vm386_vm15 = vcmp.eq.f32.partialorder %v385_v31, 8.507059e+37 }
 0x305   :  { %v373_v41 = vor.u32 1.1754944e-38, %v372_v34  ;;  %vm371_vm2 = vcmp.eq.f32.partialorder %v370_v36, 8.507059e+37 }
 0x308   :  { %v2685_v21 = vpop.eup %2684 }
 0x309   :  { %v2687_v22 = vpop.eup %2686  ;;  %v377_v23 = vmul.f32 %v2685_v21, %v360_v17  ;;  %vm382_vm10 = vweird.f32 %v2685_v21 }
 0x30a   :  { %v362_v24 = vmul.f32 %v2687_v22, %v359_v19  ;;  %vm383_vm12 = vmor %vm381_vm11, %vm382_vm10  ;;  %vm367_vm13 = vweird.f32 %v2687_v22 }
 0x30b   :  { %v378_v25 = vsub.f32 1.0, %v377_v23  ;;  %vm368_vm1 = vmor %vm366_vm14, %vm367_vm13 }
 0x30c   :  { %v363_v26 = vsub.f32 1.0, %v362_v24 }
 0x30d   :  { %v379_v27 = vmul.f32 %v2685_v21, %v378_v25 }
 0x30e   :  { %v364_v28 = vmul.f32 %v2687_v22, %v363_v26 }
 0x30f   :  { %v380_v29 = vadd.f32 %v2685_v21, %v379_v27 }
 0x310   :  { %v365_v32 = vadd.f32 %v2687_v22, %v364_v28 }
 0x311   :  { %v384_v33 = vsel %vm383_vm12, %v2685_v21, %v380_v29 }
 0x312   :  { %v389_v38 = vsel %vm386_vm15, %v388_v35, %v384_v33  ;;  %v369_v39 = vsel %vm368_vm1, %v2687_v22, %v365_v32 }
 0x313   :  { %v374_v43 = vsel %vm371_vm2, %v373_v41, %v369_v39  ;;  %v400_v51 = vmul.f32 %v396_v50, %v389_v38 }
 0x314   :  { %v399_v46 = vmul.f32 %v395_v45, %v374_v43 }
 0x36f   :  { %v406_v37 = vpop.permute.xlu1 %405 }
 0x370   :  { %v410_v40 = vmul.f32 %v406_v37, %v389_v38 }
 0x371   :  { %v404_v42 = vpop.permute.xlu0 %403 }
 0x372   :  { %415 = vrot.lane.b32.xlu0 %v410_v40, %s3178_s6  ;;  %v409_v44 = vmul.f32 %v404_v42, %v374_v43 }
 0x374   :  { %413 = vrot.lane.b32.xlu2 %v409_v44, %s3178_s6 }
 0x3ce   :  { %v414_v47 = vpop.permute.xlu2 %413 }
 0x3cf   :  { %v3310_v48 = vadd.f32 %v414_v47, %v399_v46 }
 0x3d1   :  { %2688 = vtanh.f32 %v3310_v48  ;;  %v519_v44 = vrot.slane %v3310_v48, 7 }
 0x3d7   :  { %v2689_v49 = vpop.eup %2688 }
 0x3d8   :  { %425 = vrot.lane.b32.xlu1 %v2689_v49, %s3178_s6 }
 0x3e4   :  { %v416_v52 = vpop.permute.xlu0 %415 }
 0x3e5   :  { %v3315_v53 = vadd.f32 %v416_v52, %v400_v51 }
 0x3e7   :  { %2690 = vtanh.f32 %v3315_v53  ;;  %v520_v39 = vrot.slane %v3315_v53, 7 }
 0x3ed   :  { %v2691_v54 = vpop.eup %2690 }
 0x3ee   :  { %427 = vrot.lane.b32.xlu2 %v2691_v54, %s3178_s6 }
 0x448   :  { %v428_v55 = vpop.permute.xlu2 %427 }
 0x449   :  { %v3321_v59 = vmul.f32 %v428_v55, %v389_v38 }
 0x44a   :  { %v426_v56 = vpop.permute.xlu1 %425 }
 0x44b   :  { %v3319_v58 = vmul.f32 %v426_v56, %v374_v43 }
 0x44d   :  { %v444_v60 = vrot.slane %v3319_v58, 1 }
 0x44f   :  { %v445_v57 = vsel %vm321_vm9, %v3321_v59, %v444_v60 }
 0x450   :  { %446 = vrot.lane.b32.xlu0 %v445_v57, %s3179_s7 }
 0x4c2   :  { %v447_v61 = vpop.permute.xlu0 %446 }
 0x4c3   :  { %2575 = vmatmul.msk.f32.vlgmr.msra.gmra.mxu3 %vm162_vm0, %v447_v61 }
 0x546   :  { %v467_v62 = vpop.f32.mrf.mxu3 }
 0x547   :  { %v471_v63 = vrot.slane %v467_v62, 6  ;;  %v472_v0 = vrot.slane %v467_v62, 7 }
 0x549   :  { %v475_v2 = vadd.f32 %v471_v63, %v3279_v20  ;;  %v476_v3 = vadd.f32 %v472_v0, %v3276_v18 }
 0x54b   :  { %2692 = vtanh.f32 %v475_v2  ;;  %v2577_v7 = vmul.f32 -1.442695, %v476_v3  ;;  %v2576_v11 = vmul.f32 -1.442695, %v475_v2 }
 0x54c   :  { %2694 = vtanh.f32 %v476_v3 }
 0x54d   :  { %2696 = vpow2.f32 %v2577_v7 }
 0x551   :  { %v2693_v5 = vpop.eup %2692 }
 0x552   :  { %v2695_v6 = vpop.eup %2694  ;;  %527 = vrot.lane.b32.xlu1 %v2693_v5, %s3178_s6 }
 0x553   :  { %529 = vrot.lane.b32.xlu2 %v2695_v6, %s3178_s6  ;;  %v2697_v8 = vpop.eup %2696 }
 0x554   :  { %v484_v9 = vadd.f32 1.0, %v2697_v8 }
 0x556   :  { %2698 = vrcp.f32 %v484_v9  ;;  %v511_v19 = vand.u32 2147483648, %v484_v9  ;;  %vm505_vm4 = vweird.f32 %v484_v9  ;;  %v509_v21 = vand.u32 2147483647, %v484_v9 }
 0x557   :  { %2700 = vpow2.f32 %v2576_v11 }
 0x558   :  { %v512_v23 = vor.u32 1.1754944e-38, %v511_v19  ;;  %vm510_vm6 = vcmp.eq.f32.partialorder %v509_v21, 8.507059e+37 }
 0x55c   :  { %v2699_v10 = vpop.eup %2698 }
 0x55d   :  { %v501_v12 = vmul.f32 %v2699_v10, %v484_v9  ;;  %v2701_v14 = vpop.eup %2700  ;;  %vm506_vm3 = vweird.f32 %v2699_v10 }
 0x55e   :  { %v483_v16 = vadd.f32 1.0, %v2701_v14  ;;  %vm507_vm5 = vmor %vm505_vm4, %vm506_vm3 }
 0x55f   :  { %v502_v13 = vsub.f32 1.0, %v501_v12 }
 0x560   :  { %2702 = vrcp.f32 %v483_v16  ;;  %v496_v32 = vand.u32 2147483648, %v483_v16  ;;  %vm490_vm8 = vweird.f32 %v483_v16  ;;  %v494_v33 = vand.u32 2147483647, %v483_v16 }
 0x561   :  { %v503_v15 = vmul.f32 %v2699_v10, %v502_v13 }
 0x562   :  { %v497_v35 = vor.u32 1.1754944e-38, %v496_v32  ;;  %vm495_vm11 = vcmp.eq.f32.partialorder %v494_v33, 8.507059e+37 }
 0x563   :  { %v504_v17 = vadd.f32 %v2699_v10, %v503_v15 }
 0x565   :  { %v508_v22 = vsel %vm507_vm5, %v2699_v10, %v504_v17 }
 0x566   :  { %v513_v25 = vsel %vm510_vm6, %v512_v23, %v508_v22  ;;  %v2703_v26 = vpop.eup %2702 }
 0x567   :  { %v486_v28 = vmul.f32 %v2703_v26, %v483_v16  ;;  %vm491_vm7 = vweird.f32 %v2703_v26  ;;  %v524_v40 = vmul.f32 %v520_v39, %v513_v25 }
 0x568   :  { %vm492_vm10 = vmor %vm490_vm8, %vm491_vm7 }
 0x569   :  { %v487_v29 = vsub.f32 1.0, %v486_v28 }
 0x56b   :  { %v488_v30 = vmul.f32 %v2703_v26, %v487_v29 }
 0x56d   :  { %v489_v31 = vadd.f32 %v2703_v26, %v488_v30 }
 0x56f   :  { %v493_v34 = vsel %vm492_vm10, %v2703_v26, %v489_v31 }
 0x570   :  { %v498_v37 = vsel %vm495_vm11, %v497_v35, %v493_v34 }
 0x571   :  { %v523_v45 = vmul.f32 %v519_v44, %v498_v37 }
 0x5ad   :  { %v530_v24 = vpop.permute.xlu2 %529 }
 0x5ae   :  { %v534_v27 = vmul.f32 %v530_v24, %v513_v25 }
 0x5b0   :  { %539 = vrot.lane.b32.xlu1 %v534_v27, %s3178_s6 }
 0x5c4   :  { %v528_v36 = vpop.permute.xlu1 %527 }
 0x5c5   :  { %v533_v38 = vmul.f32 %v528_v36, %v498_v37 }
 0x5c7   :  { %537 = vrot.lane.b32.xlu0 %v533_v38, %s3178_s6 }
 0x622   :  { %v540_v41 = vpop.permute.xlu1 %539 }
 0x623   :  { %v3335_v42 = vadd.f32 %v540_v41, %v524_v40 }
 0x625   :  { %2704 = vtanh.f32 %v3335_v42 }
 0x62b   :  { %v2705_v43 = vpop.eup %2704 }
 0x62c   :  { %551 = vrot.lane.b32.xlu0 %v2705_v43, %s3178_s6 }
 0x639   :  { %v538_v46 = vpop.permute.xlu0 %537 }
 0x63a   :  { %v3340_v47 = vadd.f32 %v538_v46, %v523_v45 }
 0x63c   :  { %2706 = vtanh.f32 %v3340_v47  ;;  %v644_v36 = vrot.slane %v3340_v47, 7 }
 0x642   :  { %v2707_v49 = vpop.eup %2706 }
 0x643   :  { %549 = vrot.lane.b32.xlu2 %v2707_v49, %s3178_s6 }
 0x69d   :  { %v550_v50 = vpop.permute.xlu2 %549 }
 0x69e   :  { %v552_v51 = vpop.permute.xlu0 %551  ;;  %v3344_v52 = vmul.f32 %v550_v50, %v498_v37  ;;  %v645_v37 = vrot.slane %v3335_v42, 7 }
 0x69f   :  { %v3346_v53 = vmul.f32 %v552_v51, %v513_v25 }
 0x6a0   :  { %v568_v54 = vrot.slane %v3344_v52, 2 }
 0x6a1   :  { %v569_v55 = vrot.slane %v3346_v53, 1 }
 0x6a3   :  { %v570_v48 = vsel %vm321_vm9, %v569_v55, %v568_v54 }
 0x6a4   :  { %571 = vrot.lane.b32.xlu1 %v570_v48, %s3179_s7 }
 0x716   :  { %v572_v56 = vpop.permute.xlu1 %571 }
 0x717   :  { %2578 = vmatmul.msk.f32.vlgmr.msrb.gmra.mxu1 %vm162_vm0, %v572_v56 }
 0x794   :  { %v592_v60 = vpop.f32.mrf.mxu1 }
 0x795   :  { %v596_v57 = vrot.slane %v592_v60, 5  ;;  %v597_v61 = vrot.slane %v592_v60, 6 }
 0x797   :  { %v600_v62 = vadd.f32 %v596_v57, %v3279_v20  ;;  %v601_v63 = vadd.f32 %v597_v61, %v3276_v18 }
 0x799   :  { %2708 = vtanh.f32 %v600_v62  ;;  %v2579_v3 = vmul.f32 -1.442695, %v600_v62  ;;  %v2580_v8 = vmul.f32 -1.442695, %v601_v63 }
 0x79a   :  { %2710 = vtanh.f32 %v601_v63 }
 0x79b   :  { %2712 = vpow2.f32 %v2579_v3 }
 0x79f   :  { %v2709_v0 = vpop.eup %2708 }
 0x7a0   :  { %v2711_v2 = vpop.eup %2710  ;;  %652 = vrot.lane.b32.xlu2 %v2709_v0, %s3178_s6 }
 0x7a1   :  { %654 = vrot.lane.b32.xlu0 %v2711_v2, %s3178_s6  ;;  %v2713_v5 = vpop.eup %2712 }
 0x7a2   :  { %v608_v6 = vadd.f32 1.0, %v2713_v5 }
 0x7a4   :  { %2714 = vrcp.f32 %v608_v6  ;;  %v621_v15 = vand.u32 2147483648, %v608_v6  ;;  %vm615_vm13 = vweird.f32 %v608_v6  ;;  %v619_v16 = vand.u32 2147483647, %v608_v6 }
 0x7a5   :  { %2716 = vpow2.f32 %v2580_v8 }
 0x7a6   :  { %v622_v19 = vor.u32 1.1754944e-38, %v621_v15  ;;  %vm620_vm15 = vcmp.eq.f32.partialorder %v619_v16, 8.507059e+37 }
 0x7aa   :  { %v2715_v7 = vpop.eup %2714 }
 0x7ab   :  { %v611_v9 = vmul.f32 %v2715_v7, %v608_v6  ;;  %v2717_v12 = vpop.eup %2716  ;;  %vm616_vm12 = vweird.f32 %v2715_v7 }
 0x7ac   :  { %v609_v13 = vadd.f32 1.0, %v2717_v12  ;;  %vm617_vm14 = vmor %vm615_vm13, %vm616_vm12 }
 0x7ad   :  { %v612_v10 = vsub.f32 1.0, %v611_v9 }
 0x7ae   :  { %2718 = vrcp.f32 %v609_v13  ;;  %v636_v29 = vand.u32 2147483648, %v609_v13  ;;  %vm630_vm2 = vweird.f32 %v609_v13  ;;  %v634_v30 = vand.u32 2147483647, %v609_v13 }
 0x7af   :  { %v613_v11 = vmul.f32 %v2715_v7, %v612_v10 }
 0x7b0   :  { %v637_v32 = vor.u32 1.1754944e-38, %v636_v29  ;;  %vm635_vm4 = vcmp.eq.f32.partialorder %v634_v30, 8.507059e+37 }
 0x7b1   :  { %v614_v14 = vadd.f32 %v2715_v7, %v613_v11 }
 0x7b3   :  { %v618_v17 = vsel %vm617_vm14, %v2715_v7, %v614_v14 }
 0x7b4   :  { %v623_v22 = vsel %vm620_vm15, %v622_v19, %v618_v17  ;;  %v2719_v24 = vpop.eup %2718 }
 0x7b5   :  { %v626_v25 = vmul.f32 %v2719_v24, %v609_v13  ;;  %vm631_vm1 = vweird.f32 %v2719_v24  ;;  %v648_v38 = vmul.f32 %v644_v36, %v623_v22 }
 0x7b6   :  { %vm632_vm3 = vmor %vm630_vm2, %vm631_vm1 }
 0x7b7   :  { %v627_v26 = vsub.f32 1.0, %v626_v25 }
 0x7b9   :  { %v628_v27 = vmul.f32 %v2719_v24, %v627_v26 }
 0x7bb   :  { %v629_v28 = vadd.f32 %v2719_v24, %v628_v27 }
 0x7bd   :  { %v633_v31 = vsel %vm632_vm3, %v2719_v24, %v629_v28 }
 0x7be   :  { %v638_v34 = vsel %vm635_vm4, %v637_v32, %v633_v31 }
 0x7bf   :  { %v649_v39 = vmul.f32 %v645_v37, %v638_v34 }
 0x7fa   :  { %v653_v21 = vpop.permute.xlu2 %652 }
 0x7fb   :  { %v658_v23 = vmul.f32 %v653_v21, %v623_v22 }
 0x7fd   :  { %662 = vrot.lane.b32.xlu1 %v658_v23, %s3178_s6 }
 0x813   :  { %v655_v33 = vpop.permute.xlu0 %654 }
 0x814   :  { %v659_v35 = vmul.f32 %v655_v33, %v638_v34 }
 0x816   :  { %664 = vrot.lane.b32.xlu2 %v659_v35, %s3178_s6 }
 0x86f   :  { %v663_v40 = vpop.permute.xlu1 %662 }
 0x870   :  { %v665_v41 = vpop.permute.xlu2 %664  ;;  %v3361_v43 = vadd.f32 %v663_v40, %v648_v38 }
 0x871   :  { %v3363_v44 = vadd.f32 %v665_v41, %v649_v39 }
 0x872   :  { %2720 = vtanh.f32 %v3361_v43  ;;  %v769_v35 = vrot.slane %v3361_v43, 7 }
 0x873   :  { %2722 = vtanh.f32 %v3363_v44  ;;  %v770_v40 = vrot.slane %v3363_v44, 7 }
 0x878   :  { %v2721_v45 = vpop.eup %2720 }
 0x879   :  { %v2723_v46 = vpop.eup %2722  ;;  %674 = vrot.lane.b32.xlu0 %v2721_v45, %s3178_s6 }
 0x87a   :  { %676 = vrot.lane.b32.xlu1 %v2723_v46, %s3178_s6 }
 0x8eb   :  { %v675_v47 = vpop.permute.xlu0 %674 }
 0x8ec   :  { %v677_v42 = vpop.permute.xlu1 %676  ;;  %v3369_v49 = vmul.f32 %v675_v47, %v623_v22 }
 0x8ed   :  { %v3371_v50 = vmul.f32 %v677_v42, %v638_v34 }
 0x8ee   :  { %v693_v51 = vrot.slane %v3369_v49, 3 }
 0x8ef   :  { %v694_v54 = vrot.slane %v3371_v50, 2 }
 0x8f1   :  { %v695_v55 = vsel %vm321_vm9, %v694_v54, %v693_v51 }
 0x8f2   :  { %696 = vrot.lane.b32.xlu2 %v695_v55, %s3179_s7 }
 0x94c   :  { %v697_v48 = vpop.permute.xlu2 %696 }
 0x94d   :  { %2581 = vmatmul.msk.f32.vlgmr.msrb.gmra.mxu2 %vm162_vm0, %v697_v48 }
 0x9d0   :  { %v717_v56 = vpop.f32.mrf.mxu2 }
 0x9d1   :  { %v721_v60 = vrot.slane %v717_v56, 4  ;;  %v722_v57 = vrot.slane %v717_v56, 5 }
 0x9d3   :  { %v725_v61 = vadd.f32 %v721_v60, %v3279_v20  ;;  %v726_v62 = vadd.f32 %v722_v57, %v3276_v18 }
 0x9d5   :  { %2724 = vtanh.f32 %v725_v61  ;;  %v2582_v2 = vmul.f32 -1.442695, %v725_v61  ;;  %v2583_v3 = vmul.f32 -1.442695, %v726_v62 }
 0x9d6   :  { %2726 = vtanh.f32 %v726_v62 }
 0x9d7   :  { %2728 = vpow2.f32 %v2582_v2 }
 0x9d8   :  { %2730 = vpow2.f32 %v2583_v3 }
 0x9db   :  { %v2725_v63 = vpop.eup %2724 }
 0x9dc   :  { %v2727_v0 = vpop.eup %2726  ;;  %777 = vrot.lane.b32.xlu0 %v2725_v63, %s3178_s6 }
 0x9dd   :  { %779 = vrot.lane.b32.xlu1 %v2727_v0, %s3178_s6  ;;  %v2729_v5 = vpop.eup %2728 }
 0x9de   :  { %v2731_v6 = vpop.eup %2730  ;;  %v733_v7 = vadd.f32 1.0, %v2729_v5 }
 0x9df   :  { %v734_v8 = vadd.f32 1.0, %v2731_v6 }
 0x9e0   :  { %2732 = vrcp.f32 %v733_v7  ;;  %v746_v21 = vand.u32 2147483648, %v733_v7  ;;  %vm740_vm7 = vweird.f32 %v733_v7  ;;  %v744_v23 = vand.u32 2147483647, %v733_v7 }
 0x9e1   :  { %2734 = vrcp.f32 %v734_v8  ;;  %v761_v22 = vand.u32 2147483648, %v734_v8  ;;  %vm755_vm8 = vweird.f32 %v734_v8  ;;  %v759_v24 = vand.u32 2147483647, %v734_v8 }
 0x9e2   :  { %v747_v27 = vor.u32 1.1754944e-38, %v746_v21  ;;  %vm745_vm12 = vcmp.eq.f32.partialorder %v744_v23, 8.507059e+37 }
 0x9e3   :  { %v762_v28 = vor.u32 1.1754944e-38, %v761_v22  ;;  %vm760_vm13 = vcmp.eq.f32.partialorder %v759_v24, 8.507059e+37 }
 0x9e6   :  { %v2733_v9 = vpop.eup %2732 }
 0x9e7   :  { %v2735_v10 = vpop.eup %2734  ;;  %v736_v11 = vmul.f32 %v2733_v9, %v733_v7  ;;  %vm741_vm5 = vweird.f32 %v2733_v9 }
 0x9e8   :  { %v751_v12 = vmul.f32 %v2735_v10, %v734_v8  ;;  %vm756_vm6 = vweird.f32 %v2735_v10  ;;  %vm742_vm10 = vmor %vm740_vm7, %vm741_vm5 }
 0x9e9   :  { %v737_v13 = vsub.f32 1.0, %v736_v11  ;;  %vm757_vm11 = vmor %vm755_vm8, %vm756_vm6 }
 0x9ea   :  { %v752_v14 = vsub.f32 1.0, %v751_v12 }
 0x9eb   :  { %v738_v15 = vmul.f32 %v2733_v9, %v737_v13 }
 0x9ec   :  { %v753_v16 = vmul.f32 %v2735_v10, %v752_v14 }
 0x9ed   :  { %v739_v17 = vadd.f32 %v2733_v9, %v738_v15 }
 0x9ee   :  { %v754_v19 = vadd.f32 %v2735_v10, %v753_v16 }
 0x9ef   :  { %v743_v25 = vsel %vm742_vm10, %v2733_v9, %v739_v17 }
 0x9f0   :  { %v758_v26 = vsel %vm757_vm11, %v2735_v10, %v754_v19  ;;  %v748_v30 = vsel %vm745_vm12, %v747_v27, %v743_v25 }
 0x9f1   :  { %v763_v32 = vsel %vm760_vm13, %v762_v28, %v758_v26  ;;  %v773_v36 = vmul.f32 %v769_v35, %v748_v30 }
 0x9f2   :  { %v774_v41 = vmul.f32 %v770_v40, %v763_v32 }
 0xa4e   :  { %v778_v29 = vpop.permute.xlu0 %777 }
 0xa4f   :  { %v780_v31 = vpop.permute.xlu1 %779  ;;  %v783_v33 = vmul.f32 %v778_v29, %v748_v30 }
 0xa50   :  { %v784_v34 = vmul.f32 %v780_v31, %v763_v32 }
 0xa51   :  { %787 = vrot.lane.b32.xlu2 %v783_v33, %s3178_s6 }
 0xa52   :  { %789 = vrot.lane.b32.xlu0 %v784_v34, %s3178_s6 }
 0xaab   :  { %v788_v37 = vpop.permute.xlu2 %787 }
 0xaac   :  { %v3385_v38 = vadd.f32 %v788_v37, %v773_v36 }
 0xaae   :  { %2736 = vtanh.f32 %v3385_v38 }
 0xab4   :  { %v2737_v39 = vpop.eup %2736 }
 0xab5   :  { %799 = vrot.lane.b32.xlu1 %v2737_v39, %s3178_s6 }
 0xac4   :  { %v790_v45 = vpop.permute.xlu0 %789 }
 0xac5   :  { %v3390_v46 = vadd.f32 %v790_v45, %v774_v41  ;;  %v894_v45 = vrot.slane %v3385_v38, 7 }
 0xac7   :  { %2738 = vtanh.f32 %v3390_v46  ;;  %v895_v36 = vrot.slane %v3390_v46, 7 }
 0xacd   :  { %v2739_v47 = vpop.eup %2738 }
 0xace   :  { %801 = vrot.lane.b32.xlu2 %v2739_v47, %s3178_s6 }
 0xb27   :  { %v800_v43 = vpop.permute.xlu1 %799 }
 0xb28   :  { %v802_v42 = vpop.permute.xlu2 %801  ;;  %v3394_v51 = vmul.f32 %v800_v43, %v748_v30 }
 0xb29   :  { %v3396_v54 = vmul.f32 %v802_v42, %v763_v32 }
 0xb2a   :  { %v818_v55 = vrot.slane %v3394_v51, 4 }
 0xb2b   :  { %v819_v48 = vrot.slane %v3396_v54, 3 }
 0xb2d   :  { %v820_v44 = vsel %vm321_vm9, %v819_v48, %v818_v55 }
 0xb2e   :  { %821 = vrot.lane.b32.xlu0 %v820_v44, %s3179_s7 }
 0xba0   :  { %v822_v56 = vpop.permute.xlu0 %821 }
 0xba1   :  { %2584 = vmatmul.msk.f32.vlgmr.msrb.gmra.mxu3 %vm162_vm0, %v822_v56 }
 0xc24   :  { %v842_v60 = vpop.f32.mrf.mxu3 }
 0xc25   :  { %v846_v57 = vrot.slane %v842_v60, 3  ;;  %v847_v61 = vrot.slane %v842_v60, 4 }
 0xc27   :  { %v850_v62 = vadd.f32 %v846_v57, %v3279_v20  ;;  %v851_v63 = vadd.f32 %v847_v61, %v3276_v18 }
 0xc29   :  { %2740 = vtanh.f32 %v850_v62  ;;  %v2586_v3 = vmul.f32 -1.442695, %v851_v63  ;;  %v2585_v8 = vmul.f32 -1.442695, %v850_v62 }
 0xc2a   :  { %2742 = vtanh.f32 %v851_v63 }
 0xc2b   :  { %2744 = vpow2.f32 %v2586_v3 }
 0xc2f   :  { %v2741_v0 = vpop.eup %2740 }
 0xc30   :  { %v2743_v2 = vpop.eup %2742  ;;  %902 = vrot.lane.b32.xlu1 %v2741_v0, %s3178_s6 }
 0xc31   :  { %904 = vrot.lane.b32.xlu2 %v2743_v2, %s3178_s6  ;;  %v2745_v5 = vpop.eup %2744 }
 0xc32   :  { %v859_v6 = vadd.f32 1.0, %v2745_v5 }
 0xc34   :  { %2746 = vrcp.f32 %v859_v6  ;;  %v886_v15 = vand.u32 2147483648, %v859_v6  ;;  %vm880_vm15 = vweird.f32 %v859_v6  ;;  %v884_v16 = vand.u32 2147483647, %v859_v6 }
 0xc35   :  { %2748 = vpow2.f32 %v2585_v8 }
 0xc36   :  { %v887_v19 = vor.u32 1.1754944e-38, %v886_v15  ;;  %vm885_vm2 = vcmp.eq.f32.partialorder %v884_v16, 8.507059e+37 }
 0xc3a   :  { %v2747_v7 = vpop.eup %2746 }
 0xc3b   :  { %v876_v9 = vmul.f32 %v2747_v7, %v859_v6  ;;  %v2749_v11 = vpop.eup %2748  ;;  %vm881_vm14 = vweird.f32 %v2747_v7 }
 0xc3c   :  { %v858_v13 = vadd.f32 1.0, %v2749_v11  ;;  %vm882_vm1 = vmor %vm880_vm15, %vm881_vm14 }
 0xc3d   :  { %v877_v10 = vsub.f32 1.0, %v876_v9 }
 0xc3e   :  { %2750 = vrcp.f32 %v858_v13  ;;  %v871_v29 = vand.u32 2147483648, %v858_v13  ;;  %vm865_vm4 = vweird.f32 %v858_v13  ;;  %v869_v30 = vand.u32 2147483647, %v858_v13 }
 0xc3f   :  { %v878_v12 = vmul.f32 %v2747_v7, %v877_v10 }
 0xc40   :  { %v872_v32 = vor.u32 1.1754944e-38, %v871_v29  ;;  %vm870_vm6 = vcmp.eq.f32.partialorder %v869_v30, 8.507059e+37 }
 0xc41   :  { %v879_v14 = vadd.f32 %v2747_v7, %v878_v12 }
 0xc43   :  { %v883_v17 = vsel %vm882_vm1, %v2747_v7, %v879_v14 }
 0xc44   :  { %v888_v22 = vsel %vm885_vm2, %v887_v19, %v883_v17  ;;  %v2751_v23 = vpop.eup %2750 }
 0xc45   :  { %v861_v25 = vmul.f32 %v2751_v23, %v858_v13  ;;  %vm866_vm3 = vweird.f32 %v2751_v23  ;;  %v899_v37 = vmul.f32 %v895_v36, %v888_v22 }
 0xc46   :  { %vm867_vm5 = vmor %vm865_vm4, %vm866_vm3 }
 0xc47   :  { %v862_v26 = vsub.f32 1.0, %v861_v25 }
 0xc49   :  { %v863_v27 = vmul.f32 %v2751_v23, %v862_v26 }
 0xc4b   :  { %v864_v28 = vadd.f32 %v2751_v23, %v863_v27 }
 0xc4d   :  { %v868_v31 = vsel %vm867_vm5, %v2751_v23, %v864_v28 }
 0xc4e   :  { %v873_v34 = vsel %vm870_vm6, %v872_v32, %v868_v31 }
 0xc4f   :  { %v898_v47 = vmul.f32 %v894_v45, %v873_v34 }
 0xc8b   :  { %v905_v21 = vpop.permute.xlu2 %904 }
 0xc8c   :  { %v909_v24 = vmul.f32 %v905_v21, %v888_v22 }
 0xc8e   :  { %914 = vrot.lane.b32.xlu1 %v909_v24, %s3178_s6 }
 0xca2   :  { %v903_v33 = vpop.permute.xlu1 %902 }
 0xca3   :  { %v908_v35 = vmul.f32 %v903_v33, %v873_v34 }
 0xca5   :  { %912 = vrot.lane.b32.xlu0 %v908_v35, %s3178_s6 }
 0xd00   :  { %v915_v39 = vpop.permute.xlu1 %914 }
 0xd01   :  { %v3410_v40 = vadd.f32 %v915_v39, %v899_v37 }
 0xd03   :  { %2752 = vtanh.f32 %v3410_v40  ;;  %v1020_v45 = vrot.slane %v3410_v40, 7 }
 0xd09   :  { %v2753_v41 = vpop.eup %2752 }
 0xd0a   :  { %926 = vrot.lane.b32.xlu0 %v2753_v41, %s3178_s6 }
 0xd17   :  { %v913_v43 = vpop.permute.xlu0 %912 }
 0xd18   :  { %v3415_v42 = vadd.f32 %v913_v43, %v898_v47 }
 0xd1a   :  { %2754 = vtanh.f32 %v3415_v42  ;;  %v1019_v41 = vrot.slane %v3415_v42, 7 }
 0xd20   :  { %v2755_v55 = vpop.eup %2754 }
 0xd21   :  { %924 = vrot.lane.b32.xlu2 %v2755_v55, %s3178_s6 }
 0xd7b   :  { %v925_v46 = vpop.permute.xlu2 %924 }
 0xd7c   :  { %v927_v48 = vpop.permute.xlu0 %926  ;;  %v3419_v44 = vmul.f32 %v925_v46, %v873_v34 }
 0xd7d   :  { %v3421_v56 = vmul.f32 %v927_v48, %v888_v22 }
 0xd7e   :  { %v943_v60 = vrot.slane %v3419_v44, 5 }
 0xd7f   :  { %v944_v57 = vrot.slane %v3421_v56, 4 }
 0xd81   :  { %v945_v38 = vsel %vm321_vm9, %v944_v57, %v943_v60 }
 0xd82   :  { %946 = vrot.lane.b32.xlu1 %v945_v38, %s3179_s7 }
 0xdf4   :  { %v947_v61 = vpop.permute.xlu1 %946 }
 0xdf5   :  { %2587 = vmatmul.msk.f32.vlgmr.msrb.gmra.mxu0 %vm162_vm0, %v947_v61 }
 0xe72   :  { %v967_v62 = vpop.f32.mrf.mxu0 }
 0xe73   :  { %v971_v63 = vrot.slane %v967_v62, 2  ;;  %v972_v0 = vrot.slane %v967_v62, 3 }
 0xe75   :  { %v975_v2 = vadd.f32 %v971_v63, %v3279_v20  ;;  %v976_v3 = vadd.f32 %v972_v0, %v3276_v18 }
 0xe77   :  { %2756 = vtanh.f32 %v975_v2  ;;  %v2588_v7 = vmul.f32 -1.442695, %v975_v2  ;;  %v2589_v11 = vmul.f32 -1.442695, %v976_v3 }
 0xe78   :  { %2758 = vtanh.f32 %v976_v3 }
 0xe79   :  { %2760 = vpow2.f32 %v2588_v7 }
 0xe7d   :  { %v2757_v5 = vpop.eup %2756 }
 0xe7e   :  { %v2759_v6 = vpop.eup %2758  ;;  %1027 = vrot.lane.b32.xlu2 %v2757_v5, %s3178_s6 }
 0xe7f   :  { %1029 = vrot.lane.b32.xlu0 %v2759_v6, %s3178_s6  ;;  %v2761_v8 = vpop.eup %2760 }
 0xe80   :  { %v983_v9 = vadd.f32 1.0, %v2761_v8 }
 0xe82   :  { %2762 = vrcp.f32 %v983_v9  ;;  %v996_v19 = vand.u32 2147483648, %v983_v9  ;;  %vm990_vm8 = vweird.f32 %v983_v9  ;;  %v994_v21 = vand.u32 2147483647, %v983_v9 }
 0xe83   :  { %2764 = vpow2.f32 %v2589_v11 }
 0xe84   :  { %v997_v23 = vor.u32 1.1754944e-38, %v996_v19  ;;  %vm995_vm11 = vcmp.eq.f32.partialorder %v994_v21, 8.507059e+37 }
 0xe88   :  { %v2763_v10 = vpop.eup %2762 }
 0xe89   :  { %v986_v12 = vmul.f32 %v2763_v10, %v983_v9  ;;  %v2765_v15 = vpop.eup %2764  ;;  %vm991_vm7 = vweird.f32 %v2763_v10 }
 0xe8a   :  { %v984_v16 = vadd.f32 1.0, %v2765_v15  ;;  %vm992_vm10 = vmor %vm990_vm8, %vm991_vm7  ;;  %vm4583_vm8 = vcmask 253952  }
 0xe8b   :  { %v987_v13 = vsub.f32 1.0, %v986_v12 }
 0xe8c   :  { %2766 = vrcp.f32 %v984_v16  ;;  %v1011_v32 = vand.u32 2147483648, %v984_v16  ;;  %vm1005_vm13 = vweird.f32 %v984_v16  ;;  %v1009_v33 = vand.u32 2147483647, %v984_v16 }
 0xe8d   :  { %v988_v14 = vmul.f32 %v2763_v10, %v987_v13 }
 0xe8e   :  { %v1012_v35 = vor.u32 1.1754944e-38, %v1011_v32  ;;  %vm1010_vm15 = vcmp.eq.f32.partialorder %v1009_v33, 8.507059e+37 }
 0xe8f   :  { %v989_v17 = vadd.f32 %v2763_v10, %v988_v14 }
 0xe91   :  { %v993_v22 = vsel %vm992_vm10, %v2763_v10, %v989_v17  ;;  %vm690_vm10 = vcmask 257027  }
 0xe92   :  { %v998_v25 = vsel %vm995_vm11, %v997_v23, %v993_v22  ;;  %v2767_v27 = vpop.eup %2766  ;;  %vm1065_vm11 = vcmask 260102  }
 0xe93   :  { %v1001_v28 = vmul.f32 %v2767_v27, %v984_v16  ;;  %vm1006_vm12 = vweird.f32 %v2767_v27  ;;  %v1023_v47 = vmul.f32 %v1019_v41, %v998_v25 }
 0xe94   :  { %vm1007_vm14 = vmor %vm1005_vm13, %vm1006_vm12  ;;  %vm441_vm12 = vcmask 254977   ;;  %vm815_vm13 = vcmask 258052  }
 0xe95   :  { %v1002_v29 = vsub.f32 1.0, %v1001_v28 }
 0xe97   :  { %v1003_v30 = vmul.f32 %v2767_v27, %v1002_v29 }
 0xe99   :  { %v1004_v31 = vadd.f32 %v2767_v27, %v1003_v30 }
 0xe9b   :  { %v1008_v34 = vsel %vm1007_vm14, %v2767_v27, %v1004_v31  ;;  %vm565_vm14 = vcmask 256002  }
 0xe9c   :  { %v1013_v37 = vsel %vm1010_vm15, %v1012_v35, %v1008_v34  ;;  %vm940_vm15 = vcmask 259077  }
 0xe9d   :  { %v1024_v43 = vmul.f32 %v1020_v45, %v1013_v37 }
 0xed8   :  { %v1028_v24 = vpop.permute.xlu2 %1027 }
 0xed9   :  { %v1033_v26 = vmul.f32 %v1028_v24, %v998_v25 }
 0xedb   :  { %1037 = vrot.lane.b32.xlu1 %v1033_v26, %s3178_s6 }
 0xef1   :  { %v1030_v36 = vpop.permute.xlu0 %1029 }
 0xef2   :  { %v1034_v39 = vmul.f32 %v1030_v36, %v1013_v37 }
 0xef4   :  { %1039 = vrot.lane.b32.xlu2 %v1034_v39, %s3178_s6 }
 0xf4d   :  { %v1038_v55 = vpop.permute.xlu1 %1037 }
 0xf4e   :  { %v1040_v46 = vpop.permute.xlu2 %1039  ;;  %v3436_v48 = vadd.f32 %v1038_v55, %v1023_v47 }
 0xf4f   :  { %v3438_v60 = vadd.f32 %v1040_v46, %v1024_v43 }
 0xf50   :  { %2768 = vtanh.f32 %v3436_v48  ;;  %v1144_v43 = vrot.slane %v3436_v48, 7 }
 0xf51   :  { %2770 = vtanh.f32 %v3438_v60 }
 0xf56   :  { %v2769_v57 = vpop.eup %2768 }
 0xf57   :  { %v2771_v38 = vpop.eup %2770  ;;  %1049 = vrot.lane.b32.xlu0 %v2769_v57, %s3178_s6 }
 0xf58   :  { %1051 = vrot.lane.b32.xlu1 %v2771_v38, %s3178_s6 }
 0xfc9   :  { %v1050_v42 = vpop.permute.xlu0 %1049 }
 0xfca   :  { %v1052_v40 = vpop.permute.xlu1 %1051  ;;  %v3444_v61 = vmul.f32 %v1050_v42, %v998_v25 }
 0xfcb   :  { %v3446_v62 = vmul.f32 %v1052_v40, %v1013_v37 }
 0xfcc   :  { %v1068_v63 = vrot.slane %v3444_v61, 6 }
 0xfcd   :  { %v1069_v0 = vrot.slane %v3446_v62, 5 }
 0xfcf   :  { %v1070_v2 = vsel %vm321_vm9, %v1069_v0, %v1068_v63 }
 0xfd0   :  { %1071 = vrot.lane.b32.xlu2 %v1070_v2, %s3179_s7 }
0x102a   :  { %v1072_v3 = vpop.permute.xlu2 %1071 }
0x102b   :  { %2590 = vmatmul.msk.f32.vlgmr.msra.gmra.mxu1 %vm162_vm0, %v1072_v3 }
0x10a8   :  { %v1092_v5 = vpop.f32.mrf.mxu1 }
0x10a9   :  { %v1096_v6 = vrot.slane %v1092_v5, 1  ;;  %v1097_v7 = vrot.slane %v1092_v5, 2 }
0x10ab   :  { %v1100_v8 = vadd.f32 %v1096_v6, %v3279_v20  ;;  %v1101_v9 = vadd.f32 %v1097_v7, %v3276_v18  ;;  %v1284_v6 = vld [vmem:[#allocation14 + $0x240] sm:$0xff]  ;;  %v1286_v7 = vld [vmem:[#allocation14 + $0x250] sm:$0xff] }
0x10ac   :  { %1380 = vmatpush.msra.mxu2 %v1284_v6  ;;  %1426 = vmatpush.msra.mxu0 %v1286_v7  ;;  %v1248_v6 = vld [vmem:[#allocation14 + $0x120] sm:$0xff]  ;;  %v1250_v7 = vld [vmem:[#allocation14 + $0x130] sm:$0xff] }
0x10ad   :  { %2772 = vtanh.f32 %v1100_v8  ;;  %v2591_v12 = vmul.f32 -1.442695, %v1100_v8  ;;  %v2592_v13 = vmul.f32 -1.442695, %v1101_v9  ;;  %v1287_v8 = vld [vmem:[#allocation14 + $0x258] sm:$0xff] }
0x10ae   :  { %2774 = vtanh.f32 %v1101_v9  ;;  %1449 = vmatpush.msrb.mxu1 %v1287_v8  ;;  %v1260_v9 = vld [vmem:[#allocation14 + $0x180] sm:$0xff]  ;;  %v1251_v8 = vld [vmem:[#allocation14 + $0x138] sm:$0xff] }
0x10af   :  { %2776 = vpow2.f32 %v2591_v12  ;;  %1381 = vmatpush.msra.mxu2 %v1260_v9  ;;  %v1263_v12 = vld [vmem:[#allocation14 + $0x198] sm:$0xff]  ;;  %v1224_v9 = vld [vmem:[#allocation14 + $0x60] sm:$0xff] }
0x10b0   :  { %2778 = vpow2.f32 %v2592_v13  ;;  %1450 = vmatpush.msrb.mxu1 %v1263_v12  ;;  %v1236_v13 = vld [vmem:[#allocation14 + $0xc0] sm:$0xff]  ;;  %v1227_v12 = vld [vmem:[#allocation14 + $0x78] sm:$0xff] }
0x10b1   :  { %1382 = vmatpush.msra.mxu2 %v1236_v13  ;;  %v1300_v13 = vld [vmem:[#allocation14 + $0x2c0] sm:$0xff] }
0x10b3   :  { %v2773_v10 = vpop.eup %2772 }
0x10b4   :  { %v2775_v11 = vpop.eup %2774  ;;  %1152 = vrot.lane.b32.xlu0 %v2773_v10, %s3178_s6  ;;  %v1261_v10 = vld [vmem:[#allocation14 + $0x188] sm:$0xff] }
0x10b5   :  { %1154 = vrot.lane.b32.xlu1 %v2775_v11, %s3178_s6  ;;  %v2777_v14 = vpop.eup %2776  ;;  %v1262_v11 = vld [vmem:[#allocation14 + $0x190] sm:$0xff] }
0x10b6   :  { %v2779_v15 = vpop.eup %2778  ;;  %v1108_v16 = vadd.f32 1.0, %v2777_v14  ;;  %1427 = vmatpush.msra.mxu0 %v1262_v11  ;;  %v1237_v14 = vld [vmem:[#allocation14 + $0xc8] sm:$0xff]  ;;  %v1226_v11 = vld [vmem:[#allocation14 + $0x70] sm:$0xff] }
0x10b7   :  { %v1109_v17 = vadd.f32 1.0, %v2779_v15  ;;  %v1238_v15 = vld [vmem:[#allocation14 + $0xd0] sm:$0xff] }
0x10b8   :  { %2780 = vrcp.f32 %v1108_v16  ;;  %v1121_v28 = vand.u32 2147483648, %v1108_v16  ;;  %vm1115_vm2 = vweird.f32 %v1108_v16  ;;  %v1119_v30 = vand.u32 2147483647, %v1108_v16  ;;  %1428 = vmatpush.msra.mxu0 %v1238_v15  ;;  %v1302_v15 = vld [vmem:[#allocation14 + $0x2d0] sm:$0xff] }
0x10b9   :  { %2782 = vrcp.f32 %v1109_v17  ;;  %v1136_v29 = vand.u32 2147483648, %v1109_v17  ;;  %vm1130_vm3 = vweird.f32 %v1109_v17  ;;  %v1134_v31 = vand.u32 2147483647, %v1109_v17 }
0x10ba   :  { %v1122_v34 = vor.u32 1.1754944e-38, %v1121_v28  ;;  %vm1120_vm6 = vcmp.eq.f32.partialorder %v1119_v30, 8.507059e+37  ;;  %v1291_v28 = vld [vmem:[#allocation14 + $0x278] sm:$0xff] }
0x10bb   :  { %v1137_v35 = vor.u32 1.1754944e-38, %v1136_v29  ;;  %vm1135_vm7 = vcmp.eq.f32.partialorder %v1134_v31, 8.507059e+37  ;;  %v1266_v29 = vld [vmem:[#allocation14 + $0x1b0] sm:$0xff]  ;;  %v1267_v30 = vld [vmem:[#allocation14 + $0x1b8] sm:$0xff]  ;;  %v1216_v31 = vld [vmem:[#allocation14 + $0x20] sm:$0xff] }
0x10be   :  { %v2781_v20 = vpop.eup %2780 }
0x10bf   :  { %v2783_v18 = vpop.eup %2782  ;;  %v1111_v19 = vmul.f32 %v2781_v20, %v1108_v16  ;;  %vm1116_vm9 = vweird.f32 %v2781_v20  ;;  %v1239_v16 = vld [vmem:[#allocation14 + $0xd8] sm:$0xff] }
0x10c0   :  { %v1126_v21 = vmul.f32 %v2783_v18, %v1109_v17  ;;  %vm1131_vm1 = vweird.f32 %v2783_v18  ;;  %vm1117_vm4 = vmor %vm1115_vm2, %vm1116_vm9  ;;  %v1212_v17 = vld [vmem:[#allocation14] sm:$0xff]  ;;  %1451 = vmatpush.msrb.mxu1 %v1239_v16  ;;  %vm4582_vm9 = vcmask 261127   ;;  %v1303_v16 = vld [vmem:[#allocation14 + $0x2d8] sm:$0xff] }
0x10c1   :  { %v1112_v22 = vsub.f32 1.0, %v1111_v19  ;;  %vm1132_vm5 = vmor %vm1130_vm3, %vm1131_vm1  ;;  %v1215_v19 = vld [vmem:[#allocation14 + $0x18] sm:$0xff]  ;;  %1383 = vmatpush.msra.mxu2 %v1212_v17  ;;  %v1276_v17 = vld [vmem:[#allocation14 + $0x200] sm:$0xff] }
0x10c2   :  { %v1127_v23 = vsub.f32 1.0, %v1126_v21  ;;  %1452 = vmatpush.msrb.mxu1 %v1215_v19  ;;  %v1288_v21 = vld [vmem:[#allocation14 + $0x260] sm:$0xff]  ;;  %v1279_v19 = vld [vmem:[#allocation14 + $0x218] sm:$0xff] }
0x10c3   :  { %v1113_v24 = vmul.f32 %v2781_v20, %v1112_v22  ;;  %v1289_v22 = vld [vmem:[#allocation14 + $0x268] sm:$0xff]  ;;  %1472 = vmatpush.msrb.mxu2 %v1288_v21  ;;  %v1252_v21 = vld [vmem:[#allocation14 + $0x140] sm:$0xff] }
0x10c4   :  { %v1128_v25 = vmul.f32 %v2783_v18, %v1127_v23  ;;  %v1264_v23 = vld [vmem:[#allocation14 + $0x1a0] sm:$0xff]  ;;  %1541 = vmatpush.msra.mxu1 %v1291_v28  ;;  %v1231_v28 = vld [vmem:[#allocation14 + $0x98] sm:$0xff] }
0x10c5   :  { %v1114_v26 = vadd.f32 %v2781_v20, %v1113_v24  ;;  %v1265_v24 = vld [vmem:[#allocation14 + $0x1a8] sm:$0xff]  ;;  %1473 = vmatpush.msrb.mxu2 %v1264_v23  ;;  %v1254_v23 = vld [vmem:[#allocation14 + $0x150] sm:$0xff] }
0x10c6   :  { %v1129_v27 = vadd.f32 %v2783_v18, %v1128_v25  ;;  %v1240_v25 = vld [vmem:[#allocation14 + $0xe0] sm:$0xff]  ;;  %1542 = vmatpush.msra.mxu1 %v1267_v30  ;;  %v1305_v30 = vld [vmem:[#allocation14 + $0x2e8] sm:$0xff] }
0x10c7   :  { %v1118_v32 = vsel %vm1117_vm4, %v2781_v20, %v1114_v26  ;;  %v1213_v20 = vld [vmem:[#allocation14 + $0x8] sm:$0xff]  ;;  %1474 = vmatpush.msrb.mxu2 %v1240_v25  ;;  %v1228_v25 = vld [vmem:[#allocation14 + $0x80] sm:$0xff] }
0x10c8   :  { %v1133_v33 = vsel %vm1132_vm5, %v2783_v18, %v1129_v27  ;;  %v1123_v37 = vsel %vm1120_vm6, %v1122_v34, %v1118_v32  ;;  %v1214_v18 = vld [vmem:[#allocation14 + $0x10] sm:$0xff]  ;;  %v1241_v26 = vld [vmem:[#allocation14 + $0xe8] sm:$0xff]  ;;  %v1243_v34 = vld [vmem:[#allocation14 + $0xf8] sm:$0xff] }
0x10c9   :  { %v1138_v41 = vsel %vm1135_vm7, %v1137_v35, %v1133_v33  ;;  %v1148_v55 = vmul.f32 %v1144_v43, %v1123_v37  ;;  %1429 = vmatpush.msra.mxu0 %v1214_v18  ;;  %v1290_v27 = vld [vmem:[#allocation14 + $0x270] sm:$0xff]  ;;  %v1217_v32 = vld [vmem:[#allocation14 + $0x28] sm:$0xff]  ;;  %1475 = vmatpush.msrb.mxu2 %v1216_v31 }
0x10ca   :  { %v1242_v33 = vld [vmem:[#allocation14 + $0xf0] sm:$0xff]  ;;  %1543 = vmatpush.msra.mxu1 %v1243_v34  ;;  %v1293_v43 = vld [vmem:[#allocation14 + $0x288] sm:$0xff] }
0x10cb   :  { %1518 = vmatpush.msrb.mxu0 %v1290_v27  ;;  %v1218_v35 = vld [vmem:[#allocation14 + $0x30] sm:$0xff]  ;;  %v1281_v34 = vld [vmem:[#allocation14 + $0x228] sm:$0xff] }
0x10cc   :  { %v1278_v18 = vld [vmem:[#allocation14 + $0x210] sm:$0xff] }
0x10cd   :  { %1519 = vmatpush.msrb.mxu0 %v1266_v29  ;;  %v1230_v27 = vld [vmem:[#allocation14 + $0x90] sm:$0xff]  ;;  %v1304_v29 = vld [vmem:[#allocation14 + $0x2e0] sm:$0xff] }
0x10ce   :  { %v1306_v31 = vld [vmem:[#allocation14 + $0x2f0] sm:$0xff] }
0x10cf   :  { %1520 = vmatpush.msrb.mxu0 %v1242_v33  ;;  %v1280_v33 = vld [vmem:[#allocation14 + $0x220] sm:$0xff] }
0x10d1   :  { %1521 = vmatpush.msrb.mxu0 %v1218_v35  ;;  %v1282_v35 = vld [vmem:[#allocation14 + $0x230] sm:$0xff] }
0x1126   :  { %v1153_v36 = vpop.permute.xlu0 %1152 }
0x1127   :  { %v1155_v39 = vpop.permute.xlu1 %1154  ;;  %v1158_v45 = vmul.f32 %v1153_v36, %v1123_v37  ;;  %v1219_v36 = vld [vmem:[#allocation14 + $0x38] sm:$0xff] }
0x1128   :  { %v1159_v47 = vmul.f32 %v1155_v39, %v1138_v41  ;;  %1544 = vmatpush.msra.mxu1 %v1219_v36  ;;  %v1283_v36 = vld [vmem:[#allocation14 + $0x238] sm:$0xff] }
0x1129   :  { %1162 = vrot.lane.b32.xlu2 %v1158_v45, %s3178_s6 }
0x112a   :  { %1164 = vrot.lane.b32.xlu0 %v1159_v47, %s3178_s6  ;;  %v1292_v47 = vld [vmem:[#allocation14 + $0x280] sm:$0xff] }
0x1132   :  { %311 = vrot.lane.b32.xlu0 %v3297_v4, %s3179_s7 }
0x113a   :  { %684 = vrot.lane.b32.xlu0 %v3369_v49, %s3179_s7  ;;  %v1145_v49 = vrot.slane %v3438_v60, 7 }
0x1142   :  { %1059 = vrot.lane.b32.xlu0 %v3444_v61, %s3179_s7 }
0x114a   :  { %437 = vrot.lane.b32.xlu0 %v3321_v59, %s3179_s7  ;;  %v1149_v59 = vmul.f32 %v1145_v49, %v1138_v41  ;;  %v1269_v49 = vld [vmem:[#allocation14 + $0x1c8] sm:$0xff] }
0x1152   :  { %811 = vrot.lane.b32.xlu0 %v3396_v54, %s3179_s7 }
0x1183   :  { %v1163_v46 = vpop.permute.xlu2 %1162 }
0x1184   :  { %v3470_v57 = vadd.f32 %v1163_v46, %v1148_v55  ;;  %v1294_v55 = vld [vmem:[#allocation14 + $0x290] sm:$0xff]  ;;  %v1295_v46 = vld [vmem:[#allocation14 + $0x298] sm:$0xff] }
0x1186   :  { %4610 = vst [vmem:[#allocation28_spill] sm:$0xff] %v3470_v57  ;;  %2784 = vtanh.f32 %v3470_v57 }
0x118c   :  { %v2785_v4 = vpop.eup %2784 }
0x118d   :  { %1174 = vrot.lane.b32.xlu1 %v2785_v4, %s3178_s6  ;;  %v1268_v4 = vld [vmem:[#allocation14 + $0x1c0] sm:$0xff] }
0x1195   :  { %435 = vrot.lane.b32.xlu1 %v3319_v58, %s3179_s7 }
0x119c   :  { %v1165_v38 = vpop.permute.xlu0 %1164 }
0x119d   :  { %v3477_v42 = vadd.f32 %v1165_v38, %v1149_v59  ;;  %809 = vrot.lane.b32.xlu1 %v3394_v51, %s3179_s7  ;;  %v1270_v59 = vld [vmem:[#allocation14 + $0x1d0] sm:$0xff]  ;;  %v1271_v38 = vld [vmem:[#allocation14 + $0x1d8] sm:$0xff] }
0x119f   :  { %4611 = vst [vmem:[#allocation29_spill] sm:$0xff] %v3477_v42  ;;  %2786 = vtanh.f32 %v3477_v42 }
0x11a4   :  { %v312_v54 = vpop.permute.xlu0 %311 }
0x11a5   :  { %v2787_v48 = vpop.eup %2786  ;;  %318 = vst.msk [vmem:[#allocation2] sm:$0x1] %vm4583_vm8, %v312_v54  ;;  %561 = vrot.lane.b32.xlu1 %v3346_v53, %s3179_s7  ;;  %v1244_v54 = vld [vmem:[#allocation14 + $0x100] sm:$0xff] }
0x11a6   :  { %1176 = vrot.lane.b32.xlu2 %v2787_v48, %s3178_s6  ;;  %v1245_v48 = vld [vmem:[#allocation14 + $0x108] sm:$0xff] }
0x11ac   :  { %v685_v58 = vpop.permute.xlu0 %684 }
0x11ad   :  { %691 = vst.msk [vmem:[#allocation2] sm:$0x8] %vm690_vm10, %v685_v58  ;;  %v1246_v58 = vld [vmem:[#allocation14 + $0x110] sm:$0xff] }
0x11ae   :  { %559 = vrot.lane.b32.xlu2 %v3344_v52, %s3179_s7 }
0x11b4   :  { %v1060_v51 = vpop.permute.xlu0 %1059 }
0x11b5   :  { %1066 = vst.msk [vmem:[#allocation2] sm:$0x40] %vm1065_vm11, %v1060_v51  ;;  %v1247_v51 = vld [vmem:[#allocation14 + $0x118] sm:$0xff] }
0x11b6   :  { %934 = vrot.lane.b32.xlu2 %v3419_v44, %s3179_s7 }
0x11bc   :  { %v438_v60 = vpop.permute.xlu0 %437 }
0x11bd   :  { %443 = vst.msk [vmem:[#allocation2 + $0x8] sm:$0x2] %vm441_vm12, %v438_v60 }
0x11be   :  { %313 = vrot.lane.b32.xlu2 %v3294_v1, %s3179_s7 }
0x11c4   :  { %v812_v53 = vpop.permute.xlu0 %811 }
0x11c5   :  { %817 = vst.msk [vmem:[#allocation2 + $0x8] sm:$0x10] %vm815_vm13, %v812_v53  ;;  %v1220_v53 = vld [vmem:[#allocation14 + $0x40] sm:$0xff] }
0x11c6   :  { %686 = vrot.lane.b32.xlu2 %v3371_v50, %s3179_s7 }
0x11ce   :  { %1061 = vrot.lane.b32.xlu2 %v3446_v62, %s3179_s7 }
0x11ff   :  { %v1175_v52 = vpop.permute.xlu1 %1174 }
0x1200   :  { %v1177_v40 = vpop.permute.xlu2 %1176  ;;  %v1180_v44 = vmul.f32 %v1175_v52, %v1123_v37  ;;  %v1221_v52 = vld [vmem:[#allocation14 + $0x48] sm:$0xff] }
0x1201   :  { %v3500_v61 = vmul.f32 %v1177_v40, %v1138_v41  ;;  %v1222_v40 = vld [vmem:[#allocation14 + $0x50] sm:$0xff] }
0x1202   :  { %1184 = vrot.lane.b32.xlu1 %v1180_v44, %s3179_s7  ;;  %v1223_v44 = vld [vmem:[#allocation14 + $0x58] sm:$0xff] }
0x1203   :  { %4612 = vst [vmem:[#allocation30_spill] sm:$0xff] %v3500_v61  ;;  %1186 = vrot.lane.b32.xlu0 %v3500_v61, %s3179_s7 }
0x1207   :  { %v436_v1 = vpop.permute.xlu1 %435 }
0x1208   :  { %v560_v63 = vpop.permute.xlu2 %559  ;;  %442 = vst.msk [vmem:[#allocation2] sm:$0x2] %vm441_vm12, %v436_v1  ;;  %v1296_v1 = vld [vmem:[#allocation14 + $0x2a0] sm:$0xff] }
0x1209   :  { %566 = vst.msk [vmem:[#allocation2] sm:$0x4] %vm565_vm14, %v560_v63  ;;  %v1297_v63 = vld [vmem:[#allocation14 + $0x2a8] sm:$0xff] }
0x120a   :  { %936 = vrot.lane.b32.xlu1 %v3421_v56, %s3179_s7  ;;  %v1285_v56 = vld [vmem:[#allocation14 + $0x248] sm:$0xff] }
0x120b   :  { %1403 = vmatpush.msra.mxu3 %v1285_v56  ;;  %v1249_v56 = vld [vmem:[#allocation14 + $0x128] sm:$0xff] }
0x120d   :  { %1404 = vmatpush.msra.mxu3 %v1261_v10  ;;  %v1225_v10 = vld [vmem:[#allocation14 + $0x68] sm:$0xff] }
0x120f   :  { %v810_v50 = vpop.permute.xlu1 %809  ;;  %1405 = vmatpush.msra.mxu3 %v1237_v14  ;;  %v1301_v14 = vld [vmem:[#allocation14 + $0x2c8] sm:$0xff] }
0x1210   :  { %v935_v62 = vpop.permute.xlu2 %934  ;;  %816 = vst.msk [vmem:[#allocation2] sm:$0x10] %vm815_vm13, %v810_v50  ;;  %v1298_v50 = vld [vmem:[#allocation14 + $0x2b0] sm:$0xff] }
0x1211   :  { %941 = vst.msk [vmem:[#allocation2] sm:$0x20] %vm940_vm15, %v935_v62  ;;  %1406 = vmatpush.msra.mxu3 %v1213_v20  ;;  %v1299_v62 = vld [vmem:[#allocation14 + $0x2b8] sm:$0xff]  ;;  %v1277_v20 = vld [vmem:[#allocation14 + $0x208] sm:$0xff] }
0x1213   :  { %1495 = vmatpush.msrb.mxu3 %v1289_v22  ;;  %v1253_v22 = vld [vmem:[#allocation14 + $0x148] sm:$0xff] }
0x1215   :  { %1496 = vmatpush.msrb.mxu3 %v1265_v24  ;;  %v1255_v24 = vld [vmem:[#allocation14 + $0x158] sm:$0xff] }
0x1217   :  { %v562_v0 = vpop.permute.xlu1 %561  ;;  %1497 = vmatpush.msrb.mxu3 %v1241_v26  ;;  %v1229_v26 = vld [vmem:[#allocation14 + $0x88] sm:$0xff] }
0x1218   :  { %v314_v2 = vpop.permute.xlu2 %313  ;;  %567 = vst.msk [vmem:[#allocation2 + $0x8] sm:$0x4] %vm565_vm14, %v562_v0  ;;  %v1272_v0 = vld [vmem:[#allocation14 + $0x1e0] sm:$0xff] }
0x1219   :  { %319 = vst.msk [vmem:[#allocation2 + $0x8] sm:$0x1] %vm4583_vm8, %v314_v2  ;;  %1498 = vmatpush.msrb.mxu3 %v1217_v32  ;;  %v1273_v2 = vld [vmem:[#allocation14 + $0x1e8] sm:$0xff]  ;;  %v1307_v32 = vld [vmem:[#allocation14 + $0x2f8] sm:$0xff] }
0x1220   :  { %v687_v3 = vpop.permute.xlu2 %686 }
0x1221   :  { %692 = vst.msk [vmem:[#allocation2 + $0x8] sm:$0x8] %vm690_vm10, %v687_v3  ;;  %v1274_v3 = vld [vmem:[#allocation14 + $0x1f0] sm:$0xff] }
0x1228   :  { %v1062_v5 = vpop.permute.xlu2 %1061 }
0x1229   :  { %1067 = vst.msk [vmem:[#allocation2 + $0x8] sm:$0x40] %vm1065_vm11, %v1062_v5  ;;  %v1275_v5 = vld [vmem:[#allocation14 + $0x1f8] sm:$0xff] }
0x1274   :  { %v1185_v37 = vpop.permute.xlu1 %1184 }
0x1275   :  { %v1187_v39 = vpop.permute.xlu0 %1186  ;;  %1191 = vst.msk [vmem:[#allocation2] sm:$0x80] %vm4582_vm9, %v1185_v37 }
0x1276   :  { %1192 = vst.msk [vmem:[#allocation2 + $0x8] sm:$0x80] %vm4582_vm9, %v1187_v39  ;;  %v1257_v39 = vld [vmem:[#allocation14 + $0x168] sm:$0xff] }
0x1277   :  { %1197 = vst.msk [vmem:[#allocation18 - $0x7] sm:$0x80] %vm4582_vm9, %v1185_v37  ;;  %v1256_v37 = vld [vmem:[#allocation14 + $0x160] sm:$0xff] }
0x127c   :  { %v3516_v41 = vld [vmem:[#allocation2] sm:$0xff]  ;;  %v937_v45 = vpop.permute.xlu1 %936 }
0x127d   :  { %942 = vst.msk [vmem:[#allocation2 + $0x8] sm:$0x20] %vm940_vm15, %v937_v45  ;;  %2593 = vmatmul.msk.f32.vlgmr.msra.gmra.mxu2 %vm162_vm0, %v3516_v41  ;;  %2595 = vmatmul.msk.f32.vlgmr.msra.gmra.mxu3 %vm162_vm0, %v3516_v41  ;;  %v1258_v45 = vld [vmem:[#allocation14 + $0x170] sm:$0xff] }
0x127e   :  { %2597 = vmatmul.msk.f32.vlgmr.msra.gmra.mxu0 %vm162_vm0, %v3516_v41  ;;  %2599 = vmatmul.msk.f32.vlgmr.msrb.gmra.mxu1 %vm162_vm0, %v3516_v41 }
0x127f   :  { %1564 = vmatpush.msra.mxu2 %v1292_v47  ;;  %1587 = vmatpush.msra.mxu3 %v1293_v43  ;;  %v1259_v47 = vld [vmem:[#allocation14 + $0x178] sm:$0xff]  ;;  %v1232_v43 = vld [vmem:[#allocation14 + $0xa0] sm:$0xff] }
0x1280   :  { %1610 = vmatpush.msra.mxu0 %v1294_v55  ;;  %1633 = vmatpush.msrb.mxu1 %v1295_v46  ;;  %v1233_v55 = vld [vmem:[#allocation14 + $0xa8] sm:$0xff]  ;;  %v1234_v46 = vld [vmem:[#allocation14 + $0xb0] sm:$0xff] }
0x1281   :  { %1565 = vmatpush.msra.mxu2 %v1268_v4  ;;  %1588 = vmatpush.msra.mxu3 %v1269_v49  ;;  %v1235_v4 = vld [vmem:[#allocation14 + $0xb8] sm:$0xff] }
0x1282   :  { %1611 = vmatpush.msra.mxu0 %v1270_v59  ;;  %1634 = vmatpush.msrb.mxu1 %v1271_v38 }
0x1283   :  { %1566 = vmatpush.msra.mxu2 %v1244_v54  ;;  %1589 = vmatpush.msra.mxu3 %v1245_v48 }
0x1284   :  { %v3527_v60 = vld [vmem:[#allocation2 + $0x8] sm:$0xff]  ;;  %1612 = vmatpush.msra.mxu0 %v1246_v58  ;;  %1635 = vmatpush.msrb.mxu1 %v1247_v51 }
0x1285   :  { %2594 = vmatmul.msk.f32.gmra.mxu2 %vm162_vm0, %v3527_v60  ;;  %2596 = vmatmul.msk.f32.gmra.mxu3 %vm162_vm0, %v3527_v60 }
0x1286   :  { %2598 = vmatmul.msk.f32.gmra.mxu0 %vm162_vm0, %v3527_v60  ;;  %2600 = vmatmul.msk.f32.gmra.mxu1 %vm162_vm0, %v3527_v60 }
0x1287   :  { %1567 = vmatpush.msra.mxu2 %v1220_v53  ;;  %1590 = vmatpush.msra.mxu3 %v1221_v52 }
0x1288   :  { %1613 = vmatpush.msra.mxu0 %v1222_v40  ;;  %1636 = vmatpush.msrb.mxu1 %v1223_v44 }
0x128d   :  { %2601 = vmatmul.msk.f32.vlgmr.msrb.gmra.mxu2 %vm162_vm0, %v3516_v41  ;;  %2603 = vmatmul.msk.f32.vlgmr.msrb.gmra.mxu3 %vm162_vm0, %v3516_v41 }
0x128e   :  { %2605 = vmatmul.msk.f32.vlgmr.msrb.gmra.mxu0 %vm162_vm0, %v3516_v41  ;;  %2607 = vmatmul.msk.f32.vlgmr.msra.gmra.mxu1 %vm162_vm0, %v3516_v41 }
0x128f   :  { %1656 = vmatpush.msrb.mxu2 %v1296_v1  ;;  %1679 = vmatpush.msrb.mxu3 %v1297_v63 }
0x1290   :  { %1702 = vmatpush.msrb.mxu0 %v1298_v50  ;;  %1725 = vmatpush.msra.mxu1 %v1299_v62 }
0x1291   :  { %1657 = vmatpush.msrb.mxu2 %v1272_v0  ;;  %1680 = vmatpush.msrb.mxu3 %v1273_v2 }
0x1292   :  { %1703 = vmatpush.msrb.mxu0 %v1274_v3  ;;  %1726 = vmatpush.msra.mxu1 %v1275_v5 }
0x1293   :  { %1658 = vmatpush.msrb.mxu2 %v1248_v6  ;;  %1681 = vmatpush.msrb.mxu3 %v1249_v56 }
0x1294   :  { %1704 = vmatpush.msrb.mxu0 %v1250_v7  ;;  %1727 = vmatpush.msra.mxu1 %v1251_v8 }
0x1295   :  { %2602 = vmatmul.msk.f32.gmra.mxu2 %vm162_vm0, %v3527_v60  ;;  %2604 = vmatmul.msk.f32.gmra.mxu3 %vm162_vm0, %v3527_v60 }
0x1296   :  { %2606 = vmatmul.msk.f32.gmra.mxu0 %vm162_vm0, %v3527_v60  ;;  %2608 = vmatmul.msk.f32.gmra.mxu1 %vm162_vm0, %v3527_v60 }
0x1297   :  { %1659 = vmatpush.msrb.mxu2 %v1224_v9  ;;  %1682 = vmatpush.msrb.mxu3 %v1225_v10  ;;  %v1308_v10 = vld [vmem:[#allocation15] sm:$0xff] }
0x1298   :  { %1705 = vmatpush.msrb.mxu0 %v1226_v11  ;;  %1728 = vmatpush.msra.mxu1 %v1227_v12  ;;  %v1314_v11 = vperm.slane %v1308_v10, 0  ;;  %v1315_v12 = vperm.slane %v1308_v10, 1 }
0x129d   :  { %2609 = vmatmul.msk.f32.vlgmr.msra.gmra.mxu2 %vm162_vm0, %v3516_v41  ;;  %2611 = vmatmul.msk.f32.vlgmr.msra.gmra.mxu3 %vm162_vm0, %v3516_v41 }
0x129e   :  { %2613 = vmatmul.msk.f32.vlgmr.msra.gmra.mxu0 %vm162_vm0, %v3516_v41  ;;  %2615 = vmatmul.msk.f32.vlgmr.msrb.gmra.mxu1 %vm162_vm0, %v3516_v41 }
0x129f   :  { %1748 = vmatpush.msra.mxu2 %v1300_v13  ;;  %1771 = vmatpush.msra.mxu3 %v1301_v14 }
0x12a0   :  { %1794 = vmatpush.msra.mxu0 %v1302_v15  ;;  %1817 = vmatpush.msrb.mxu1 %v1303_v16  ;;  %v1316_v15 = vperm.slane %v1308_v10, 2  ;;  %v1317_v16 = vperm.slane %v1308_v10, 3 }
0x12a1   :  { %1749 = vmatpush.msra.mxu2 %v1276_v17  ;;  %1772 = vmatpush.msra.mxu3 %v1277_v20  ;;  %v1318_v17 = vperm.slane %v1308_v10, 4  ;;  %v1319_v20 = vperm.slane %v1308_v10, 5 }
0x12a2   :  { %1795 = vmatpush.msra.mxu0 %v1278_v18  ;;  %1818 = vmatpush.msrb.mxu1 %v1279_v19 }
0x12a3   :  { %1750 = vmatpush.msra.mxu2 %v1252_v21  ;;  %1773 = vmatpush.msra.mxu3 %v1253_v22 }
0x12a4   :  { %1796 = vmatpush.msra.mxu0 %v1254_v23  ;;  %1819 = vmatpush.msrb.mxu1 %v1255_v24 }
0x12a5   :  { %2610 = vmatmul.msk.f32.gmra.mxu2 %vm162_vm0, %v3527_v60  ;;  %2612 = vmatmul.msk.f32.gmra.mxu3 %vm162_vm0, %v3527_v60 }
0x12a6   :  { %2614 = vmatmul.msk.f32.gmra.mxu0 %vm162_vm0, %v3527_v60  ;;  %2616 = vmatmul.msk.f32.gmra.mxu1 %vm162_vm0, %v3527_v60 }
0x12a7   :  { %1751 = vmatpush.msra.mxu2 %v1228_v25  ;;  %1774 = vmatpush.msra.mxu3 %v1229_v26 }
0x12a8   :  { %1797 = vmatpush.msra.mxu0 %v1230_v27  ;;  %1820 = vmatpush.msrb.mxu1 %v1231_v28  ;;  %v1320_v27 = vperm.slane %v1308_v10, 6  ;;  %v1321_v28 = vperm.slane %v1308_v10, 7 }
0x12ad   :  { %2617 = vmatmul.msk.f32.vlgmr.msrb.gmra.mxu2 %vm162_vm0, %v3516_v41  ;;  %2619 = vmatmul.msk.f32.vlgmr.msrb.gmra.mxu3 %vm162_vm0, %v3516_v41 }
0x12ae   :  { %2621 = vmatmul.msk.f32.vlgmr.msrb.gmra.mxu0 %vm162_vm0, %v3516_v41  ;;  %2623 = vmatmul.msk.f32.vlgmr.msra.gmra.mxu1 %vm162_vm0, %v3516_v41 }
0x12af   :  { %1840 = vmatpush.msrb.mxu2 %v1304_v29  ;;  %1863 = vmatpush.msrb.mxu3 %v1305_v30  ;;  %v3653_v29 = vld [vmem:[#allocation15 + $0x8] sm:$0xff] }
0x12b0   :  { %1886 = vmatpush.msrb.mxu0 %v1306_v31  ;;  %1909 = vmatpush.msra.mxu1 %v1307_v32  ;;  %v1322_v32 = vperm.slane %v3653_v29, 0 }
0x12b1   :  { %1841 = vmatpush.msrb.mxu2 %v1280_v33  ;;  %1864 = vmatpush.msrb.mxu3 %v1281_v34  ;;  %v1323_v33 = vperm.slane %v3653_v29, 1 }
0x12b2   :  { %1887 = vmatpush.msrb.mxu0 %v1282_v35  ;;  %1910 = vmatpush.msra.mxu1 %v1283_v36 }
0x12b3   :  { %1842 = vmatpush.msrb.mxu2 %v1256_v37  ;;  %1865 = vmatpush.msrb.mxu3 %v1257_v39 }
0x12b4   :  { %1888 = vmatpush.msrb.mxu0 %v1258_v45  ;;  %1911 = vmatpush.msra.mxu1 %v1259_v47  ;;  %v1324_v47 = vperm.slane %v3653_v29, 2 }
0x12b5   :  { %2618 = vmatmul.msk.f32.gmra.mxu2 %vm162_vm0, %v3527_v60  ;;  %2620 = vmatmul.msk.f32.gmra.mxu3 %vm162_vm0, %v3527_v60 }
0x12b6   :  { %2622 = vmatmul.msk.f32.gmra.mxu0 %vm162_vm0, %v3527_v60  ;;  %2624 = vmatmul.msk.f32.gmra.mxu1 %vm162_vm0, %v3527_v60 }
0x12b7   :  { %1843 = vmatpush.msrb.mxu2 %v1232_v43  ;;  %1866 = vmatpush.msrb.mxu3 %v1233_v55  ;;  %v1325_v43 = vperm.slane %v3653_v29, 3 }
0x12b8   :  { %1889 = vmatpush.msrb.mxu0 %v1234_v46  ;;  %1912 = vmatpush.msra.mxu1 %v1235_v4 }
0x12bd   :  { %2625 = vmatmul.msk.f32.vlgmr.msra.gmra.mxu2 %vm162_vm0, %v3516_v41  ;;  %2627 = vmatmul.msk.f32.vlgmr.msra.gmra.mxu3 %vm162_vm0, %v3516_v41 }
0x12be   :  { %2629 = vmatmul.msk.f32.vlgmr.msra.gmra.mxu0 %vm162_vm0, %v3516_v41  ;;  %2631 = vmatmul.msk.f32.vlgmr.msrb.gmra.mxu1 %vm162_vm0, %v3516_v41 }
0x12c5   :  { %2626 = vmatmul.msk.f32.gmra.mxu2 %vm162_vm0, %v3527_v60  ;;  %2628 = vmatmul.msk.f32.gmra.mxu3 %vm162_vm0, %v3527_v60 }
0x12c6   :  { %2630 = vmatmul.msk.f32.gmra.mxu0 %vm162_vm0, %v3527_v60  ;;  %2632 = vmatmul.msk.f32.gmra.mxu1 %vm162_vm0, %v3527_v60 }
0x12cd   :  { %2633 = vmatmul.msk.f32.vlgmr.msrb.gmra.mxu2 %vm162_vm0, %v3516_v41  ;;  %2635 = vmatmul.msk.f32.vlgmr.msrb.gmra.mxu3 %vm162_vm0, %v3516_v41 }
0x12ce   :  { %2637 = vmatmul.msk.f32.vlgmr.msrb.gmra.mxu0 %vm162_vm0, %v3516_v41  ;;  %2639 = vmatmul.msk.f32.vlgmr.msra.gmra.mxu1 %vm162_vm0, %v3516_v41 }
0x12d5   :  { %2634 = vmatmul.msk.f32.gmra.mxu2 %vm162_vm0, %v3527_v60  ;;  %2636 = vmatmul.msk.f32.gmra.mxu3 %vm162_vm0, %v3527_v60 }
0x12d6   :  { %2638 = vmatmul.msk.f32.gmra.mxu0 %vm162_vm0, %v3527_v60  ;;  %2640 = vmatmul.msk.f32.gmra.mxu1 %vm162_vm0, %v3527_v60 }
0x12fb   :  { %v1431_v49 = vpop.f32.mrf.mxu0  ;;  %v1454_v59 = vpop.f32.mrf.mxu1 }
0x12fc   :  { %v3645_v23 = vadd.f32 %v1431_v49, %v1316_v15  ;;  %v3647_v24 = vadd.f32 %v1454_v59, %v1317_v16 }
0x12fe   :  { %4615 = vst [vmem:[#allocation33_spill] sm:$0xff] %v3645_v23 }
0x12ff   :  { %4616 = vst [vmem:[#allocation34_spill] sm:$0xff] %v3647_v24 }
0x1300   :  { %v1385_v38 = vpop.f32.mrf.mxu2  ;;  %v1408_v54 = vpop.f32.mrf.mxu3 }
0x1301   :  { %v3641_v21 = vadd.f32 %v1385_v38, %v1314_v11  ;;  %v3643_v22 = vadd.f32 %v1408_v54, %v1315_v12 }
0x1303   :  { %v1434_v48 = vpop.f32.mrf.mxu0  ;;  %v1457_v58 = vpop.f32.mrf.mxu1  ;;  %4613 = vst [vmem:[#allocation31_spill] sm:$0xff] %v3641_v21  ;;  %v1920_v30 = vmax.f32 %v3641_v21, %v3645_v23  ;;  %v1921_v31 = vmax.f32 %v3643_v22, %v3647_v24 }
0x1304   :  { %4614 = vst [vmem:[#allocation32_spill] sm:$0xff] %v3643_v22  ;;  %v3685_v54 = vadd.f32 %v1434_v48, %v1316_v15  ;;  %v1328_v15 = vperm.slane %v3653_v29, 6 }
0x1308   :  { %v1388_v51 = vpop.f32.mrf.mxu2  ;;  %v1411_v41 = vpop.f32.mrf.mxu3 }
0x1309   :  { %v3667_v39 = vadd.f32 %v1388_v51, %v1314_v11  ;;  %v3669_v45 = vadd.f32 %v1411_v41, %v1315_v12  ;;  %v3687_v51 = vadd.f32 %v1457_v58, %v1317_v16  ;;  %v1329_v16 = vperm.slane %v3653_v29, 7 }
0x130b   :  { %v1523_v53 = vpop.f32.mrf.mxu0  ;;  %v1546_v52 = vpop.f32.mrf.mxu1  ;;  %v1946_v48 = vmax.f32 %v3669_v45, %v3687_v51 }
0x130c   :  { %v3677_v4 = vadd.f32 %v1523_v53, %v1320_v27  ;;  %v3679_v49 = vadd.f32 %v1546_v52, %v1321_v28  ;;  %v1326_v53 = vperm.slane %v3653_v29, 4  ;;  %v1327_v52 = vperm.slane %v3653_v29, 5 }
0x1310   :  { %v1477_v40 = vpop.f32.mrf.mxu2  ;;  %v1500_v44 = vpop.f32.mrf.mxu3 }
0x1311   :  { %v3649_v25 = vadd.f32 %v1477_v40, %v1318_v17  ;;  %v3651_v26 = vadd.f32 %v1500_v44, %v1319_v20 }
0x1313   :  { %v3617_v1 = vpop.f32.mrf.mxu0  ;;  %v3619_v63 = vpop.f32.mrf.mxu1  ;;  %4617 = vst [vmem:[#allocation35_spill] sm:$0xff] %v3649_v25  ;;  %v1922_v36 = vmax.f32 %v1920_v30, %v3649_v25  ;;  %v1923_v37 = vmax.f32 %v1921_v31, %v3651_v26 }
0x1314   :  { %4618 = vst [vmem:[#allocation36_spill] sm:$0xff] %v3651_v26 }
0x1315   :  { %v1924_v44 = vmax.f32 %v1922_v36, %v3677_v4  ;;  %v1925_v10 = vmax.f32 %v1923_v37, %v3679_v49  ;;  %v3718_v36 = vadd.f32 %v3617_v1, %v1320_v27  ;;  %v3721_v37 = vadd.f32 %v3619_v63, %v1321_v28 }
0x1318   :  { %v1480_v50 = vpop.f32.mrf.mxu2  ;;  %v1503_v62 = vpop.f32.mrf.mxu3 }
0x1319   :  { %v3689_v41 = vadd.f32 %v1480_v50, %v1318_v17  ;;  %v3691_v40 = vadd.f32 %v1503_v62, %v1319_v20 }
0x131b   :  { %v3621_v0 = vpop.f32.mrf.mxu0  ;;  %v3623_v60 = vpop.f32.mrf.mxu1  ;;  %v1948_v12 = vmax.f32 %v1946_v48, %v3691_v40 }
0x131c   :  { %v3708_v17 = vadd.f32 %v3621_v0, %v1324_v47  ;;  %v3711_v20 = vadd.f32 %v3623_v60, %v1325_v43  ;;  %v3729_v0 = vld [vmem:[#allocation15 + $0x10] sm:$0xff] }
0x131d   :  { %v1330_v1 = vperm.slane %v3729_v0, 0  ;;  %v1331_v27 = vperm.slane %v3729_v0, 1 }
0x131e   :  { %4619 = vst [vmem:[#allocation37_spill] sm:$0xff] %v3711_v20 }
0x1320   :  { %v1569_v2 = vpop.f32.mrf.mxu2  ;;  %v1592_v3 = vpop.f32.mrf.mxu3 }
0x1321   :  { %v3681_v59 = vadd.f32 %v1569_v2, %v1322_v32  ;;  %v3683_v38 = vadd.f32 %v1592_v3, %v1323_v33  ;;  %v1945_v2 = vmax.f32 %v3667_v39, %v3685_v54 }
0x1323   :  { %v3625_v5 = vpop.f32.mrf.mxu0  ;;  %v3627_v6 = vpop.f32.mrf.mxu1  ;;  %v1926_v58 = vmax.f32 %v1924_v44, %v3681_v59  ;;  %v1927_v50 = vmax.f32 %v1925_v10, %v3683_v38  ;;  %v1947_v11 = vmax.f32 %v1945_v2, %v3689_v41 }
0x1325   :  { %v1949_v63 = vmax.f32 %v1947_v11, %v3718_v36 }
0x1328   :  { %v3629_v56 = vpop.f32.mrf.mxu2  ;;  %v3631_v7 = vpop.f32.mrf.mxu3 }
0x1329   :  { %v3724_v44 = vadd.f32 %v3629_v56, %v1322_v32  ;;  %v3727_v29 = vadd.f32 %v3631_v7, %v1323_v33  ;;  %v1950_v56 = vmax.f32 %v1948_v12, %v3721_v37 }
0x132b   :  { %v3633_v8 = vpop.f32.mrf.mxu0  ;;  %v3635_v9 = vpop.f32.mrf.mxu1  ;;  %v1951_v32 = vmax.f32 %v1949_v63, %v3724_v44  ;;  %v1952_v33 = vmax.f32 %v1950_v56, %v3727_v29  ;;  %v1332_v63 = vperm.slane %v3729_v0, 2 }
0x132c   :  { %v3742_v2 = vadd.f32 %v3633_v8, %v1328_v15  ;;  %v3745_v48 = vadd.f32 %v3635_v9, %v1329_v16  ;;  %v1333_v8 = vperm.slane %v3729_v0, 3 }
0x132e   :  { %4621 = vst [vmem:[#allocation39_spill] sm:$0xff] %v3742_v2 }
0x1330   :  { %v1661_v13 = vpop.f32.mrf.mxu2  ;;  %v1684_v14 = vpop.f32.mrf.mxu3 }
0x1331   :  { %v3713_v30 = vadd.f32 %v1661_v13, %v1326_v53  ;;  %v3715_v31 = vadd.f32 %v1684_v14, %v1327_v52  ;;  %v1928_v13 = vmax.f32 %v1926_v58, %v3708_v17  ;;  %v1929_v14 = vmax.f32 %v1927_v50, %v3711_v20 }
0x1333   :  { %v3637_v18 = vpop.f32.mrf.mxu0  ;;  %v3639_v19 = vpop.f32.mrf.mxu1  ;;  %4620 = vst [vmem:[#allocation38_spill] sm:$0xff] %v3715_v31  ;;  %v1930_v28 = vmax.f32 %v1928_v13, %v3713_v30  ;;  %v1931_v7 = vmax.f32 %v1929_v14, %v3715_v31  ;;  %v3752_v13 = vadd.f32 %v3625_v5, %v1324_v47  ;;  %v3755_v14 = vadd.f32 %v3627_v6, %v1325_v43 }
0x1335   :  { %4624 = vst [vmem:[#allocation42_spill] sm:$0xff] %v3755_v14  ;;  %v1953_v5 = vmax.f32 %v1951_v32, %v3752_v13  ;;  %v1954_v47 = vmax.f32 %v1952_v33, %v3755_v14  ;;  %v1336_v32 = vperm.slane %v3729_v0, 6  ;;  %v1337_v33 = vperm.slane %v3729_v0, 7 }
0x1338   :  { %v3661_v34 = vpop.f32.mrf.mxu2  ;;  %v3663_v35 = vpop.f32.mrf.mxu3 }
0x1339   :  { %v3760_v56 = vadd.f32 %v3661_v34, %v1326_v53  ;;  %v3763_v9 = vadd.f32 %v3663_v35, %v1327_v52  ;;  %v1334_v34 = vperm.slane %v3729_v0, 4  ;;  %v1335_v53 = vperm.slane %v3729_v0, 5 }
0x133b   :  { %v3673_v55 = vpop.f32.mrf.mxu0  ;;  %v3675_v46 = vpop.f32.mrf.mxu1  ;;  %4625 = vst [vmem:[#allocation43_spill] sm:$0xff] %v3760_v56  ;;  %v1955_v35 = vmax.f32 %v1953_v5, %v3760_v56  ;;  %v1956_v52 = vmax.f32 %v1954_v47, %v3763_v9 }
0x133c   :  { %4626 = vst [vmem:[#allocation44_spill] sm:$0xff] %v3763_v9 }
0x1340   :  { %v1753_v62 = vpop.f32.mrf.mxu2  ;;  %v1776_v3 = vpop.f32.mrf.mxu3 }
0x1341   :  { %v3747_v58 = vadd.f32 %v1753_v62, %v1330_v1  ;;  %v3749_v50 = vadd.f32 %v1776_v3, %v1331_v27  ;;  %v1932_v62 = vmax.f32 %v1930_v28, %v3742_v2  ;;  %v1933_v3 = vmax.f32 %v1931_v7, %v3745_v48 }
0x1342   :  { %v3776_v28 = vadd.f32 %v3673_v55, %v1332_v63  ;;  %v3779_v7 = vadd.f32 %v3675_v46, %v1333_v8 }
0x1343   :  { %v1802_v60 = vpop.f32.mrf.mxu0  ;;  %v1825_v10 = vpop.f32.mrf.mxu1  ;;  %4622 = vst [vmem:[#allocation40_spill] sm:$0xff] %v3747_v58  ;;  %v1934_v6 = vmax.f32 %v1932_v62, %v3747_v58  ;;  %v1935_v43 = vmax.f32 %v1933_v3, %v3749_v50  ;;  %v3784_v62 = vadd.f32 %v3637_v18, %v1328_v15  ;;  %v3787_v3 = vadd.f32 %v3639_v19, %v1329_v16 }
0x1344   :  { %4623 = vst [vmem:[#allocation41_spill] sm:$0xff] %v3749_v50 }
0x1345   :  { %4627 = vst [vmem:[#allocation45_spill] sm:$0xff] %v3779_v7  ;;  %v1936_v5 = vmax.f32 %v1934_v6, %v3776_v28  ;;  %v1937_v55 = vmax.f32 %v1935_v43, %v3779_v7  ;;  %v1957_v18 = vmax.f32 %v1955_v35, %v3784_v62  ;;  %v1958_v15 = vmax.f32 %v1956_v52, %v3787_v3 }
0x1346   :  { %4628 = vst [vmem:[#allocation46_spill] sm:$0xff] %v3784_v62  ;;  %v3813_v43 = vadd.f32 %v1825_v10, %v1333_v8 }
0x1347   :  { %4629 = vst [vmem:[#allocation47_spill] sm:$0xff] %v3787_v3 }
0x1348   :  { %v1756_v11 = vpop.f32.mrf.mxu2  ;;  %v1779_v12 = vpop.f32.mrf.mxu3  ;;  %4634 = vst [vmem:[#allocation52_spill] sm:$0xff] %v3813_v43 }
0x1349   :  { %v3791_v9 = vadd.f32 %v1756_v11, %v1330_v1  ;;  %v3793_v46 = vadd.f32 %v1779_v12, %v1331_v27  ;;  %v3811_v12 = vadd.f32 %v1802_v60, %v1332_v63 }
0x134b   :  { %v1891_v42 = vpop.f32.mrf.mxu0  ;;  %v1914_v57 = vpop.f32.mrf.mxu1  ;;  %4630 = vst [vmem:[#allocation48_spill] sm:$0xff] %v3791_v9  ;;  %v1959_v1 = vmax.f32 %v1957_v18, %v3791_v9  ;;  %v1960_v27 = vmax.f32 %v1958_v15, %v3793_v46 }
0x134c   :  { %4631 = vst [vmem:[#allocation49_spill] sm:$0xff] %v3793_v46  ;;  %v3801_v19 = vadd.f32 %v1891_v42, %v1336_v32  ;;  %v3803_v16 = vadd.f32 %v1914_v57, %v1337_v33 }
0x134d   :  { %4633 = vst [vmem:[#allocation51_spill] sm:$0xff] %v3811_v12  ;;  %v1962_v15 = vmax.f32 %v1960_v27, %v3813_v43 }
0x1350   :  { %v1845_v61 = vpop.f32.mrf.mxu2  ;;  %v1868_v47 = vpop.f32.mrf.mxu3 }
0x1351   :  { %v3795_v56 = vadd.f32 %v1845_v61, %v1334_v34  ;;  %v3797_v14 = vadd.f32 %v1868_v47, %v1335_v53 }
0x1353   :  { %4632 = vst [vmem:[#allocation50_spill] sm:$0xff] %v3797_v14  ;;  %v1938_v0 = vmax.f32 %v1936_v5, %v3795_v56  ;;  %v1939_v6 = vmax.f32 %v1937_v55, %v3797_v14  ;;  %v1894_v42 = vpop.f32.mrf.mxu0  ;;  %v1917_v35 = vpop.f32.mrf.mxu1  ;;  %v1961_v55 = vmax.f32 %v1959_v1, %v3811_v12  ;;  %v2265_v1 = vlaneseq }
0x1354   :  { %v3823_v60 = vadd.f32 %v1917_v35, %v1337_v33 }
0x1355   :  { %v1940_v61 = vmax.f32 %v1938_v0, %v3801_v19  ;;  %v1941_v11 = vmax.f32 %v1939_v6, %v3803_v16  ;;  %v3821_v0 = vadd.f32 %v1894_v42, %v1336_v32 }
0x1356   :  { %4638 = vst [vmem:[#allocation56_spill] sm:$0xff] %v3823_v60 }
0x1357   :  { %v1942_v57 = vmax.f32 %v1940_v61, %v1941_v11  ;;  %4637 = vst [vmem:[#allocation55_spill] sm:$0xff] %v3821_v0 }
0x1358   :  { %v1848_v52 = vpop.f32.mrf.mxu2  ;;  %v1871_v47 = vpop.f32.mrf.mxu3 }
0x1359   :  { %v3815_v5 = vadd.f32 %v1848_v52, %v1334_v34  ;;  %v3818_v18 = vadd.f32 %v1871_v47, %v1335_v53  ;;  %1943 = vmax.xlane.f32.xlu1 %v1942_v57  ;;  %v3829_v53 = vand.u32 127, %v2265_v1 }
0x135b   :  { %4635 = vst [vmem:[#allocation53_spill] sm:$0xff] %v3815_v5  ;;  %v1963_v10 = vmax.f32 %v1961_v55, %v3815_v5  ;;  %v1964_v63 = vmax.f32 %v1962_v15, %v3818_v18  ;;  %v3832_v27 = vadd.s32 128, %v3829_v53  ;;  %v3835_v32 = vadd.s32 256, %v3829_v53 }
0x135c   :  { %4636 = vst [vmem:[#allocation54_spill] sm:$0xff] %v3818_v18  ;;  %v3838_v33 = vadd.s32 384, %v3829_v53  ;;  %v3841_v61 = vadd.s32 512, %v3829_v53  ;;  %v3844_v11 = vadd.s32 640, %v3829_v53  ;;  %v3847_v42 = vadd.s32 768, %v3829_v53 }
0x135d   :  { %v1965_v8 = vmax.f32 %v1963_v10, %v3821_v0  ;;  %v1966_v34 = vmax.f32 %v1964_v63, %v3823_v60  ;;  %v3850_v35 = vadd.s32 896, %v3829_v53  ;;  %v3855_v52 = vadd.s32 1024, %v3829_v53 }
0x135e   :  { %v3858_v47 = vadd.s32 1152, %v3829_v53  ;;  %v3861_v55 = vadd.s32 1280, %v3829_v53  ;;  %v3864_v15 = vadd.s32 1408, %v3829_v53  ;;  %v3867_v10 = vadd.s32 1536, %v3829_v53 }
0x135f   :  { %v1967_v6 = vmax.f32 %v1965_v8, %v1966_v34  ;;  %v3870_v63 = vadd.s32 1664, %v3829_v53  ;;  %v3873_v8 = vadd.s32 1792, %v3829_v53  ;;  %v3876_v34 = vadd.s32 1920, %v3829_v53 }
0x1360   :  { %v3882_v1 = vadd.s32 2176, %v3829_v53  ;;  %v3885_v60 = vadd.s32 2304, %v3829_v53  ;;  %v3888_v0 = vadd.s32 2432, %v3829_v53  ;;  %v3899_v18 = vadd.s32 2560, %v3829_v53 }
0x1361   :  { %1968 = vmax.xlane.f32.xlu2 %v1967_v6  ;;  %v3879_v6 = vadd.s32 2048, %v3829_v53  ;;  %v3902_v5 = vadd.s32 2688, %v3829_v53  ;;  %v3905_v43 = vadd.s32 2816, %v3829_v53 }
0x13cc   :  { %v3852_v57 = vpop.xlane.xlu1 %1943 }
0x13cd   :  { %vm2290_vm0 = vcmp.eq.f32.partialorder %v3641_v21, %v3852_v57  ;;  %vm2291_vm1 = vcmp.eq.f32.partialorder %v3643_v22, %v3852_v57  ;;  %vm2292_vm2 = vcmp.eq.f32.partialorder %v3645_v23, %v3852_v57  ;;  %vm2293_vm3 = vcmp.eq.f32.partialorder %v3647_v24, %v3852_v57 }
0x13ce   :  { %v3908_v21 = vadd.s32 2944, %v3829_v53  ;;  %vm2294_vm4 = vcmp.eq.f32.partialorder %v3649_v25, %v3852_v57  ;;  %vm2295_vm5 = vcmp.eq.f32.partialorder %v3651_v26, %v3852_v57  ;;  %vm2296_vm6 = vcmp.eq.f32.partialorder %v3677_v4, %v3852_v57 }
0x13cf   :  { %vm2297_vm7 = vcmp.eq.f32.partialorder %v3679_v49, %v3852_v57  ;;  %v2338_v24 = vsel %vm2290_vm0, %v3829_v53, 3072  ;;  %v2339_v23 = vsel %vm2291_vm1, %v3832_v27, 3072  ;;  %v2340_v22 = vsel %vm2292_vm2, %v3835_v32, 3072 }
0x13d0   :  { %v2341_v12 = vsel %vm2293_vm3, %v3838_v33, 3072  ;;  %vm2298_vm10 = vcmp.eq.f32.partialorder %v3681_v59, %v3852_v57  ;;  %vm2299_vm11 = vcmp.eq.f32.partialorder %v3683_v38, %v3852_v57  ;;  %vm2300_vm12 = vcmp.eq.f32.partialorder %v3708_v17, %v3852_v57 }
0x13d1   :  { %vm2301_vm13 = vcmp.eq.f32.partialorder %v3711_v20, %v3852_v57  ;;  %vm2302_vm14 = vcmp.eq.f32.partialorder %v3713_v30, %v3852_v57  ;;  %vm2303_vm15 = vcmp.eq.f32.partialorder %v3715_v31, %v3852_v57  ;;  %vm2386_vm9 = vcmp.lt.s32.totalorder %v2338_v24, %v2340_v22 }
0x13d2   :  { %vm2388_vm8 = vcmp.lt.s32.totalorder %v2339_v23, %v2341_v12  ;;  %v2342_v46 = vsel %vm2294_vm4, %v3841_v61, 3072  ;;  %v2343_v9 = vsel %vm2295_vm5, %v3844_v11, 3072  ;;  %v2387_v3 = vsel %vm2386_vm9, %v2338_v24, %v2340_v22 }
0x13d3   :  { %v2389_v62 = vsel %vm2388_vm8, %v2339_v23, %v2341_v12  ;;  %vm2308_vm2 = vcmp.eq.f32.partialorder %v3776_v28, %v3852_v57  ;;  %vm2309_vm3 = vcmp.eq.f32.partialorder %v3779_v7, %v3852_v57  ;;  %vm2390_vm1 = vcmp.lt.s32.totalorder %v2387_v3, %v2342_v46 }
0x13d4   :  { %vm2392_vm0 = vcmp.lt.s32.totalorder %v2389_v62, %v2343_v9  ;;  %v2344_v25 = vsel %vm2296_vm6, %v3847_v42, 3072  ;;  %v2345_v26 = vsel %vm2297_vm7, %v3850_v35, 3072  ;;  %v2391_v22 = vsel %vm2390_vm1, %v2387_v3, %v2342_v46 }
0x13d5   :  { %v2393_v23 = vsel %vm2392_vm0, %v2389_v62, %v2343_v9  ;;  %vm2310_vm8 = vcmp.eq.f32.partialorder %v3795_v56, %v3852_v57  ;;  %vm2311_vm9 = vcmp.eq.f32.partialorder %v3797_v14, %v3852_v57  ;;  %vm2394_vm4 = vcmp.lt.s32.totalorder %v2391_v22, %v2344_v25 }
0x13d6   :  { %vm2396_vm5 = vcmp.lt.s32.totalorder %v2393_v23, %v2345_v26  ;;  %v2346_v24 = vsel %vm2298_vm10, %v3855_v52, 3072  ;;  %v2347_v12 = vsel %vm2299_vm11, %v3858_v47, 3072  ;;  %v2395_v3 = vsel %vm2394_vm4, %v2391_v22, %v2344_v25 }
0x13d7   :  { %v2397_v9 = vsel %vm2396_vm5, %v2393_v23, %v2345_v26  ;;  %vm2312_vm6 = vcmp.eq.f32.partialorder %v3801_v19, %v3852_v57  ;;  %vm2313_vm7 = vcmp.eq.f32.partialorder %v3803_v16, %v3852_v57  ;;  %vm2398_vm0 = vcmp.lt.s32.totalorder %v2395_v3, %v2346_v24 }
0x13d8   :  { %vm2400_vm1 = vcmp.lt.s32.totalorder %v2397_v9, %v2347_v12  ;;  %v2348_v62 = vsel %vm2300_vm12, %v3861_v55, 3072  ;;  %v2349_v46 = vsel %vm2301_vm13, %v3864_v15, 3072  ;;  %v2399_v25 = vsel %vm2398_vm0, %v2395_v3, %v2346_v24 }
0x13d9   :  { %v2401_v26 = vsel %vm2400_vm1, %v2397_v9, %v2347_v12  ;;  %v2350_v22 = vsel %vm2302_vm14, %v3867_v10, 3072  ;;  %v2351_v23 = vsel %vm2303_vm15, %v3870_v63, 3072  ;;  %vm2402_vm10 = vcmp.lt.s32.totalorder %v2399_v25, %v2348_v62 }
0x13da   :  { %vm2404_vm11 = vcmp.lt.s32.totalorder %v2401_v26, %v2349_v46  ;;  %vm4639_vm12 = vcmp.eq.f32.partialorder %v3742_v2, %v3852_v57  ;;  %vm4640_vm13 = vcmp.eq.f32.partialorder %v3745_v48, %v3852_v57  ;;  %v2403_v12 = vsel %vm2402_vm10, %v2399_v25, %v2348_v62  ;;  %v4010_v2 = vpop.xlane.xlu2 %1968 }
0x13db   :  { %v2352_v20 = vsel %vm4639_vm12, %v3873_v8, 3072  ;;  %v2353_v24 = vsel %vm4640_vm13, %v3876_v34, 3072  ;;  %v2405_v3 = vsel %vm2404_vm11, %v2401_v26, %v2349_v46  ;;  %vm4641_vm14 = vcmp.eq.f32.partialorder %v3747_v58, %v3852_v57 }
0x13dc   :  { %v2354_v9 = vsel %vm4641_vm14, %v3879_v6, 3072  ;;  %vm4642_vm15 = vcmp.eq.f32.partialorder %v3749_v50, %v3852_v57  ;;  %vm2406_vm4 = vcmp.lt.s32.totalorder %v2403_v12, %v2350_v22  ;;  %vm2408_vm5 = vcmp.lt.s32.totalorder %v2405_v3, %v2351_v23 }
0x13dd   :  { %v2355_v31 = vsel %vm4642_vm15, %v3882_v1, 3072  ;;  %v2356_v62 = vsel %vm2308_vm2, %v3885_v60, 3072  ;;  %v2357_v46 = vsel %vm2309_vm3, %v3888_v0, 3072  ;;  %v2407_v25 = vsel %vm2406_vm4, %v2403_v12, %v2350_v22 }
0x13de   :  { %v2409_v26 = vsel %vm2408_vm5, %v2405_v3, %v2351_v23  ;;  %v2358_v50 = vsel %vm2310_vm8, %v3899_v18, 3072  ;;  %v2359_v58 = vsel %vm2311_vm9, %v3902_v5, 3072  ;;  %vm2410_vm0 = vcmp.lt.s32.totalorder %v2407_v25, %v2352_v20 }
0x13df   :  { %vm2412_vm1 = vcmp.lt.s32.totalorder %v2409_v26, %v2353_v24  ;;  %v2360_v7 = vsel %vm2312_vm6, %v3905_v43, 3072  ;;  %v2361_v22 = vsel %vm2313_vm7, %v3908_v21, 3072  ;;  %v2411_v23 = vsel %vm2410_vm0, %v2407_v25, %v2352_v20 }
0x13e0   :  { %v2413_v12 = vsel %vm2412_vm1, %v2409_v26, %v2353_v24  ;;  %vm2414_vm2 = vcmp.lt.s32.totalorder %v2411_v23, %v2354_v9  ;;  %vm2314_vm8 = vcmp.eq.f32.partialorder %v3667_v39, %v4010_v2  ;;  %vm2315_vm9 = vcmp.eq.f32.partialorder %v3669_v45, %v4010_v2  ;;  %v4645_v26 = vld [vmem:[#allocation44_spill] sm:$0xff] }
0x13e1   :  { %vm2416_vm3 = vcmp.lt.s32.totalorder %v2413_v12, %v2355_v31  ;;  %v2415_v3 = vsel %vm2414_vm2, %v2411_v23, %v2354_v9  ;;  %vm2316_vm6 = vcmp.eq.f32.partialorder %v3685_v54, %v4010_v2  ;;  %vm2317_vm10 = vcmp.eq.f32.partialorder %v3687_v51, %v4010_v2 }
0x13e2   :  { %v2417_v14 = vsel %vm2416_vm3, %v2413_v12, %v2355_v31  ;;  %vm2418_vm11 = vcmp.lt.s32.totalorder %v2415_v3, %v2356_v62  ;;  %vm2318_vm12 = vcmp.eq.f32.partialorder %v3689_v41, %v4010_v2  ;;  %vm2319_vm13 = vcmp.eq.f32.partialorder %v3691_v40, %v4010_v2  ;;  %v4648_v12 = vld [vmem:[#allocation48_spill] sm:$0xff] }
0x13e3   :  { %vm2420_vm7 = vcmp.lt.s32.totalorder %v2417_v14, %v2357_v46  ;;  %v2419_v20 = vsel %vm2418_vm11, %v2415_v3, %v2356_v62  ;;  %vm2320_vm14 = vcmp.eq.f32.partialorder %v3718_v36, %v4010_v2  ;;  %vm2321_vm15 = vcmp.eq.f32.partialorder %v3721_v37, %v4010_v2 }
0x13e4   :  { %v2421_v24 = vsel %vm2420_vm7, %v2417_v14, %v2357_v46  ;;  %vm2422_vm4 = vcmp.lt.s32.totalorder %v2419_v20, %v2358_v50  ;;  %vm2322_vm0 = vcmp.eq.f32.partialorder %v3724_v44, %v4010_v2  ;;  %vm2323_vm1 = vcmp.eq.f32.partialorder %v3727_v29, %v4010_v2 }
0x13e5   :  { %vm2424_vm5 = vcmp.lt.s32.totalorder %v2421_v24, %v2359_v58  ;;  %v2423_v31 = vsel %vm2422_vm4, %v2419_v20, %v2358_v50  ;;  %v2362_v14 = vsel %vm2314_vm8, %v3829_v53, 3072  ;;  %v2363_v62 = vsel %vm2315_vm9, %v3832_v27, 3072  ;;  %v4643_v53 = vld [vmem:[#allocation42_spill] sm:$0xff]  ;;  %v4644_v27 = vld [vmem:[#allocation43_spill] sm:$0xff] }
0x13e6   :  { %v2425_v9 = vsel %vm2424_vm5, %v2421_v24, %v2359_v58  ;;  %vm2426_vm2 = vcmp.lt.s32.totalorder %v2423_v31, %v2360_v7  ;;  %v2364_v46 = vsel %vm2316_vm6, %v3835_v32, 3072  ;;  %v2365_v58 = vsel %vm2317_vm10, %v3838_v33, 3072  ;;  %v4646_v32 = vld [vmem:[#allocation46_spill] sm:$0xff] }
0x13e7   :  { %vm2428_vm3 = vcmp.lt.s32.totalorder %v2425_v9, %v2361_v22  ;;  %v2427_v50 = vsel %vm2426_vm2, %v2423_v31, %v2360_v7  ;;  %vm2324_vm8 = vcmp.eq.f32.partialorder %v3752_v13, %v4010_v2  ;;  %vm2325_vm9 = vcmp.eq.f32.partialorder %v4643_v53, %v4010_v2  ;;  %v4647_v7 = vld [vmem:[#allocation47_spill] sm:$0xff]  ;;  %v4649_v31 = vld [vmem:[#allocation49_spill] sm:$0xff] }
0x13e8   :  { %v2429_v25 = vsel %vm2428_vm3, %v2425_v9, %v2361_v22  ;;  %vm2326_vm7 = vcmp.eq.f32.partialorder %v4644_v27, %v4010_v2  ;;  %vm2327_vm6 = vcmp.eq.f32.partialorder %v4645_v26, %v4010_v2  ;;  %vm2328_vm4 = vcmp.eq.f32.partialorder %v4646_v32, %v4010_v2 }
0x13e9   :  { %vm2430_vm11 = vcmp.lt.s32.totalorder %v2427_v50, %v2429_v25  ;;  %v2366_v33 = vsel %vm2318_vm12, %v3841_v61, 3072  ;;  %vm2446_vm5 = vcmp.lt.s32.totalorder %v2362_v14, %v2364_v46  ;;  %vm2448_vm2 = vcmp.lt.s32.totalorder %v2363_v62, %v2365_v58 }
0x13ea   :  { %v4082_v23 = vsel %vm2430_vm11, %v2427_v50, %v2429_v25  ;;  %vm2330_vm3 = vcmp.eq.f32.partialorder %v4648_v12, %v4010_v2  ;;  %v2367_v3 = vsel %vm2319_vm13, %v3844_v11, 3072  ;;  %v2447_v20 = vsel %vm2446_vm5, %v2362_v14, %v2364_v46  ;;  %v4651_v46 = vld [vmem:[#allocation52_spill] sm:$0xff] }
0x13eb   :  { %v2433_v22 = vshra.s32 %v4082_v23, 16  ;;  %v2449_v24 = vsel %vm2448_vm2, %v2363_v62, %v2365_v58  ;;  %v2368_v61 = vsel %vm2320_vm14, %v3847_v42, 3072  ;;  %vm2450_vm12 = vcmp.lt.s32.totalorder %v2447_v20, %v2366_v33  ;;  %v4650_v62 = vld [vmem:[#allocation51_spill] sm:$0xff] }
0x13ec   :  { %vm2452_vm10 = vcmp.lt.s32.totalorder %v2449_v24, %v2367_v3  ;;  %v2369_v50 = vsel %vm2321_vm15, %v3850_v35, 3072  ;;  %v2451_v11 = vsel %vm2450_vm12, %v2447_v20, %v2366_v33  ;;  %vm2332_vm13 = vcmp.eq.f32.partialorder %v4650_v62, %v4010_v2  ;;  %v4652_v33 = vld [vmem:[#allocation53_spill] sm:$0xff] }
0x13ed   :  { %v4103_v9 = vcvt.s32.f32 %v2433_v22  ;;  %v2453_v14 = vsel %vm2452_vm10, %v2449_v24, %v2367_v3  ;;  %vm2333_vm5 = vcmp.eq.f32.partialorder %v4651_v46, %v4010_v2  ;;  %vm2454_vm2 = vcmp.lt.s32.totalorder %v2451_v11, %v2368_v61  ;;  %v4653_v22 = vld [vmem:[#allocation54_spill] sm:$0xff]  ;;  %v4654_v24 = vld [vmem:[#allocation55_spill] sm:$0xff] }
0x13ee   :  { %vm2456_vm11 = vcmp.lt.s32.totalorder %v2453_v14, %v2369_v50  ;;  %v2370_v42 = vsel %vm2322_vm0, %v3855_v52, 3072  ;;  %v2371_v35 = vsel %vm2323_vm1, %v3858_v47, 3072  ;;  %v2455_v58 = vsel %vm2454_vm2, %v2451_v11, %v2368_v61  ;;  %v4655_v61 = vld [vmem:[#allocation56_spill] sm:$0xff] }
0x13ef   :  { %2436 = vmin.xlane.f32.xlu0 %v4103_v9  ;;  %v2457_v25 = vsel %vm2456_vm11, %v2453_v14, %v2369_v50  ;;  %vm2334_vm14 = vcmp.eq.f32.partialorder %v4652_v33, %v4010_v2  ;;  %vm2335_vm15 = vcmp.eq.f32.partialorder %v4653_v22, %v4010_v2  ;;  %vm2458_vm10 = vcmp.lt.s32.totalorder %v2455_v58, %v2370_v42 }
0x13f0   :  { %vm2460_vm12 = vcmp.lt.s32.totalorder %v2457_v25, %v2371_v35  ;;  %v2372_v52 = vsel %vm2324_vm8, %v3861_v55, 3072  ;;  %v2373_v47 = vsel %vm2325_vm9, %v3864_v15, 3072  ;;  %v2459_v3 = vsel %vm2458_vm10, %v2455_v58, %v2370_v42  ;;  %v4656_v42 = vld [vmem:[#allocation31_spill] sm:$0xff] }
0x13f1   :  { %v2461_v20 = vsel %vm2460_vm12, %v2457_v25, %v2371_v35  ;;  %vm2336_vm0 = vcmp.eq.f32.partialorder %v4654_v24, %v4010_v2  ;;  %vm2337_vm1 = vcmp.eq.f32.partialorder %v4655_v61, %v4010_v2  ;;  %vm2462_vm11 = vcmp.lt.s32.totalorder %v2459_v3, %v2372_v52  ;;  %v4658_v25 = vld [vmem:[#allocation32_spill] sm:$0xff] }
0x13f2   :  { %vm2464_vm2 = vcmp.lt.s32.totalorder %v2461_v20, %v2373_v47  ;;  %v2374_v55 = vsel %vm2326_vm7, %v3867_v10, 3072  ;;  %v2375_v15 = vsel %vm2327_vm6, %v3870_v63, 3072  ;;  %v2463_v50 = vsel %vm2462_vm11, %v2459_v3, %v2372_v52 }
0x13f3   :  { %v2465_v11 = vsel %vm2464_vm2, %v2461_v20, %v2373_v47  ;;  %v2376_v14 = vsel %vm2328_vm4, %v3873_v8, 3072  ;;  %vm2466_vm8 = vcmp.lt.s32.totalorder %v2463_v50, %v2374_v55  ;;  %v4152_v35 = vsub.f32 %v4656_v42, %v3852_v57 }
0x13f4   :  { %vm2468_vm9 = vcmp.lt.s32.totalorder %v2465_v11, %v2375_v15  ;;  %vm4657_vm7 = vcmp.eq.f32.partialorder %v4647_v7, %v4010_v2  ;;  %v2467_v58 = vsel %vm2466_vm8, %v2463_v50, %v2374_v55  ;;  %v4160_v52 = vsub.f32 %v4658_v25, %v3852_v57 }
0x13f5   :  { %v2377_v10 = vsel %vm4657_vm7, %v3876_v34, 3072  ;;  %v2469_v63 = vsel %vm2468_vm9, %v2465_v11, %v2375_v15  ;;  %v2378_v8 = vsel %vm2330_vm3, %v3879_v6, 3072  ;;  %vm4659_vm6 = vcmp.eq.f32.partialorder %v4649_v31, %v4010_v2 }
0x13f6   :  { %v2379_v47 = vsel %vm4659_vm6, %v3882_v1, 3072  ;;  %vm2470_vm4 = vcmp.lt.s32.totalorder %v2467_v58, %v2376_v14  ;;  %vm2472_vm10 = vcmp.lt.s32.totalorder %v2469_v63, %v2377_v10  ;;  %v2380_v34 = vsel %vm2332_vm13, %v3885_v60, 3072  ;;  %v4660_v60 = vld [vmem:[#allocation33_spill] sm:$0xff] }
0x13f7   :  { %v2381_v3 = vsel %vm2333_vm5, %v3888_v0, 3072  ;;  %v2471_v20 = vsel %vm2470_vm4, %v2467_v58, %v2376_v14  ;;  %v2473_v55 = vsel %vm2472_vm10, %v2469_v63, %v2377_v10  ;;  %v2382_v6 = vsel %vm2334_vm14, %v3899_v18, 3072  ;;  %v4661_v63 = vld [vmem:[#allocation34_spill] sm:$0xff] }
0x13f8   :  { %vm2474_vm3 = vcmp.lt.s32.totalorder %v2471_v20, %v2378_v8  ;;  %vm2476_vm12 = vcmp.lt.s32.totalorder %v2473_v55, %v2379_v47  ;;  %v2018_v1 = vmul.f32 1.442695, %v4152_v35  ;;  %v4185_v11 = vsub.f32 %v4660_v60, %v3852_v57 }
0x13f9   :  { %v2475_v15 = vsel %vm2474_vm3, %v2471_v20, %v2378_v8  ;;  %v2477_v50 = vsel %vm2476_vm12, %v2473_v55, %v2379_v47  ;;  %v2020_v42 = vmul.f32 1.442695, %v4160_v52  ;;  %v2383_v0 = vsel %vm2335_vm15, %v3902_v5, 3072  ;;  %v4662_v5 = vld [vmem:[#allocation35_spill] sm:$0xff] }
0x13fa   :  { %v2384_v18 = vsel %vm2336_vm0, %v3905_v43, 3072  ;;  %vm2478_vm13 = vcmp.lt.s32.totalorder %v2475_v15, %v2380_v34  ;;  %vm2480_vm5 = vcmp.lt.s32.totalorder %v2477_v50, %v2381_v3  ;;  %v2385_v14 = vsel %vm2337_vm1, %v3908_v21, 3072 }
0x13fb   :  { %v2479_v10 = vsel %vm2478_vm13, %v2475_v15, %v2380_v34  ;;  %v2481_v58 = vsel %vm2480_vm5, %v2477_v50, %v2381_v3  ;;  %v4202_v25 = vsub.f32 %v4661_v63, %v3852_v57  ;;  %v4206_v8 = vsub.f32 %v4662_v5, %v3852_v57  ;;  %v4663_v3 = vld [vmem:[#allocation36_spill] sm:$0xff] }
0x13fc   :  { %vm2482_vm14 = vcmp.lt.s32.totalorder %v2479_v10, %v2382_v6  ;;  %vm2484_vm15 = vcmp.lt.s32.totalorder %v2481_v58, %v2383_v0  ;;  %2788 = vpow2.f32 %v2018_v1  ;;  %v2022_v20 = vmul.f32 1.442695, %v4185_v11 }
0x13fd   :  { %v2483_v43 = vsel %vm2482_vm14, %v2479_v10, %v2382_v6  ;;  %v2485_v47 = vsel %vm2484_vm15, %v2481_v58, %v2383_v0  ;;  %2790 = vpow2.f32 %v2020_v42  ;;  %v4211_v55 = vsub.f32 %v4663_v3, %v3852_v57 }
0x13fe   :  { %vm2486_vm0 = vcmp.lt.s32.totalorder %v2483_v43, %v2384_v18  ;;  %vm2488_vm1 = vcmp.lt.s32.totalorder %v2485_v47, %v2385_v14  ;;  %v2024_v15 = vmul.f32 1.442695, %v4202_v25  ;;  %v4218_v6 = vsub.f32 %v3677_v4, %v3852_v57 }
0x13ff   :  { %v2487_v21 = vsel %vm2486_vm0, %v2483_v43, %v2384_v18  ;;  %v2489_v34 = vsel %vm2488_vm1, %v2485_v47, %v2385_v14  ;;  %2792 = vpow2.f32 %v2022_v20  ;;  %v2026_v1 = vmul.f32 1.442695, %v4206_v8 }
0x1400   :  { %vm2490_vm11 = vcmp.lt.s32.totalorder %v2487_v21, %v2489_v34  ;;  %v4224_v18 = vsub.f32 %v3679_v49, %v3852_v57  ;;  %2794 = vpow2.f32 %v2024_v15  ;;  %v2028_v14 = vmul.f32 1.442695, %v4211_v55 }
0x1401   :  { %v4214_v50 = vsel %vm2490_vm11, %v2487_v21, %v2489_v34  ;;  %v4231_v4 = vsub.f32 %v3681_v59, %v3852_v57  ;;  %2796 = vpow2.f32 %v2026_v1  ;;  %v2030_v58 = vmul.f32 1.442695, %v4218_v6  ;;  %v4664_v21 = vld [vmem:[#allocation37_spill] sm:$0xff] }
0x1402   :  { %v2789_v60 = vpop.eup %2788  ;;  %v2493_v42 = vshra.s32 %v4214_v50, 16  ;;  %v4237_v49 = vsub.f32 %v3683_v38, %v3852_v57  ;;  %2798 = vpow2.f32 %v2028_v14  ;;  %v2032_v43 = vmul.f32 1.442695, %v4224_v18 }
0x1403   :  { %v2791_v0 = vpop.eup %2790  ;;  %v4242_v47 = vsub.f32 %v3708_v17, %v3852_v57  ;;  %v4246_v34 = vsub.f32 %v4664_v21, %v3852_v57  ;;  %2800 = vpow2.f32 %v2030_v58  ;;  %v2034_v3 = vmul.f32 1.442695, %v4231_v4 }
0x1404   :  { %v4227_v10 = vcvt.s32.f32 %v2493_v42  ;;  %v2114_v63 = vadd.f32 %v2791_v0, %v2789_v60  ;;  %2802 = vpow2.f32 %v2032_v43  ;;  %v2036_v38 = vmul.f32 1.442695, %v4237_v49 }
0x1405   :  { %v2793_v5 = vpop.eup %2792  ;;  %v4252_v60 = vsub.f32 %v3667_v39, %v4010_v2  ;;  %v4256_v17 = vsub.f32 %v3713_v30, %v3852_v57  ;;  %v2038_v42 = vmul.f32 1.442695, %v4242_v47  ;;  %v4261_v14 = vsub.f32 %v3669_v45, %v4010_v2  ;;  %v4668_v39 = vld [vmem:[#allocation38_spill] sm:$0xff] }
0x1406   :  { %2496 = vmin.xlane.f32.xlu2 %v4227_v10  ;;  %v2115_v59 = vadd.f32 %v2793_v5, %v2114_v63  ;;  %v2795_v20 = vpop.eup %2794  ;;  %2804 = vpow2.f32 %v2034_v3  ;;  %v2040_v63 = vmul.f32 1.442695, %v4246_v34  ;;  %v4266_v5 = vsub.f32 %v3685_v54, %v4010_v2 }
0x1407   :  { %v2797_v1 = vpop.eup %2796  ;;  %4665 = vst [vmem:[#allocation42_spill] sm:$0xff] %v4252_v60  ;;  %v4270_v43 = vsub.f32 %v4668_v39, %v3852_v57  ;;  %2806 = vpow2.f32 %v2036_v38  ;;  %v4278_v45 = vsub.f32 %v3687_v51, %v4010_v2  ;;  %v2066_v3 = vmul.f32 1.442695, %v4252_v60 }
0x1408   :  { %v2116_v15 = vadd.f32 %v2795_v20, %v2115_v59  ;;  %4666 = vst [vmem:[#allocation43_spill] sm:$0xff] %v4261_v14  ;;  %v2799_v58 = vpop.eup %2798  ;;  %v4669_v20 = vld [vmem:[#allocation39_spill] sm:$0xff]  ;;  %2808 = vpow2.f32 %v2038_v42  ;;  %v2042_v54 = vmul.f32 1.442695, %v4256_v17  ;;  %v2070_v38 = vmul.f32 1.442695, %v4266_v5 }
0x1409   :  { %4667 = vst [vmem:[#allocation44_spill] sm:$0xff] %v4266_v5  ;;  %v2801_v59 = vpop.eup %2800  ;;  %v4274_v21 = vsub.f32 %v4669_v20, %v3852_v57  ;;  %2810 = vpow2.f32 %v2040_v63  ;;  %v4290_v51 = vsub.f32 %v3745_v48, %v3852_v57  ;;  %v2072_v63 = vmul.f32 1.442695, %v4278_v45 }
0x140a   :  { %v2117_v0 = vadd.f32 %v2797_v1, %v2116_v15  ;;  %4670 = vst [vmem:[#allocation46_spill] sm:$0xff] %v4278_v45  ;;  %v2068_v1 = vmul.f32 1.442695, %v4261_v14  ;;  %v2803_v39 = vpop.eup %2802  ;;  %2812 = vpow2.f32 %v2066_v3  ;;  %v4305_v3 = vsub.f32 %v3718_v36, %v4010_v2 }
0x140b   :  { %v2046_v48 = vmul.f32 1.442695, %v4274_v21  ;;  %vm2239_vm9 = vcmask 490496   ;;  %vm2506_vm7 = vcmask 7168   ;;  %vm4692_vm6 = vcmask 253952  }
0x140c   :  { %v2118_v30 = vadd.f32 %v2799_v58, %v2117_v0  ;;  %v4285_v0 = vsub.f32 %v3689_v41, %v4010_v2  ;;  %v2044_v58 = vmul.f32 1.442695, %v4270_v43  ;;  %v2805_v20 = vpop.eup %2804  ;;  %2814 = vpow2.f32 %v2068_v1  ;;  %v4673_v41 = vld [vmem:[#allocation40_spill] sm:$0xff]  ;;  %4675 = vst [vmem:[#allocation51_spill] sm:$0xff] %v4305_v3  ;;  %v4676_v1 = vld [vmem:[#allocation41_spill] sm:$0xff]  ;;  %vm4694_vm10 = vmmov %vm4692_vm6 }
0x140d   :  { %2816 = vpow2.f32 %v2042_v54  ;;  %v2807_v14 = vpop.eup %2806  ;;  %vm4693_vm4 = vcmask 261127  }
0x140e   :  { %v2119_v15 = vadd.f32 %v2801_v59, %v2118_v30  ;;  %4671 = vst [vmem:[#allocation47_spill] sm:$0xff] %v4285_v0  ;;  %v4295_v30 = vsub.f32 %v3691_v40, %v4010_v2  ;;  %v4300_v59 = vsub.f32 %v4673_v41, %v3852_v57  ;;  %2818 = vpow2.f32 %v2070_v38 }
0x140f   :  { %v2074_v40 = vmul.f32 1.442695, %v4285_v0  ;;  %2820 = vpow2.f32 %v2044_v58  ;;  %v2048_v41 = vmul.f32 1.442695, %v4290_v51 }
0x1410   :  { %v2120_v42 = vadd.f32 %v2803_v39, %v2119_v15  ;;  %4672 = vst [vmem:[#allocation48_spill] sm:$0xff] %v4295_v30  ;;  %v2809_v15 = vpop.eup %2808  ;;  %v4310_v39 = vsub.f32 %v4676_v1, %v3852_v57  ;;  %2822 = vpow2.f32 %v2072_v63  ;;  %v2076_v36 = vmul.f32 1.442695, %v4295_v30 }
0x1411   :  { %4674 = vst [vmem:[#allocation49_spill] sm:$0xff] %v4300_v59  ;;  %v2811_v45 = vpop.eup %2810  ;;  %2824 = vpow2.f32 %v2046_v48  ;;  %v2050_v1 = vmul.f32 1.442695, %v4300_v59  ;;  %v2078_v63 = vmul.f32 1.442695, %v4305_v3 }
0x1412   :  { %v2121_v5 = vadd.f32 %v2805_v20, %v2120_v42  ;;  %v4315_v42 = vsub.f32 %v3721_v37, %v4010_v2  ;;  %v2813_v38 = vpop.eup %2812  ;;  %v4320_v20 = vsub.f32 %v3776_v28, %v3852_v57  ;;  %v4329_v37 = vsub.f32 %v3724_v44, %v4010_v2 }
0x1413   :  { %v2815_v0 = vpop.eup %2814  ;;  %2826 = vpow2.f32 %v2074_v40  ;;  %v2052_v28 = vmul.f32 1.442695, %v4310_v39 }
0x1414   :  { %v2122_v54 = vadd.f32 %v2807_v14, %v2121_v5  ;;  %4677 = vst [vmem:[#allocation52_spill] sm:$0xff] %v4315_v42  ;;  %v4678_v14 = vld [vmem:[#allocation45_spill] sm:$0xff]  ;;  %v2817_v30 = vpop.eup %2816  ;;  %2828 = vpow2.f32 %v2048_v41  ;;  %v2139_v60 = vadd.f32 %v2815_v0, %v2813_v38  ;;  %v2080_v44 = vmul.f32 1.442695, %v4315_v42  ;;  %v4679_v0 = vld [vmem:[#allocation50_spill] sm:$0xff] }
0x1415   :  { %v4325_v5 = vsub.f32 %v4678_v14, %v3852_v57  ;;  %v2819_v59 = vpop.eup %2818  ;;  %2830 = vpow2.f32 %v2076_v36  ;;  %v2054_v41 = vmul.f32 1.442695, %v4320_v20  ;;  %v4345_v38 = vsub.f32 %v4679_v0, %v3852_v57 }
0x1416   :  { %v2123_v58 = vadd.f32 %v2809_v15, %v2122_v54  ;;  %v4335_v15 = vsub.f32 %v3795_v56, %v3852_v57  ;;  %v4339_v54 = vsub.f32 %v3727_v29, %v4010_v2  ;;  %v2821_v40 = vpop.eup %2820  ;;  %2832 = vpow2.f32 %v2050_v1 }
0x1417   :  { %v2140_v3 = vadd.f32 %v2819_v59, %v2139_v60  ;;  %v4349_v56 = vsub.f32 %v3752_v13, %v4010_v2  ;;  %2834 = vpow2.f32 %v2078_v63  ;;  %v2082_v29 = vmul.f32 1.442695, %v4329_v37 }
0x1418   :  { %v2124_v48 = vadd.f32 %v2811_v45, %v2123_v58  ;;  %v2823_v45 = vpop.eup %2822  ;;  %2836 = vpow2.f32 %v2052_v28  ;;  %v2056_v1 = vmul.f32 1.442695, %v4325_v5  ;;  %v4355_v60 = vsub.f32 %v3801_v19, %v3852_v57 }
0x1419   :  { %v2825_v36 = vpop.eup %2824  ;;  %v2141_v42 = vadd.f32 %v2823_v45, %v2140_v3  ;;  %v4359_v59 = vsub.f32 %v4643_v53, %v4010_v2  ;;  %2838 = vpow2.f32 %v2080_v44  ;;  %v2084_v13 = vmul.f32 1.442695, %v4339_v54 }
0x141a   :  { %v2125_v14 = vadd.f32 %v2817_v30, %v2124_v48  ;;  %v2827_v30 = vpop.eup %2826  ;;  %2840 = vpow2.f32 %v2054_v41  ;;  %v2058_v28 = vmul.f32 1.442695, %v4335_v15  ;;  %v4365_v3 = vsub.f32 %v3803_v16, %v3852_v57 }
0x141b   :  { %v2829_v63 = vpop.eup %2828  ;;  %v2142_v0 = vadd.f32 %v2827_v30, %v2141_v42  ;;  %v4369_v19 = vsub.f32 %v4644_v27, %v4010_v2  ;;  %2842 = vpow2.f32 %v2082_v29  ;;  %v2086_v53 = vmul.f32 1.442695, %v4349_v56 }
0x141c   :  { %v2126_v58 = vadd.f32 %v2821_v40, %v2125_v14  ;;  %v2831_v40 = vpop.eup %2830  ;;  %2844 = vpow2.f32 %v2056_v1  ;;  %v2060_v41 = vmul.f32 1.442695, %v4345_v38  ;;  %v4375_v42 = vsub.f32 %v4645_v26, %v4010_v2 }
0x141d   :  { %v2833_v44 = vpop.eup %2832  ;;  %v2143_v45 = vadd.f32 %v2831_v40, %v2142_v0  ;;  %2846 = vpow2.f32 %v2084_v13  ;;  %v2088_v16 = vmul.f32 1.442695, %v4359_v59  ;;  %v2062_v27 = vmul.f32 1.442695, %v4355_v60 }
0x141e   :  { %v2127_v48 = vadd.f32 %v2825_v36, %v2126_v58  ;;  %v2835_v36 = vpop.eup %2834  ;;  %2848 = vpow2.f32 %v2058_v28  ;;  %v4381_v1 = vsub.f32 %v4646_v32, %v4010_v2  ;;  %v2064_v26 = vmul.f32 1.442695, %v4365_v3 }
0x141f   :  { %v2837_v57 = vpop.eup %2836  ;;  %v2144_v58 = vadd.f32 %v2835_v36, %v2143_v45  ;;  %2850 = vpow2.f32 %v2086_v53  ;;  %v4387_v28 = vsub.f32 %v4647_v7, %v4010_v2 }
0x1420   :  { %v2128_v14 = vadd.f32 %v2829_v63, %v2127_v48  ;;  %v2839_v30 = vpop.eup %2838  ;;  %v2090_v63 = vmul.f32 1.442695, %v4369_v19  ;;  %2852 = vpow2.f32 %v2060_v41  ;;  %v4392_v41 = vsub.f32 %v4648_v12, %v4010_v2 }
0x1421   :  { %v2841_v48 = vpop.eup %2840  ;;  %v2145_v0 = vadd.f32 %v2839_v30, %v2144_v58  ;;  %2854 = vpow2.f32 %v2088_v16  ;;  %v2094_v36 = vmul.f32 1.442695, %v4381_v1  ;;  %v4397_v16 = vsub.f32 %v4649_v31, %v4010_v2 }
0x1422   :  { %v2129_v29 = vadd.f32 %v2833_v44, %v2128_v14  ;;  %v2843_v40 = vpop.eup %2842  ;;  %v2092_v44 = vmul.f32 1.442695, %v4375_v42  ;;  %2856 = vpow2.f32 %v2062_v27  ;;  %v2096_v27 = vmul.f32 1.442695, %v4387_v28 }
0x1423   :  { %v2845_v14 = vpop.eup %2844  ;;  %v2146_v53 = vadd.f32 %v2843_v40, %v2145_v0  ;;  %2858 = vpow2.f32 %v2090_v63  ;;  %v4402_v63 = vsub.f32 %v4650_v62, %v4010_v2  ;;  %v4407_v31 = vsub.f32 %v4651_v46, %v4010_v2 }
0x1424   :  { %v2130_v13 = vadd.f32 %v2837_v57, %v2129_v29  ;;  %v2847_v45 = vpop.eup %2846  ;;  %2860 = vpow2.f32 %v2064_v26  ;;  %v2098_v26 = vmul.f32 1.442695, %v4392_v41  ;;  %v4412_v62 = vsub.f32 %v4652_v33, %v4010_v2 }
0x1425   :  { %v2849_v57 = vpop.eup %2848  ;;  %v2147_v7 = vadd.f32 %v2847_v45, %v2146_v53  ;;  %2862 = vpow2.f32 %v2092_v44  ;;  %v2100_v44 = vmul.f32 1.442695, %v4397_v16  ;;  %v4417_v46 = vsub.f32 %v4653_v22, %v4010_v2 }
0x1426   :  { %v2131_v32 = vadd.f32 %v2841_v48, %v2130_v13  ;;  %v2851_v58 = vpop.eup %2850  ;;  %2864 = vpow2.f32 %v2094_v36  ;;  %v2102_v36 = vmul.f32 1.442695, %v4402_v63  ;;  %v4422_v33 = vsub.f32 %v4654_v24, %v4010_v2 }
0x1427   :  { %v2853_v30 = vpop.eup %2852  ;;  %v2148_v13 = vadd.f32 %v2851_v58, %v2147_v7  ;;  %2866 = vpow2.f32 %v2096_v27  ;;  %v2104_v27 = vmul.f32 1.442695, %v4407_v31  ;;  %v2108_v22 = vmul.f32 1.442695, %v4417_v46 }
0x1428   :  { %v2132_v29 = vadd.f32 %v2845_v14, %v2131_v32  ;;  %v2855_v12 = vpop.eup %2854  ;;  %2868 = vpow2.f32 %v2098_v26 }
0x1429   :  { %v2857_v0 = vpop.eup %2856  ;;  %v2149_v14 = vadd.f32 %v2855_v12, %v2148_v13  ;;  %2870 = vpow2.f32 %v2100_v44  ;;  %v2106_v12 = vmul.f32 1.442695, %v4412_v62  ;;  %v2110_v44 = vmul.f32 1.442695, %v4422_v33 }
0x142a   :  { %v2133_v48 = vadd.f32 %v2849_v57, %v2132_v29  ;;  %v2859_v32 = vpop.eup %2858  ;;  %2872 = vpow2.f32 %v2102_v36 }
0x142b   :  { %v2861_v53 = vpop.eup %2860  ;;  %v2150_v57 = vadd.f32 %v2859_v32, %v2149_v14  ;;  %2874 = vpow2.f32 %v2104_v27 }
0x142c   :  { %v2134_v40 = vadd.f32 %v2853_v30, %v2133_v48  ;;  %v2863_v29 = vpop.eup %2862  ;;  %2876 = vpow2.f32 %v2106_v12  ;;  %v4680_v12 = vld [vmem:[#allocation30_spill] sm:$0xff] }
0x142d   :  { %v2151_v58 = vadd.f32 %v2863_v29, %v2150_v57  ;;  %v2865_v30 = vpop.eup %2864  ;;  %2878 = vpow2.f32 %v2108_v22 }
0x142e   :  { %v2135_v45 = vadd.f32 %v2857_v0, %v2134_v40  ;;  %v2867_v13 = vpop.eup %2866  ;;  %v4427_v40 = vsub.f32 %v4655_v61, %v4010_v2  ;;  %2880 = vpow2.f32 %v2110_v44  ;;  %v2492_v44 = vand.u32 65535, %v4214_v50 }
0x142f   :  { %v2152_v48 = vadd.f32 %v2865_v30, %v2151_v58  ;;  %v2869_v0 = vpop.eup %2868 }
0x1430   :  { %v2136_v7 = vadd.f32 %v2861_v53, %v2135_v45  ;;  %v2871_v32 = vpop.eup %2870  ;;  %v2112_v45 = vmul.f32 1.442695, %v4427_v40 }
0x1431   :  { %v2153_v26 = vadd.f32 %v2867_v13, %v2152_v48  ;;  %v2873_v24 = vpop.eup %2872 }
0x1432   :  { %2137 = vadd.xlane.f32.xlu1 %v2136_v7  ;;  %v2875_v29 = vpop.eup %2874  ;;  %2882 = vpow2.f32 %v2112_v45  ;;  %v4681_v45 = vld [vmem:[#allocation28_spill] sm:$0xff] }
0x1433   :  { %v2154_v14 = vadd.f32 %v2869_v0, %v2153_v26  ;;  %v2877_v7 = vpop.eup %2876  ;;  %v1193_v26 = vrot.slane %v4680_v12, 7  ;;  %v2432_v0 = vand.u32 65535, %v4082_v23 }
0x1434   :  { %v2879_v61 = vpop.eup %2878 }
0x1435   :  { %v2155_v53 = vadd.f32 %v2871_v32, %v2154_v14  ;;  %v2881_v30 = vpop.eup %2880  ;;  %v2434_v14 = vcvt.s32.f32 %v2432_v0 }
0x1437   :  { %v2156_v57 = vadd.f32 %v2873_v24, %v2155_v53  ;;  %v2494_v24 = vcvt.s32.f32 %v2492_v44 }
0x1438   :  { %v2883_v48 = vpop.eup %2882 }
0x1439   :  { %v2157_v36 = vadd.f32 %v2875_v29, %v2156_v57  ;;  %v4682_v57 = vld [vmem:[#allocation29_spill] sm:$0xff] }
0x143a   :  { %v1201_v29 = vrot.slane %v4682_v57, 7 }
0x143b   :  { %v2158_v2 = vadd.f32 %v2877_v7, %v2157_v36 }
0x143d   :  { %v2159_v58 = vadd.f32 %v2879_v61, %v2158_v2 }
0x143f   :  { %v2160_v27 = vadd.f32 %v2881_v30, %v2159_v58 }
0x1441   :  { %v2161_v13 = vadd.f32 %v2883_v48, %v2160_v27 }
0x1443   :  { %2162 = vadd.xlane.f32.xlu2 %v2161_v13 }
0x145b   :  { %1194 = vrot.lane.b32.xlu2 %v1193_v26, %s3179_s7 }
0x1462   :  { %v4435_v22 = vpop.xlane.xlu0 %2436 }
0x1463   :  { %vm2438_vm2 = vcmp.eq.f32.partialorder %v4103_v9, %v4435_v22 }
0x1464   :  { %v2439_v32 = vsel %vm2438_vm2, %v2434_v14, inf  ;;  %v4686_v14 = vld [vmem:[#allocation44_spill] sm:$0xff] }
0x1465   :  { %2440 = vmin.xlane.f32.xlu0 %v2439_v32 }
0x1479   :  { %v4440_v53 = vpop.xlane.xlu2 %2496  ;;  %1202 = vrot.lane.b32.xlu0 %v4681_v45, %s3180_s1 }
0x147a   :  { %vm2498_vm8 = vcmp.eq.f32.partialorder %v4227_v10, %v4440_v53 }
0x147b   :  { %v2499_v23 = vsel %vm2498_vm8, %v2494_v24, inf  ;;  %v4689_v24 = vld [vmem:[#allocation48_spill] sm:$0xff] }
0x147c   :  { %2500 = vmin.xlane.f32.xlu1 %v2499_v23  ;;  %v4690_v23 = vld [vmem:[#allocation51_spill] sm:$0xff] }
0x1495   :  { %1204 = vrot.lane.b32.xlu1 %v1201_v29, %s3180_s1  ;;  %v4691_v29 = vld [vmem:[#allocation52_spill] sm:$0xff] }
0x14a5   :  { %v2138_v36 = vpop.xlane.xlu1 %2137 }
0x14a6   :  { %2884 = vlog2.f32 %v2138_v36 }
0x14ac   :  { %v2885_v9 = vpop.eup %2884 }
0x14ad   :  { %v2165_v7 = vmul.f32 0.6931472, %v2885_v9 }
0x14af   :  { %v2168_v50 = vsub.f32 %v4152_v35, %v2165_v7  ;;  %v2169_v2 = vsub.f32 %v4160_v52, %v2165_v7  ;;  %v2170_v61 = vsub.f32 %v4185_v11, %v2165_v7  ;;  %v2171_v58 = vsub.f32 %v4202_v25, %v2165_v7 }
0x14b0   :  { %v2172_v30 = vsub.f32 %v4206_v8, %v2165_v7  ;;  %v2173_v10 = vsub.f32 %v4211_v55, %v2165_v7  ;;  %v2174_v27 = vsub.f32 %v4218_v6, %v2165_v7  ;;  %v2175_v48 = vsub.f32 %v4224_v18, %v2165_v7 }
0x14b1   :  { %2216 = vst [vmem:[#allocation17] sm:$0xff] %v2168_v50  ;;  %v2176_v35 = vsub.f32 %v4231_v4, %v2165_v7  ;;  %v2177_v52 = vsub.f32 %v4237_v49, %v2165_v7  ;;  %v2178_v11 = vsub.f32 %v4242_v47, %v2165_v7  ;;  %v2179_v25 = vsub.f32 %v4246_v34, %v2165_v7  ;;  %v4683_v49 = vld [vmem:[#allocation49_spill] sm:$0xff] }
0x14b2   :  { %2217 = vst [vmem:[#allocation17 + $0x8] sm:$0xff] %v2169_v2  ;;  %v2180_v8 = vsub.f32 %v4256_v17, %v2165_v7  ;;  %v2181_v6 = vsub.f32 %v4270_v43, %v2165_v7  ;;  %v2182_v18 = vsub.f32 %v4274_v21, %v2165_v7  ;;  %v2183_v4 = vsub.f32 %v4290_v51, %v2165_v7 }
0x14b3   :  { %2218 = vst [vmem:[#allocation17 + $0x10] sm:$0xff] %v2170_v61  ;;  %v2184_v47 = vsub.f32 %v4683_v49, %v2165_v7  ;;  %v2185_v34 = vsub.f32 %v4310_v39, %v2165_v7  ;;  %v2186_v17 = vsub.f32 %v4320_v20, %v2165_v7  ;;  %v2187_v43 = vsub.f32 %v4325_v5, %v2165_v7  ;;  %v4684_v20 = vld [vmem:[#allocation42_spill] sm:$0xff] }
0x14b4   :  { %2219 = vst [vmem:[#allocation17 + $0x18] sm:$0xff] %v2171_v58  ;;  %v2188_v12 = vsub.f32 %v4335_v15, %v2165_v7  ;;  %v2189_v51 = vsub.f32 %v4345_v38, %v2165_v7  ;;  %v2190_v26 = vsub.f32 %v4355_v60, %v2165_v7  ;;  %v2191_v39 = vsub.f32 %v4365_v3, %v2165_v7  ;;  %v4685_v15 = vld [vmem:[#allocation43_spill] sm:$0xff]  ;;  %v4687_v60 = vld [vmem:[#allocation46_spill] sm:$0xff] }
0x14b5   :  { %2220 = vst [vmem:[#allocation17 + $0x20] sm:$0xff] %v2172_v30  ;;  %v4688_v3 = vld [vmem:[#allocation47_spill] sm:$0xff] }
0x14b6   :  { %2221 = vst [vmem:[#allocation17 + $0x28] sm:$0xff] %v2173_v10  ;;  %v2163_v55 = vpop.xlane.xlu2 %2162 }
0x14b7   :  { %2222 = vst [vmem:[#allocation17 + $0x30] sm:$0xff] %v2174_v27  ;;  %2886 = vlog2.f32 %v2163_v55 }
0x14b8   :  { %2223 = vst [vmem:[#allocation17 + $0x38] sm:$0xff] %v2175_v48 }
0x14b9   :  { %2224 = vst [vmem:[#allocation17 + $0x40] sm:$0xff] %v2176_v35 }
0x14ba   :  { %2225 = vst [vmem:[#allocation17 + $0x48] sm:$0xff] %v2177_v52 }
0x14bb   :  { %2226 = vst [vmem:[#allocation17 + $0x50] sm:$0xff] %v2178_v11 }
0x14bc   :  { %2227 = vst [vmem:[#allocation17 + $0x58] sm:$0xff] %v2179_v25 }
0x14bd   :  { %2228 = vst [vmem:[#allocation17 + $0x60] sm:$0xff] %v2180_v8  ;;  %v2887_v13 = vpop.eup %2886 }
0x14be   :  { %2229 = vst [vmem:[#allocation17 + $0x68] sm:$0xff] %v2181_v6  ;;  %v4467_v21 = vmul.f32 0.6931472, %v2887_v13 }
0x14bf   :  { %2230 = vst [vmem:[#allocation17 + $0x70] sm:$0xff] %v2182_v18 }
0x14c0   :  { %2231 = vst [vmem:[#allocation17 + $0x78] sm:$0xff] %v2183_v4  ;;  %v2192_v5 = vsub.f32 %v4684_v20, %v4467_v21  ;;  %v2193_v0 = vsub.f32 %v4685_v15, %v4467_v21  ;;  %v2194_v38 = vsub.f32 %v4686_v14, %v4467_v21  ;;  %v2195_v32 = vsub.f32 %v4687_v60, %v4467_v21 }
0x14c1   :  { %2232 = vst [vmem:[#allocation17 + $0x80] sm:$0xff] %v2184_v47  ;;  %v2196_v44 = vsub.f32 %v4688_v3, %v4467_v21  ;;  %v2197_v45 = vsub.f32 %v4689_v24, %v4467_v21  ;;  %v2198_v57 = vsub.f32 %v4690_v23, %v4467_v21  ;;  %v2199_v36 = vsub.f32 %v4691_v29, %v4467_v21 }
0x14c2   :  { %2233 = vst [vmem:[#allocation17 + $0x88] sm:$0xff] %v2185_v34  ;;  %v2200_v9 = vsub.f32 %v4329_v37, %v4467_v21  ;;  %v2201_v7 = vsub.f32 %v4339_v54, %v4467_v21  ;;  %v2202_v50 = vsub.f32 %v4349_v56, %v4467_v21  ;;  %v2203_v2 = vsub.f32 %v4359_v59, %v4467_v21 }
0x14c3   :  { %2234 = vst [vmem:[#allocation17 + $0x90] sm:$0xff] %v2186_v17  ;;  %v2204_v61 = vsub.f32 %v4369_v19, %v4467_v21  ;;  %v2205_v37 = vsub.f32 %v4375_v42, %v4467_v21  ;;  %v2206_v54 = vsub.f32 %v4381_v1, %v4467_v21  ;;  %v2207_v56 = vsub.f32 %v4387_v28, %v4467_v21 }
0x14c4   :  { %2235 = vst [vmem:[#allocation17 + $0x98] sm:$0xff] %v2187_v43  ;;  %v2208_v59 = vsub.f32 %v4392_v41, %v4467_v21  ;;  %v2209_v19 = vsub.f32 %v4397_v16, %v4467_v21  ;;  %v2210_v42 = vsub.f32 %v4402_v63, %v4467_v21  ;;  %v2443_v1 = vcvt.f32.s32 %v4435_v22 }
0x14c5   :  { %2236 = vst [vmem:[#allocation17 + $0xa0] sm:$0xff] %v2188_v12  ;;  %v2211_v30 = vsub.f32 %v4407_v31, %v4467_v21  ;;  %v2212_v28 = vsub.f32 %v4412_v62, %v4467_v21  ;;  %v2213_v41 = vsub.f32 %v4417_v46, %v4467_v21  ;;  %v2214_v63 = vsub.f32 %v4422_v33, %v4467_v21  ;;  %v1195_v46 = vpop.permute.xlu2 %1194 }
0x14c6   :  { %2237 = vst [vmem:[#allocation17 + $0xa8] sm:$0xff] %v2189_v51  ;;  %v2444_v31 = vshll.u32 %v2443_v1, 16  ;;  %v2215_v62 = vsub.f32 %v4427_v40, %v4467_v21  ;;  %v2503_v22 = vcvt.f32.s32 %v4440_v53 }
0x14c7   :  { %2238 = vst [vmem:[#allocation17 + $0xb0] sm:$0xff] %v2190_v26 }
0x14c8   :  { %2240 = vst.msk [vmem:[#allocation17 + $0xb8] sm:$0xff] %vm2239_vm9, %v2191_v39  ;;  %v2504_v27 = vshll.u32 %v2503_v22, 16 }
0x14c9   :  { %2241 = vst [vmem:[#allocation17 + $0xc0] sm:$0xff] %v2192_v5 }
0x14ca   :  { %2242 = vst [vmem:[#allocation17 + $0xc8] sm:$0xff] %v2193_v0 }
0x14cb   :  { %2243 = vst [vmem:[#allocation17 + $0xd0] sm:$0xff] %v2194_v38 }
0x14cc   :  { %2244 = vst [vmem:[#allocation17 + $0xd8] sm:$0xff] %v2195_v32 }
0x14cd   :  { %2245 = vst [vmem:[#allocation17 + $0xe0] sm:$0xff] %v2196_v44 }
0x14ce   :  { %2246 = vst [vmem:[#allocation17 + $0xe8] sm:$0xff] %v2197_v45 }
0x14cf   :  { %2247 = vst [vmem:[#allocation17 + $0xf0] sm:$0xff] %v2198_v57 }
0x14d0   :  { %2248 = vst [vmem:[#allocation17 + $0xf8] sm:$0xff] %v2199_v36 }
0x14d1   :  { %2249 = vst [vmem:[#allocation17 + $0x100] sm:$0xff] %v2200_v9 }
0x14d2   :  { %2250 = vst [vmem:[#allocation17 + $0x108] sm:$0xff] %v2201_v7 }
0x14d3   :  { %2251 = vst [vmem:[#allocation17 + $0x110] sm:$0xff] %v2202_v50 }
0x14d4   :  { %2252 = vst [vmem:[#allocation17 + $0x118] sm:$0xff] %v2203_v2 }
0x14d5   :  { %2253 = vst [vmem:[#allocation17 + $0x120] sm:$0xff] %v2204_v61 }
0x14d6   :  { %2254 = vst [vmem:[#allocation17 + $0x128] sm:$0xff] %v2205_v37 }
0x14d7   :  { %2255 = vst [vmem:[#allocation17 + $0x130] sm:$0xff] %v2206_v54 }
0x14d8   :  { %v2441_v58 = vpop.xlane.xlu0 %2440  ;;  %2256 = vst [vmem:[#allocation17 + $0x138] sm:$0xff] %v2207_v56 }
0x14d9   :  { %2257 = vst [vmem:[#allocation17 + $0x140] sm:$0xff] %v2208_v59  ;;  %v2442_v16 = vcvt.f32.s32 %v2441_v58 }
0x14da   :  { %2258 = vst [vmem:[#allocation17 + $0x148] sm:$0xff] %v2209_v19 }
0x14db   :  { %2259 = vst [vmem:[#allocation17 + $0x150] sm:$0xff] %v2210_v42  ;;  %v2445_v33 = vadd.s32 %v2444_v31, %v2442_v16 }
0x14dc   :  { %2260 = vst [vmem:[#allocation17 + $0x158] sm:$0xff] %v2211_v30 }
0x14dd   :  { %2261 = vst [vmem:[#allocation17 + $0x160] sm:$0xff] %v2212_v28 }
0x14de   :  { %2262 = vst [vmem:[#allocation17 + $0x168] sm:$0xff] %v2213_v41 }
0x14df   :  { %2263 = vst [vmem:[#allocation17 + $0x170] sm:$0xff] %v2214_v63 }
0x14e0   :  { %2264 = vst.msk [vmem:[#allocation17 + $0x178] sm:$0xff] %vm2239_vm9, %v2215_v62 }
0x14e1   :  { %1198 = vst.msk [vmem:[#allocation18 + $0x1] sm:$0x1] %vm4692_vm6, %v1195_v46  ;;  %2521 = dma.vmem_to_hbm [thread:$0]  %s2514_s17, 6144, %s2516_s5, [#allocation5], %s3175_s14, %s3175_s14, %s3176_s15  }
0x14e2   :  { %2507 = vst.msk [vmem:[%s4554_s9] sm:$0xff] %vm2506_vm7, %v2445_v33  ;;  %2534 = dma.vmem_to_hbm [thread:$0]  %s2530_s21, 32, %s2532_s0, [#allocation19]  }
0x14eb   :  { %v1203_v40 = vpop.permute.xlu0 %1202 }
0x14ec   :  { %1208 = vst.msk [vmem:[#allocation20 - $0x7] sm:$0x80] %vm4693_vm4, %v1203_v40 }
0x14ef   :  { %v2501_v10 = vpop.xlane.xlu1 %2500 }
0x14f0   :  { %v2502_v48 = vcvt.f32.s32 %v2501_v10 }
0x14f2   :  { %v2505_v35 = vadd.s32 %v2504_v27, %v2502_v48 }
0x14f4   :  { %2508 = vst.msk [vmem:[%s4554_s9 + $0x8] sm:$0xff] %vm2506_vm7, %v2505_v35 }
0x1507   :  { %v1205_v52 = vpop.permute.xlu1 %1204 }
0x1508   :  { %1209 = vst.msk [vmem:[#allocation20 + $0x1] sm:$0x1] %vm4694_vm10, %v1205_v52 }
0x1509   :  { %2545 = dma.vmem_to_hbm [thread:$0]  %s2541_s27, 32, %s2543_s29, [#allocation19]  }
0x150a   :  { %3162 = dma.done.wait [#allocation5], 6144  }
0x150b   :  { %3163 = vsyncadd [#allocation5], 4294961152 }
0x150c   :  { %3164 = dma.done.wait [#allocation19], 64  }
0x150d   :  { %3165 = vsyncadd [#allocation19], 4294967232 }
0x150e   :  { %2560 = vsyncpa [#allocation4], 1 }
0x150f   :  { %2561 = vsyncpa [#allocation7], 1 }
0x1510   :  { %2562 = vsyncpa [#allocation10], 1 }
0x1511   :  { %2563 = vsyncpa [#allocation13], 1 }
0x1512   :  { %2564 = vsyncpa [#allocation16], 1 }
0x1513   :  { %2565 = vsyncpa [#allocation5], 1 }
0x1514   :  { %2566 = vsyncpa [#allocation19], 1 }

</bundles_post_ra>
